<compile_context>
chip_gen: v7x
topology: tpu7x:2x2x1
jax: 0.10.0
libtpu: 0.0.40
codegen_flags: <defaults>
</compile_context>

<pallas_src>
import jax
import jax.numpy as jnp
from jax import lax
from jax.experimental import pallas as pl
from jax.experimental.pallas import tpu as pltpu

# ----- deterministic "module" parameters (IzhNodeMU init / globals) -----------
PARAM_THRESHOLD = 30.0   # spike threshold (mV)
PARAM_A         = 0.02
PARAM_B         = 0.2
PARAM_C         = -65.0  # reset potential
PARAM_D         = 8.0
PARAM_MEM       = -70.0  # initial membrane potential
PARAM_U         = -14.0  # initial recovery variable (b * mem)
PARAM_DT        = 0.5
I_MAX           = 20.0
SIMULATION_TIME = 64
NUM_NEURON      = 128

_LANES         = 128
_SUBLANES      = 8
_MAX_TILE_ROWS = 512     # 512x128 f32 = 256 KiB per in/out tile (fits v5e/v6e/v7x)

# ---- strength-reduced constants; state carried as (mem, v=dt*u, acc) ---------
# mem_new = mem + dt*(0.04*mem^2 + 5*mem + 140 - u + I)
#         = mem*(C_MEM_LIN + C_MEM_QUAD*mem) + (i_eff - v),  i_eff = dt*(I+140)
_C_MEM_LIN  = 1.0 + 5.0 * PARAM_DT
_C_MEM_QUAD = 0.04 * PARAM_DT
# u_new = u + dt*a*(b*mem_new - u)  =>  v_new = C_U_DECAY*v + C_V_MEM*mem_new
_C_U_DECAY  = 1.0 - PARAM_DT * PARAM_A
_C_V_MEM    = PARAM_DT * PARAM_DT * PARAM_A * PARAM_B
# u += spike*d  =>  v += spike*(dt*d)
_C_V_SPIKE  = PARAM_DT * PARAM_D
_V0         = PARAM_DT * PARAM_U


def _vnet_kernel(inp_ref, out_ref):
    # Current injected into every neuron: round(input * I_max)
    I = jnp.round(inp_ref[...] * I_MAX)
    i_eff = PARAM_DT * (I + 140.0)           # per-neuron, computed once

    mem0 = jnp.full_like(I, PARAM_MEM)
    v0   = jnp.full_like(I, _V0)             # v = dt * u
    acc0 = jnp.zeros_like(I)

    def step(_, carry):
        mem, v, acc = carry
        # Izhikevich integration (constant-folded; same math as BrainCog IzhNode)
        mem_new = mem * (_C_MEM_LIN + _C_MEM_QUAD * mem) + (i_eff - v)
        v_new   = _C_U_DECAY * v + _C_V_MEM * mem_new   # uses freshly updated mem
        # Spike + reset (hard heaviside forward); vselects for spike/reset.
        spike_b = mem_new > PARAM_THRESHOLD
        spike_f = jnp.where(spike_b, 1.0, 0.0)
        mem     = jnp.where(spike_b, PARAM_C, mem_new)
        v       = v_new + spike_f * _C_V_SPIKE
        acc     = acc + spike_f
        return mem, v, acc

    # Full unroll: ~14 VPU ops/step x 64 steps, live state ~5 vregs/row-tile chunk.
    _, _, acc = lax.fori_loop(0, SIMULATION_TIME, step, (mem0, v0, acc0),
                              unroll=True)

    # Firing rate over the simulation window
    out_ref[...] = acc * (1.0 / SIMULATION_TIME)


def vnet_forward(x):
    """x: f32[..., num_neuron] (or any shape) with values in [0, 1].
    Returns the firing rate FR_n with the same shape."""
    orig_shape = x.shape
    xf = jnp.asarray(x, jnp.float32).reshape(-1)
    n = int(xf.shape[0])

    # Pack neurons densely into (rows, 128) so every lane/sublane is live, then
    # pad rows up to a multiple of the row tile (padded neurons get input 0 ->
    # I=0, which is the resting fixed point: they never spike and are sliced off).
    rows        = pl.cdiv(n, _LANES)
    rows_padded = max(_SUBLANES, pl.cdiv(rows, _SUBLANES) * _SUBLANES)
    tile_rows   = min(rows_padded, _MAX_TILE_ROWS)
    rows_padded = pl.cdiv(rows_padded, tile_rows) * tile_rows
    padded      = rows_padded * _LANES

    if padded != n:
        xf = jnp.zeros((padded,), jnp.float32).at[:n].set(xf)
    x2d = xf.reshape(rows_padded, _LANES)

    grid = (rows_padded // tile_rows,)
    cost = pl.CostEstimate(
        flops=16 * padded * SIMULATION_TIME,   # ~14-16 VPU ops / neuron / step
        transcendentals=0,
        bytes_accessed=2 * padded * 4,         # one f32 read + one f32 write
    )

    out = pl.pallas_call(
        _vnet_kernel,
        out_shape=jax.ShapeDtypeStruct((rows_padded, _LANES), jnp.float32),
        grid=grid,
        in_specs=[pl.BlockSpec((tile_rows, _LANES), lambda i: (i, 0))],
        out_specs=pl.BlockSpec((tile_rows, _LANES), lambda i: (i, 0)),
        compiler_params=pltpu.CompilerParams(
            dimension_semantics=("parallel",)),   # megacore split on v7x
        cost_estimate=cost,
    )(x2d)

    return out.reshape(padded)[:n].reshape(orig_shape)


if __name__ == "__main__":
    key = jax.random.PRNGKey(0)
    B = 8                                              # batch of independent samples
    x = jax.random.uniform(key, (B, NUM_NEURON), dtype=jnp.float32)  # inputs in [0, 1)
    fr = vnet_forward(x)
    jax.block_until_ready(fr)
    assert fr.shape == (B, NUM_NEURON)
    assert bool(jnp.all(fr >= 0.0)) and bool(jnp.all(fr <= 1.0))
    print("KERNEL_OK")
</pallas_src>

<mosaic_0001>
module attributes {stable_mosaic.version = 11 : i64} {
  func.func @_vnet_kernel(%arg0: i32, %arg1: memref<8x128xf32, #tpu.memory_space<vmem>>, %arg2: memref<8x128xf32, #tpu.memory_space<vmem>>) attributes {dimension_semantics = [#tpu.dimension_semantics<parallel>], iteration_bounds = array<i64: 1>, scalar_prefetch = 0 : i64, scratch_operands = 0 : i64, tpu.core_type = #tpu.core_type<tc>, window_params = [{transform_indices = @transform_0, window_bounds = array<i64: 8, 128>}, {transform_indices = @transform_1, window_bounds = array<i64: 8, 128>}]} {
    %c0 = arith.constant 0 : index
    %c0_0 = arith.constant 0 : index
    %0 = vector.load %arg1[%c0, %c0_0] : memref<8x128xf32, #tpu.memory_space<vmem>>, vector<8x128xf32>
    %cst = arith.constant 2.000000e+01 : f32
    %1 = vector.broadcast %cst : f32 to vector<8x128xf32>
    %2 = arith.mulf %0, %1 : vector<8x128xf32>
    %3 = math.roundeven %2 : vector<8x128xf32>
    %cst_1 = arith.constant 1.400000e+02 : f32
    %4 = vector.broadcast %cst_1 : f32 to vector<8x128xf32>
    %5 = arith.addf %3, %4 : vector<8x128xf32>
    %cst_2 = arith.constant 5.000000e-01 : f32
    %6 = vector.broadcast %cst_2 : f32 to vector<8x128xf32>
    %7 = arith.mulf %6, %5 : vector<8x128xf32>
    %cst_3 = arith.constant -7.000000e+01 : f32
    %8 = vector.broadcast %cst_3 : f32 to vector<8x128xf32>
    %cst_4 = arith.constant -7.000000e+00 : f32
    %9 = vector.broadcast %cst_4 : f32 to vector<8x128xf32>
    %cst_5 = arith.constant 0.000000e+00 : f32
    %10 = vector.broadcast %cst_5 : f32 to vector<8x128xf32>
    %c0_i32 = arith.constant 0 : i32
    %cst_6 = arith.constant 2.000000e-02 : f32
    %11 = vector.broadcast %cst_6 : f32 to vector<8x128xf32>
    %12 = arith.mulf %11, %8 : vector<8x128xf32>
    %cst_7 = arith.constant 3.500000e+00 : f32
    %13 = vector.broadcast %cst_7 : f32 to vector<8x128xf32>
    %14 = arith.addf %13, %12 : vector<8x128xf32>
    %15 = arith.mulf %8, %14 : vector<8x128xf32>
    %16 = arith.subf %7, %9 : vector<8x128xf32>
    %17 = arith.addf %15, %16 : vector<8x128xf32>
    %cst_8 = arith.constant 9.900000e-01 : f32
    %18 = vector.broadcast %cst_8 : f32 to vector<8x128xf32>
    %19 = arith.mulf %18, %9 : vector<8x128xf32>
    %cst_9 = arith.constant 1.000000e-03 : f32
    %20 = vector.broadcast %cst_9 : f32 to vector<8x128xf32>
    %21 = arith.mulf %20, %17 : vector<8x128xf32>
    %22 = arith.addf %19, %21 : vector<8x128xf32>
    %cst_10 = arith.constant 3.000000e+01 : f32
    %23 = vector.broadcast %cst_10 : f32 to vector<8x128xf32>
    %24 = arith.cmpf ogt, %17, %23 : vector<8x128xf32>
    %cst_11 = arith.constant 1.000000e+00 : f32
    %cst_12 = arith.constant 0.000000e+00 : f32
    %25 = vector.broadcast %cst_11 : f32 to vector<8x128xf32>
    %26 = vector.broadcast %cst_12 : f32 to vector<8x128xf32>
    %27 = arith.select %24, %25, %26 : vector<8x128xi1>, vector<8x128xf32>
    %cst_13 = arith.constant -6.500000e+01 : f32
    %28 = vector.broadcast %cst_13 : f32 to vector<8x128xf32>
    %29 = arith.select %24, %28, %17 : vector<8x128xi1>, vector<8x128xf32>
    %cst_14 = arith.constant 4.000000e+00 : f32
    %30 = vector.broadcast %cst_14 : f32 to vector<8x128xf32>
    %31 = arith.mulf %27, %30 : vector<8x128xf32>
    %32 = arith.addf %22, %31 : vector<8x128xf32>
    %33 = arith.addf %10, %27 : vector<8x128xf32>
    %c1_i32 = arith.constant 1 : i32
    %cst_15 = arith.constant 2.000000e-02 : f32
    %34 = vector.broadcast %cst_15 : f32 to vector<8x128xf32>
    %35 = arith.mulf %34, %29 : vector<8x128xf32>
    %cst_16 = arith.constant 3.500000e+00 : f32
    %36 = vector.broadcast %cst_16 : f32 to vector<8x128xf32>
    %37 = arith.addf %36, %35 : vector<8x128xf32>
    %38 = arith.mulf %29, %37 : vector<8x128xf32>
    %39 = arith.subf %7, %32 : vector<8x128xf32>
    %40 = arith.addf %38, %39 : vector<8x128xf32>
    %cst_17 = arith.constant 9.900000e-01 : f32
    %41 = vector.broadcast %cst_17 : f32 to vector<8x128xf32>
    %42 = arith.mulf %41, %32 : vector<8x128xf32>
    %cst_18 = arith.constant 1.000000e-03 : f32
    %43 = vector.broadcast %cst_18 : f32 to vector<8x128xf32>
    %44 = arith.mulf %43, %40 : vector<8x128xf32>
    %45 = arith.addf %42, %44 : vector<8x128xf32>
    %cst_19 = arith.constant 3.000000e+01 : f32
    %46 = vector.broadcast %cst_19 : f32 to vector<8x128xf32>
    %47 = arith.cmpf ogt, %40, %46 : vector<8x128xf32>
    %cst_20 = arith.constant 1.000000e+00 : f32
    %cst_21 = arith.constant 0.000000e+00 : f32
    %48 = vector.broadcast %cst_20 : f32 to vector<8x128xf32>
    %49 = vector.broadcast %cst_21 : f32 to vector<8x128xf32>
    %50 = arith.select %47, %48, %49 : vector<8x128xi1>, vector<8x128xf32>
    %cst_22 = arith.constant -6.500000e+01 : f32
    %51 = vector.broadcast %cst_22 : f32 to vector<8x128xf32>
    %52 = arith.select %47, %51, %40 : vector<8x128xi1>, vector<8x128xf32>
    %cst_23 = arith.constant 4.000000e+00 : f32
    %53 = vector.broadcast %cst_23 : f32 to vector<8x128xf32>
    %54 = arith.mulf %50, %53 : vector<8x128xf32>
    %55 = arith.addf %45, %54 : vector<8x128xf32>
    %56 = arith.addf %33, %50 : vector<8x128xf32>
    %c2_i32 = arith.constant 2 : i32
    %cst_24 = arith.constant 2.000000e-02 : f32
    %57 = vector.broadcast %cst_24 : f32 to vector<8x128xf32>
    %58 = arith.mulf %57, %52 : vector<8x128xf32>
    %cst_25 = arith.constant 3.500000e+00 : f32
    %59 = vector.broadcast %cst_25 : f32 to vector<8x128xf32>
    %60 = arith.addf %59, %58 : vector<8x128xf32>
    %61 = arith.mulf %52, %60 : vector<8x128xf32>
    %62 = arith.subf %7, %55 : vector<8x128xf32>
    %63 = arith.addf %61, %62 : vector<8x128xf32>
    %cst_26 = arith.constant 9.900000e-01 : f32
    %64 = vector.broadcast %cst_26 : f32 to vector<8x128xf32>
    %65 = arith.mulf %64, %55 : vector<8x128xf32>
    %cst_27 = arith.constant 1.000000e-03 : f32
    %66 = vector.broadcast %cst_27 : f32 to vector<8x128xf32>
    %67 = arith.mulf %66, %63 : vector<8x128xf32>
    %68 = arith.addf %65, %67 : vector<8x128xf32>
    %cst_28 = arith.constant 3.000000e+01 : f32
    %69 = vector.broadcast %cst_28 : f32 to vector<8x128xf32>
    %70 = arith.cmpf ogt, %63, %69 : vector<8x128xf32>
    %cst_29 = arith.constant 1.000000e+00 : f32
    %cst_30 = arith.constant 0.000000e+00 : f32
    %71 = vector.broadcast %cst_29 : f32 to vector<8x128xf32>
    %72 = vector.broadcast %cst_30 : f32 to vector<8x128xf32>
    %73 = arith.select %70, %71, %72 : vector<8x128xi1>, vector<8x128xf32>
    %cst_31 = arith.constant -6.500000e+01 : f32
    %74 = vector.broadcast %cst_31 : f32 to vector<8x128xf32>
    %75 = arith.select %70, %74, %63 : vector<8x128xi1>, vector<8x128xf32>
    %cst_32 = arith.constant 4.000000e+00 : f32
    %76 = vector.broadcast %cst_32 : f32 to vector<8x128xf32>
    %77 = arith.mulf %73, %76 : vector<8x128xf32>
    %78 = arith.addf %68, %77 : vector<8x128xf32>
    %79 = arith.addf %56, %73 : vector<8x128xf32>
    %c3_i32 = arith.constant 3 : i32
    %cst_33 = arith.constant 2.000000e-02 : f32
    %80 = vector.broadcast %cst_33 : f32 to vector<8x128xf32>
    %81 = arith.mulf %80, %75 : vector<8x128xf32>
    %cst_34 = arith.constant 3.500000e+00 : f32
    %82 = vector.broadcast %cst_34 : f32 to vector<8x128xf32>
    %83 = arith.addf %82, %81 : vector<8x128xf32>
    %84 = arith.mulf %75, %83 : vector<8x128xf32>
    %85 = arith.subf %7, %78 : vector<8x128xf32>
    %86 = arith.addf %84, %85 : vector<8x128xf32>
    %cst_35 = arith.constant 9.900000e-01 : f32
    %87 = vector.broadcast %cst_35 : f32 to vector<8x128xf32>
    %88 = arith.mulf %87, %78 : vector<8x128xf32>
    %cst_36 = arith.constant 1.000000e-03 : f32
    %89 = vector.broadcast %cst_36 : f32 to vector<8x128xf32>
    %90 = arith.mulf %89, %86 : vector<8x128xf32>
    %91 = arith.addf %88, %90 : vector<8x128xf32>
    %cst_37 = arith.constant 3.000000e+01 : f32
    %92 = vector.broadcast %cst_37 : f32 to vector<8x128xf32>
    %93 = arith.cmpf ogt, %86, %92 : vector<8x128xf32>
    %cst_38 = arith.constant 1.000000e+00 : f32
    %cst_39 = arith.constant 0.000000e+00 : f32
    %94 = vector.broadcast %cst_38 : f32 to vector<8x128xf32>
    %95 = vector.broadcast %cst_39 : f32 to vector<8x128xf32>
    %96 = arith.select %93, %94, %95 : vector<8x128xi1>, vector<8x128xf32>
    %cst_40 = arith.constant -6.500000e+01 : f32
    %97 = vector.broadcast %cst_40 : f32 to vector<8x128xf32>
    %98 = arith.select %93, %97, %86 : vector<8x128xi1>, vector<8x128xf32>
    %cst_41 = arith.constant 4.000000e+00 : f32
    %99 = vector.broadcast %cst_41 : f32 to vector<8x128xf32>
    %100 = arith.mulf %96, %99 : vector<8x128xf32>
    %101 = arith.addf %91, %100 : vector<8x128xf32>
    %102 = arith.addf %79, %96 : vector<8x128xf32>
    %c4_i32 = arith.constant 4 : i32
    %cst_42 = arith.constant 2.000000e-02 : f32
    %103 = vector.broadcast %cst_42 : f32 to vector<8x128xf32>
    %104 = arith.mulf %103, %98 : vector<8x128xf32>
    %cst_43 = arith.constant 3.500000e+00 : f32
    %105 = vector.broadcast %cst_43 : f32 to vector<8x128xf32>
    %106 = arith.addf %105, %104 : vector<8x128xf32>
    %107 = arith.mulf %98, %106 : vector<8x128xf32>
    %108 = arith.subf %7, %101 : vector<8x128xf32>
    %109 = arith.addf %107, %108 : vector<8x128xf32>
    %cst_44 = arith.constant 9.900000e-01 : f32
    %110 = vector.broadcast %cst_44 : f32 to vector<8x128xf32>
    %111 = arith.mulf %110, %101 : vector<8x128xf32>
    %cst_45 = arith.constant 1.000000e-03 : f32
    %112 = vector.broadcast %cst_45 : f32 to vector<8x128xf32>
    %113 = arith.mulf %112, %109 : vector<8x128xf32>
    %114 = arith.addf %111, %113 : vector<8x128xf32>
    %cst_46 = arith.constant 3.000000e+01 : f32
    %115 = vector.broadcast %cst_46 : f32 to vector<8x128xf32>
    %116 = arith.cmpf ogt, %109, %115 : vector<8x128xf32>
    %cst_47 = arith.constant 1.000000e+00 : f32
    %cst_48 = arith.constant 0.000000e+00 : f32
    %117 = vector.broadcast %cst_47 : f32 to vector<8x128xf32>
    %118 = vector.broadcast %cst_48 : f32 to vector<8x128xf32>
    %119 = arith.select %116, %117, %118 : vector<8x128xi1>, vector<8x128xf32>
    %cst_49 = arith.constant -6.500000e+01 : f32
    %120 = vector.broadcast %cst_49 : f32 to vector<8x128xf32>
    %121 = arith.select %116, %120, %109 : vector<8x128xi1>, vector<8x128xf32>
    %cst_50 = arith.constant 4.000000e+00 : f32
    %122 = vector.broadcast %cst_50 : f32 to vector<8x128xf32>
    %123 = arith.mulf %119, %122 : vector<8x128xf32>
    %124 = arith.addf %114, %123 : vector<8x128xf32>
    %125 = arith.addf %102, %119 : vector<8x128xf32>
    %c5_i32 = arith.constant 5 : i32
    %cst_51 = arith.constant 2.000000e-02 : f32
    %126 = vector.broadcast %cst_51 : f32 to vector<8x128xf32>
    %127 = arith.mulf %126, %121 : vector<8x128xf32>
    %cst_52 = arith.constant 3.500000e+00 : f32
    %128 = vector.broadcast %cst_52 : f32 to vector<8x128xf32>
    %129 = arith.addf %128, %127 : vector<8x128xf32>
    %130 = arith.mulf %121, %129 : vector<8x128xf32>
    %131 = arith.subf %7, %124 : vector<8x128xf32>
    %132 = arith.addf %130, %131 : vector<8x128xf32>
    %cst_53 = arith.constant 9.900000e-01 : f32
    %133 = vector.broadcast %cst_53 : f32 to vector<8x128xf32>
    %134 = arith.mulf %133, %124 : vector<8x128xf32>
    %cst_54 = arith.constant 1.000000e-03 : f32
    %135 = vector.broadcast %cst_54 : f32 to vector<8x128xf32>
    %136 = arith.mulf %135, %132 : vector<8x128xf32>
    %137 = arith.addf %134, %136 : vector<8x128xf32>
    %cst_55 = arith.constant 3.000000e+01 : f32
    %138 = vector.broadcast %cst_55 : f32 to vector<8x128xf32>
    %139 = arith.cmpf ogt, %132, %138 : vector<8x128xf32>
    %cst_56 = arith.constant 1.000000e+00 : f32
    %cst_57 = arith.constant 0.000000e+00 : f32
    %140 = vector.broadcast %cst_56 : f32 to vector<8x128xf32>
    %141 = vector.broadcast %cst_57 : f32 to vector<8x128xf32>
    %142 = arith.select %139, %140, %141 : vector<8x128xi1>, vector<8x128xf32>
    %cst_58 = arith.constant -6.500000e+01 : f32
    %143 = vector.broadcast %cst_58 : f32 to vector<8x128xf32>
    %144 = arith.select %139, %143, %132 : vector<8x128xi1>, vector<8x128xf32>
    %cst_59 = arith.constant 4.000000e+00 : f32
    %145 = vector.broadcast %cst_59 : f32 to vector<8x128xf32>
    %146 = arith.mulf %142, %145 : vector<8x128xf32>
    %147 = arith.addf %137, %146 : vector<8x128xf32>
    %148 = arith.addf %125, %142 : vector<8x128xf32>
    %c6_i32 = arith.constant 6 : i32
    %cst_60 = arith.constant 2.000000e-02 : f32
    %149 = vector.broadcast %cst_60 : f32 to vector<8x128xf32>
    %150 = arith.mulf %149, %144 : vector<8x128xf32>
    %cst_61 = arith.constant 3.500000e+00 : f32
    %151 = vector.broadcast %cst_61 : f32 to vector<8x128xf32>
    %152 = arith.addf %151, %150 : vector<8x128xf32>
    %153 = arith.mulf %144, %152 : vector<8x128xf32>
    %154 = arith.subf %7, %147 : vector<8x128xf32>
    %155 = arith.addf %153, %154 : vector<8x128xf32>
    %cst_62 = arith.constant 9.900000e-01 : f32
    %156 = vector.broadcast %cst_62 : f32 to vector<8x128xf32>
    %157 = arith.mulf %156, %147 : vector<8x128xf32>
    %cst_63 = arith.constant 1.000000e-03 : f32
    %158 = vector.broadcast %cst_63 : f32 to vector<8x128xf32>
    %159 = arith.mulf %158, %155 : vector<8x128xf32>
    %160 = arith.addf %157, %159 : vector<8x128xf32>
    %cst_64 = arith.constant 3.000000e+01 : f32
    %161 = vector.broadcast %cst_64 : f32 to vector<8x128xf32>
    %162 = arith.cmpf ogt, %155, %161 : vector<8x128xf32>
    %cst_65 = arith.constant 1.000000e+00 : f32
    %cst_66 = arith.constant 0.000000e+00 : f32
    %163 = vector.broadcast %cst_65 : f32 to vector<8x128xf32>
    %164 = vector.broadcast %cst_66 : f32 to vector<8x128xf32>
    %165 = arith.select %162, %163, %164 : vector<8x128xi1>, vector<8x128xf32>
    %cst_67 = arith.constant -6.500000e+01 : f32
    %166 = vector.broadcast %cst_67 : f32 to vector<8x128xf32>
    %167 = arith.select %162, %166, %155 : vector<8x128xi1>, vector<8x128xf32>
    %cst_68 = arith.constant 4.000000e+00 : f32
    %168 = vector.broadcast %cst_68 : f32 to vector<8x128xf32>
    %169 = arith.mulf %165, %168 : vector<8x128xf32>
    %170 = arith.addf %160, %169 : vector<8x128xf32>
    %171 = arith.addf %148, %165 : vector<8x128xf32>
    %c7_i32 = arith.constant 7 : i32
    %cst_69 = arith.constant 2.000000e-02 : f32
    %172 = vector.broadcast %cst_69 : f32 to vector<8x128xf32>
    %173 = arith.mulf %172, %167 : vector<8x128xf32>
    %cst_70 = arith.constant 3.500000e+00 : f32
    %174 = vector.broadcast %cst_70 : f32 to vector<8x128xf32>
    %175 = arith.addf %174, %173 : vector<8x128xf32>
    %176 = arith.mulf %167, %175 : vector<8x128xf32>
    %177 = arith.subf %7, %170 : vector<8x128xf32>
    %178 = arith.addf %176, %177 : vector<8x128xf32>
    %cst_71 = arith.constant 9.900000e-01 : f32
    %179 = vector.broadcast %cst_71 : f32 to vector<8x128xf32>
    %180 = arith.mulf %179, %170 : vector<8x128xf32>
    %cst_72 = arith.constant 1.000000e-03 : f32
    %181 = vector.broadcast %cst_72 : f32 to vector<8x128xf32>
    %182 = arith.mulf %181, %178 : vector<8x128xf32>
    %183 = arith.addf %180, %182 : vector<8x128xf32>
    %cst_73 = arith.constant 3.000000e+01 : f32
    %184 = vector.broadcast %cst_73 : f32 to vector<8x128xf32>
    %185 = arith.cmpf ogt, %178, %184 : vector<8x128xf32>
    %cst_74 = arith.constant 1.000000e+00 : f32
    %cst_75 = arith.constant 0.000000e+00 : f32
    %186 = vector.broadcast %cst_74 : f32 to vector<8x128xf32>
    %187 = vector.broadcast %cst_75 : f32 to vector<8x128xf32>
    %188 = arith.select %185, %186, %187 : vector<8x128xi1>, vector<8x128xf32>
    %cst_76 = arith.constant -6.500000e+01 : f32
    %189 = vector.broadcast %cst_76 : f32 to vector<8x128xf32>
    %190 = arith.select %185, %189, %178 : vector<8x128xi1>, vector<8x128xf32>
    %cst_77 = arith.constant 4.000000e+00 : f32
    %191 = vector.broadcast %cst_77 : f32 to vector<8x128xf32>
    %192 = arith.mulf %188, %191 : vector<8x128xf32>
    %193 = arith.addf %183, %192 : vector<8x128xf32>
    %194 = arith.addf %171, %188 : vector<8x128xf32>
    %c8_i32 = arith.constant 8 : i32
    %cst_78 = arith.constant 2.000000e-02 : f32
    %195 = vector.broadcast %cst_78 : f32 to vector<8x128xf32>
    %196 = arith.mulf %195, %190 : vector<8x128xf32>
    %cst_79 = arith.constant 3.500000e+00 : f32
    %197 = vector.broadcast %cst_79 : f32 to vector<8x128xf32>
    %198 = arith.addf %197, %196 : vector<8x128xf32>
    %199 = arith.mulf %190, %198 : vector<8x128xf32>
    %200 = arith.subf %7, %193 : vector<8x128xf32>
    %201 = arith.addf %199, %200 : vector<8x128xf32>
    %cst_80 = arith.constant 9.900000e-01 : f32
    %202 = vector.broadcast %cst_80 : f32 to vector<8x128xf32>
    %203 = arith.mulf %202, %193 : vector<8x128xf32>
    %cst_81 = arith.constant 1.000000e-03 : f32
    %204 = vector.broadcast %cst_81 : f32 to vector<8x128xf32>
    %205 = arith.mulf %204, %201 : vector<8x128xf32>
    %206 = arith.addf %203, %205 : vector<8x128xf32>
    %cst_82 = arith.constant 3.000000e+01 : f32
    %207 = vector.broadcast %cst_82 : f32 to vector<8x128xf32>
    %208 = arith.cmpf ogt, %201, %207 : vector<8x128xf32>
    %cst_83 = arith.constant 1.000000e+00 : f32
    %cst_84 = arith.constant 0.000000e+00 : f32
    %209 = vector.broadcast %cst_83 : f32 to vector<8x128xf32>
    %210 = vector.broadcast %cst_84 : f32 to vector<8x128xf32>
    %211 = arith.select %208, %209, %210 : vector<8x128xi1>, vector<8x128xf32>
    %cst_85 = arith.constant -6.500000e+01 : f32
    %212 = vector.broadcast %cst_85 : f32 to vector<8x128xf32>
    %213 = arith.select %208, %212, %201 : vector<8x128xi1>, vector<8x128xf32>
    %cst_86 = arith.constant 4.000000e+00 : f32
    %214 = vector.broadcast %cst_86 : f32 to vector<8x128xf32>
    %215 = arith.mulf %211, %214 : vector<8x128xf32>
    %216 = arith.addf %206, %215 : vector<8x128xf32>
    %217 = arith.addf %194, %211 : vector<8x128xf32>
    %c9_i32 = arith.constant 9 : i32
    %cst_87 = arith.constant 2.000000e-02 : f32
    %218 = vector.broadcast %cst_87 : f32 to vector<8x128xf32>
    %219 = arith.mulf %218, %213 : vector<8x128xf32>
    %cst_88 = arith.constant 3.500000e+00 : f32
    %220 = vector.broadcast %cst_88 : f32 to vector<8x128xf32>
    %221 = arith.addf %220, %219 : vector<8x128xf32>
    %222 = arith.mulf %213, %221 : vector<8x128xf32>
    %223 = arith.subf %7, %216 : vector<8x128xf32>
    %224 = arith.addf %222, %223 : vector<8x128xf32>
    %cst_89 = arith.constant 9.900000e-01 : f32
    %225 = vector.broadcast %cst_89 : f32 to vector<8x128xf32>
    %226 = arith.mulf %225, %216 : vector<8x128xf32>
    %cst_90 = arith.constant 1.000000e-03 : f32
    %227 = vector.broadcast %cst_90 : f32 to vector<8x128xf32>
    %228 = arith.mulf %227, %224 : vector<8x128xf32>
    %229 = arith.addf %226, %228 : vector<8x128xf32>
    %cst_91 = arith.constant 3.000000e+01 : f32
    %230 = vector.broadcast %cst_91 : f32 to vector<8x128xf32>
    %231 = arith.cmpf ogt, %224, %230 : vector<8x128xf32>
    %cst_92 = arith.constant 1.000000e+00 : f32
    %cst_93 = arith.constant 0.000000e+00 : f32
    %232 = vector.broadcast %cst_92 : f32 to vector<8x128xf32>
    %233 = vector.broadcast %cst_93 : f32 to vector<8x128xf32>
    %234 = arith.select %231, %232, %233 : vector<8x128xi1>, vector<8x128xf32>
    %cst_94 = arith.constant -6.500000e+01 : f32
    %235 = vector.broadcast %cst_94 : f32 to vector<8x128xf32>
    %236 = arith.select %231, %235, %224 : vector<8x128xi1>, vector<8x128xf32>
    %cst_95 = arith.constant 4.000000e+00 : f32
    %237 = vector.broadcast %cst_95 : f32 to vector<8x128xf32>
    %238 = arith.mulf %234, %237 : vector<8x128xf32>
    %239 = arith.addf %229, %238 : vector<8x128xf32>
    %240 = arith.addf %217, %234 : vector<8x128xf32>
    %c10_i32 = arith.constant 10 : i32
    %cst_96 = arith.constant 2.000000e-02 : f32
    %241 = vector.broadcast %cst_96 : f32 to vector<8x128xf32>
    %242 = arith.mulf %241, %236 : vector<8x128xf32>
    %cst_97 = arith.constant 3.500000e+00 : f32
    %243 = vector.broadcast %cst_97 : f32 to vector<8x128xf32>
    %244 = arith.addf %243, %242 : vector<8x128xf32>
    %245 = arith.mulf %236, %244 : vector<8x128xf32>
    %246 = arith.subf %7, %239 : vector<8x128xf32>
    %247 = arith.addf %245, %246 : vector<8x128xf32>
    %cst_98 = arith.constant 9.900000e-01 : f32
    %248 = vector.broadcast %cst_98 : f32 to vector<8x128xf32>
    %249 = arith.mulf %248, %239 : vector<8x128xf32>
    %cst_99 = arith.constant 1.000000e-03 : f32
    %250 = vector.broadcast %cst_99 : f32 to vector<8x128xf32>
    %251 = arith.mulf %250, %247 : vector<8x128xf32>
    %252 = arith.addf %249, %251 : vector<8x128xf32>
    %cst_100 = arith.constant 3.000000e+01 : f32
    %253 = vector.broadcast %cst_100 : f32 to vector<8x128xf32>
    %254 = arith.cmpf ogt, %247, %253 : vector<8x128xf32>
    %cst_101 = arith.constant 1.000000e+00 : f32
    %cst_102 = arith.constant 0.000000e+00 : f32
    %255 = vector.broadcast %cst_101 : f32 to vector<8x128xf32>
    %256 = vector.broadcast %cst_102 : f32 to vector<8x128xf32>
    %257 = arith.select %254, %255, %256 : vector<8x128xi1>, vector<8x128xf32>
    %cst_103 = arith.constant -6.500000e+01 : f32
    %258 = vector.broadcast %cst_103 : f32 to vector<8x128xf32>
    %259 = arith.select %254, %258, %247 : vector<8x128xi1>, vector<8x128xf32>
    %cst_104 = arith.constant 4.000000e+00 : f32
    %260 = vector.broadcast %cst_104 : f32 to vector<8x128xf32>
    %261 = arith.mulf %257, %260 : vector<8x128xf32>
    %262 = arith.addf %252, %261 : vector<8x128xf32>
    %263 = arith.addf %240, %257 : vector<8x128xf32>
    %c11_i32 = arith.constant 11 : i32
    %cst_105 = arith.constant 2.000000e-02 : f32
    %264 = vector.broadcast %cst_105 : f32 to vector<8x128xf32>
    %265 = arith.mulf %264, %259 : vector<8x128xf32>
    %cst_106 = arith.constant 3.500000e+00 : f32
    %266 = vector.broadcast %cst_106 : f32 to vector<8x128xf32>
    %267 = arith.addf %266, %265 : vector<8x128xf32>
    %268 = arith.mulf %259, %267 : vector<8x128xf32>
    %269 = arith.subf %7, %262 : vector<8x128xf32>
    %270 = arith.addf %268, %269 : vector<8x128xf32>
    %cst_107 = arith.constant 9.900000e-01 : f32
    %271 = vector.broadcast %cst_107 : f32 to vector<8x128xf32>
    %272 = arith.mulf %271, %262 : vector<8x128xf32>
    %cst_108 = arith.constant 1.000000e-03 : f32
    %273 = vector.broadcast %cst_108 : f32 to vector<8x128xf32>
    %274 = arith.mulf %273, %270 : vector<8x128xf32>
    %275 = arith.addf %272, %274 : vector<8x128xf32>
    %cst_109 = arith.constant 3.000000e+01 : f32
    %276 = vector.broadcast %cst_109 : f32 to vector<8x128xf32>
    %277 = arith.cmpf ogt, %270, %276 : vector<8x128xf32>
    %cst_110 = arith.constant 1.000000e+00 : f32
    %cst_111 = arith.constant 0.000000e+00 : f32
    %278 = vector.broadcast %cst_110 : f32 to vector<8x128xf32>
    %279 = vector.broadcast %cst_111 : f32 to vector<8x128xf32>
    %280 = arith.select %277, %278, %279 : vector<8x128xi1>, vector<8x128xf32>
    %cst_112 = arith.constant -6.500000e+01 : f32
    %281 = vector.broadcast %cst_112 : f32 to vector<8x128xf32>
    %282 = arith.select %277, %281, %270 : vector<8x128xi1>, vector<8x128xf32>
    %cst_113 = arith.constant 4.000000e+00 : f32
    %283 = vector.broadcast %cst_113 : f32 to vector<8x128xf32>
    %284 = arith.mulf %280, %283 : vector<8x128xf32>
    %285 = arith.addf %275, %284 : vector<8x128xf32>
    %286 = arith.addf %263, %280 : vector<8x128xf32>
    %c12_i32 = arith.constant 12 : i32
    %cst_114 = arith.constant 2.000000e-02 : f32
    %287 = vector.broadcast %cst_114 : f32 to vector<8x128xf32>
    %288 = arith.mulf %287, %282 : vector<8x128xf32>
    %cst_115 = arith.constant 3.500000e+00 : f32
    %289 = vector.broadcast %cst_115 : f32 to vector<8x128xf32>
    %290 = arith.addf %289, %288 : vector<8x128xf32>
    %291 = arith.mulf %282, %290 : vector<8x128xf32>
    %292 = arith.subf %7, %285 : vector<8x128xf32>
    %293 = arith.addf %291, %292 : vector<8x128xf32>
    %cst_116 = arith.constant 9.900000e-01 : f32
    %294 = vector.broadcast %cst_116 : f32 to vector<8x128xf32>
    %295 = arith.mulf %294, %285 : vector<8x128xf32>
    %cst_117 = arith.constant 1.000000e-03 : f32
    %296 = vector.broadcast %cst_117 : f32 to vector<8x128xf32>
    %297 = arith.mulf %296, %293 : vector<8x128xf32>
    %298 = arith.addf %295, %297 : vector<8x128xf32>
    %cst_118 = arith.constant 3.000000e+01 : f32
    %299 = vector.broadcast %cst_118 : f32 to vector<8x128xf32>
    %300 = arith.cmpf ogt, %293, %299 : vector<8x128xf32>
    %cst_119 = arith.constant 1.000000e+00 : f32
    %cst_120 = arith.constant 0.000000e+00 : f32
    %301 = vector.broadcast %cst_119 : f32 to vector<8x128xf32>
    %302 = vector.broadcast %cst_120 : f32 to vector<8x128xf32>
    %303 = arith.select %300, %301, %302 : vector<8x128xi1>, vector<8x128xf32>
    %cst_121 = arith.constant -6.500000e+01 : f32
    %304 = vector.broadcast %cst_121 : f32 to vector<8x128xf32>
    %305 = arith.select %300, %304, %293 : vector<8x128xi1>, vector<8x128xf32>
    %cst_122 = arith.constant 4.000000e+00 : f32
    %306 = vector.broadcast %cst_122 : f32 to vector<8x128xf32>
    %307 = arith.mulf %303, %306 : vector<8x128xf32>
    %308 = arith.addf %298, %307 : vector<8x128xf32>
    %309 = arith.addf %286, %303 : vector<8x128xf32>
    %c13_i32 = arith.constant 13 : i32
    %cst_123 = arith.constant 2.000000e-02 : f32
    %310 = vector.broadcast %cst_123 : f32 to vector<8x128xf32>
    %311 = arith.mulf %310, %305 : vector<8x128xf32>
    %cst_124 = arith.constant 3.500000e+00 : f32
    %312 = vector.broadcast %cst_124 : f32 to vector<8x128xf32>
    %313 = arith.addf %312, %311 : vector<8x128xf32>
    %314 = arith.mulf %305, %313 : vector<8x128xf32>
    %315 = arith.subf %7, %308 : vector<8x128xf32>
    %316 = arith.addf %314, %315 : vector<8x128xf32>
    %cst_125 = arith.constant 9.900000e-01 : f32
    %317 = vector.broadcast %cst_125 : f32 to vector<8x128xf32>
    %318 = arith.mulf %317, %308 : vector<8x128xf32>
    %cst_126 = arith.constant 1.000000e-03 : f32
    %319 = vector.broadcast %cst_126 : f32 to vector<8x128xf32>
    %320 = arith.mulf %319, %316 : vector<8x128xf32>
    %321 = arith.addf %318, %320 : vector<8x128xf32>
    %cst_127 = arith.constant 3.000000e+01 : f32
    %322 = vector.broadcast %cst_127 : f32 to vector<8x128xf32>
    %323 = arith.cmpf ogt, %316, %322 : vector<8x128xf32>
    %cst_128 = arith.constant 1.000000e+00 : f32
    %cst_129 = arith.constant 0.000000e+00 : f32
    %324 = vector.broadcast %cst_128 : f32 to vector<8x128xf32>
    %325 = vector.broadcast %cst_129 : f32 to vector<8x128xf32>
    %326 = arith.select %323, %324, %325 : vector<8x128xi1>, vector<8x128xf32>
    %cst_130 = arith.constant -6.500000e+01 : f32
    %327 = vector.broadcast %cst_130 : f32 to vector<8x128xf32>
    %328 = arith.select %323, %327, %316 : vector<8x128xi1>, vector<8x128xf32>
    %cst_131 = arith.constant 4.000000e+00 : f32
    %329 = vector.broadcast %cst_131 : f32 to vector<8x128xf32>
    %330 = arith.mulf %326, %329 : vector<8x128xf32>
    %331 = arith.addf %321, %330 : vector<8x128xf32>
    %332 = arith.addf %309, %326 : vector<8x128xf32>
    %c14_i32 = arith.constant 14 : i32
    %cst_132 = arith.constant 2.000000e-02 : f32
    %333 = vector.broadcast %cst_132 : f32 to vector<8x128xf32>
    %334 = arith.mulf %333, %328 : vector<8x128xf32>
    %cst_133 = arith.constant 3.500000e+00 : f32
    %335 = vector.broadcast %cst_133 : f32 to vector<8x128xf32>
    %336 = arith.addf %335, %334 : vector<8x128xf32>
    %337 = arith.mulf %328, %336 : vector<8x128xf32>
    %338 = arith.subf %7, %331 : vector<8x128xf32>
    %339 = arith.addf %337, %338 : vector<8x128xf32>
    %cst_134 = arith.constant 9.900000e-01 : f32
    %340 = vector.broadcast %cst_134 : f32 to vector<8x128xf32>
    %341 = arith.mulf %340, %331 : vector<8x128xf32>
    %cst_135 = arith.constant 1.000000e-03 : f32
    %342 = vector.broadcast %cst_135 : f32 to vector<8x128xf32>
    %343 = arith.mulf %342, %339 : vector<8x128xf32>
    %344 = arith.addf %341, %343 : vector<8x128xf32>
    %cst_136 = arith.constant 3.000000e+01 : f32
    %345 = vector.broadcast %cst_136 : f32 to vector<8x128xf32>
    %346 = arith.cmpf ogt, %339, %345 : vector<8x128xf32>
    %cst_137 = arith.constant 1.000000e+00 : f32
    %cst_138 = arith.constant 0.000000e+00 : f32
    %347 = vector.broadcast %cst_137 : f32 to vector<8x128xf32>
    %348 = vector.broadcast %cst_138 : f32 to vector<8x128xf32>
    %349 = arith.select %346, %347, %348 : vector<8x128xi1>, vector<8x128xf32>
    %cst_139 = arith.constant -6.500000e+01 : f32
    %350 = vector.broadcast %cst_139 : f32 to vector<8x128xf32>
    %351 = arith.select %346, %350, %339 : vector<8x128xi1>, vector<8x128xf32>
    %cst_140 = arith.constant 4.000000e+00 : f32
    %352 = vector.broadcast %cst_140 : f32 to vector<8x128xf32>
    %353 = arith.mulf %349, %352 : vector<8x128xf32>
    %354 = arith.addf %344, %353 : vector<8x128xf32>
    %355 = arith.addf %332, %349 : vector<8x128xf32>
    %c15_i32 = arith.constant 15 : i32
    %cst_141 = arith.constant 2.000000e-02 : f32
    %356 = vector.broadcast %cst_141 : f32 to vector<8x128xf32>
    %357 = arith.mulf %356, %351 : vector<8x128xf32>
    %cst_142 = arith.constant 3.500000e+00 : f32
    %358 = vector.broadcast %cst_142 : f32 to vector<8x128xf32>
    %359 = arith.addf %358, %357 : vector<8x128xf32>
    %360 = arith.mulf %351, %359 : vector<8x128xf32>
    %361 = arith.subf %7, %354 : vector<8x128xf32>
    %362 = arith.addf %360, %361 : vector<8x128xf32>
    %cst_143 = arith.constant 9.900000e-01 : f32
    %363 = vector.broadcast %cst_143 : f32 to vector<8x128xf32>
    %364 = arith.mulf %363, %354 : vector<8x128xf32>
    %cst_144 = arith.constant 1.000000e-03 : f32
    %365 = vector.broadcast %cst_144 : f32 to vector<8x128xf32>
    %366 = arith.mulf %365, %362 : vector<8x128xf32>
    %367 = arith.addf %364, %366 : vector<8x128xf32>
    %cst_145 = arith.constant 3.000000e+01 : f32
    %368 = vector.broadcast %cst_145 : f32 to vector<8x128xf32>
    %369 = arith.cmpf ogt, %362, %368 : vector<8x128xf32>
    %cst_146 = arith.constant 1.000000e+00 : f32
    %cst_147 = arith.constant 0.000000e+00 : f32
    %370 = vector.broadcast %cst_146 : f32 to vector<8x128xf32>
    %371 = vector.broadcast %cst_147 : f32 to vector<8x128xf32>
    %372 = arith.select %369, %370, %371 : vector<8x128xi1>, vector<8x128xf32>
    %cst_148 = arith.constant -6.500000e+01 : f32
    %373 = vector.broadcast %cst_148 : f32 to vector<8x128xf32>
    %374 = arith.select %369, %373, %362 : vector<8x128xi1>, vector<8x128xf32>
    %cst_149 = arith.constant 4.000000e+00 : f32
    %375 = vector.broadcast %cst_149 : f32 to vector<8x128xf32>
    %376 = arith.mulf %372, %375 : vector<8x128xf32>
    %377 = arith.addf %367, %376 : vector<8x128xf32>
    %378 = arith.addf %355, %372 : vector<8x128xf32>
    %c16_i32 = arith.constant 16 : i32
    %cst_150 = arith.constant 2.000000e-02 : f32
    %379 = vector.broadcast %cst_150 : f32 to vector<8x128xf32>
    %380 = arith.mulf %379, %374 : vector<8x128xf32>
    %cst_151 = arith.constant 3.500000e+00 : f32
    %381 = vector.broadcast %cst_151 : f32 to vector<8x128xf32>
    %382 = arith.addf %381, %380 : vector<8x128xf32>
    %383 = arith.mulf %374, %382 : vector<8x128xf32>
    %384 = arith.subf %7, %377 : vector<8x128xf32>
    %385 = arith.addf %383, %384 : vector<8x128xf32>
    %cst_152 = arith.constant 9.900000e-01 : f32
    %386 = vector.broadcast %cst_152 : f32 to vector<8x128xf32>
    %387 = arith.mulf %386, %377 : vector<8x128xf32>
    %cst_153 = arith.constant 1.000000e-03 : f32
    %388 = vector.broadcast %cst_153 : f32 to vector<8x128xf32>
    %389 = arith.mulf %388, %385 : vector<8x128xf32>
    %390 = arith.addf %387, %389 : vector<8x128xf32>
    %cst_154 = arith.constant 3.000000e+01 : f32
    %391 = vector.broadcast %cst_154 : f32 to vector<8x128xf32>
    %392 = arith.cmpf ogt, %385, %391 : vector<8x128xf32>
    %cst_155 = arith.constant 1.000000e+00 : f32
    %cst_156 = arith.constant 0.000000e+00 : f32
    %393 = vector.broadcast %cst_155 : f32 to vector<8x128xf32>
    %394 = vector.broadcast %cst_156 : f32 to vector<8x128xf32>
    %395 = arith.select %392, %393, %394 : vector<8x128xi1>, vector<8x128xf32>
    %cst_157 = arith.constant -6.500000e+01 : f32
    %396 = vector.broadcast %cst_157 : f32 to vector<8x128xf32>
    %397 = arith.select %392, %396, %385 : vector<8x128xi1>, vector<8x128xf32>
    %cst_158 = arith.constant 4.000000e+00 : f32
    %398 = vector.broadcast %cst_158 : f32 to vector<8x128xf32>
    %399 = arith.mulf %395, %398 : vector<8x128xf32>
    %400 = arith.addf %390, %399 : vector<8x128xf32>
    %401 = arith.addf %378, %395 : vector<8x128xf32>
    %c17_i32 = arith.constant 17 : i32
    %cst_159 = arith.constant 2.000000e-02 : f32
    %402 = vector.broadcast %cst_159 : f32 to vector<8x128xf32>
    %403 = arith.mulf %402, %397 : vector<8x128xf32>
    %cst_160 = arith.constant 3.500000e+00 : f32
    %404 = vector.broadcast %cst_160 : f32 to vector<8x128xf32>
    %405 = arith.addf %404, %403 : vector<8x128xf32>
    %406 = arith.mulf %397, %405 : vector<8x128xf32>
    %407 = arith.subf %7, %400 : vector<8x128xf32>
    %408 = arith.addf %406, %407 : vector<8x128xf32>
    %cst_161 = arith.constant 9.900000e-01 : f32
    %409 = vector.broadcast %cst_161 : f32 to vector<8x128xf32>
    %410 = arith.mulf %409, %400 : vector<8x128xf32>
    %cst_162 = arith.constant 1.000000e-03 : f32
    %411 = vector.broadcast %cst_162 : f32 to vector<8x128xf32>
    %412 = arith.mulf %411, %408 : vector<8x128xf32>
    %413 = arith.addf %410, %412 : vector<8x128xf32>
    %cst_163 = arith.constant 3.000000e+01 : f32
    %414 = vector.broadcast %cst_163 : f32 to vector<8x128xf32>
    %415 = arith.cmpf ogt, %408, %414 : vector<8x128xf32>
    %cst_164 = arith.constant 1.000000e+00 : f32
    %cst_165 = arith.constant 0.000000e+00 : f32
    %416 = vector.broadcast %cst_164 : f32 to vector<8x128xf32>
    %417 = vector.broadcast %cst_165 : f32 to vector<8x128xf32>
    %418 = arith.select %415, %416, %417 : vector<8x128xi1>, vector<8x128xf32>
    %cst_166 = arith.constant -6.500000e+01 : f32
    %419 = vector.broadcast %cst_166 : f32 to vector<8x128xf32>
    %420 = arith.select %415, %419, %408 : vector<8x128xi1>, vector<8x128xf32>
    %cst_167 = arith.constant 4.000000e+00 : f32
    %421 = vector.broadcast %cst_167 : f32 to vector<8x128xf32>
    %422 = arith.mulf %418, %421 : vector<8x128xf32>
    %423 = arith.addf %413, %422 : vector<8x128xf32>
    %424 = arith.addf %401, %418 : vector<8x128xf32>
    %c18_i32 = arith.constant 18 : i32
    %cst_168 = arith.constant 2.000000e-02 : f32
    %425 = vector.broadcast %cst_168 : f32 to vector<8x128xf32>
    %426 = arith.mulf %425, %420 : vector<8x128xf32>
    %cst_169 = arith.constant 3.500000e+00 : f32
    %427 = vector.broadcast %cst_169 : f32 to vector<8x128xf32>
    %428 = arith.addf %427, %426 : vector<8x128xf32>
    %429 = arith.mulf %420, %428 : vector<8x128xf32>
    %430 = arith.subf %7, %423 : vector<8x128xf32>
    %431 = arith.addf %429, %430 : vector<8x128xf32>
    %cst_170 = arith.constant 9.900000e-01 : f32
    %432 = vector.broadcast %cst_170 : f32 to vector<8x128xf32>
    %433 = arith.mulf %432, %423 : vector<8x128xf32>
    %cst_171 = arith.constant 1.000000e-03 : f32
    %434 = vector.broadcast %cst_171 : f32 to vector<8x128xf32>
    %435 = arith.mulf %434, %431 : vector<8x128xf32>
    %436 = arith.addf %433, %435 : vector<8x128xf32>
    %cst_172 = arith.constant 3.000000e+01 : f32
    %437 = vector.broadcast %cst_172 : f32 to vector<8x128xf32>
    %438 = arith.cmpf ogt, %431, %437 : vector<8x128xf32>
    %cst_173 = arith.constant 1.000000e+00 : f32
    %cst_174 = arith.constant 0.000000e+00 : f32
    %439 = vector.broadcast %cst_173 : f32 to vector<8x128xf32>
    %440 = vector.broadcast %cst_174 : f32 to vector<8x128xf32>
    %441 = arith.select %438, %439, %440 : vector<8x128xi1>, vector<8x128xf32>
    %cst_175 = arith.constant -6.500000e+01 : f32
    %442 = vector.broadcast %cst_175 : f32 to vector<8x128xf32>
    %443 = arith.select %438, %442, %431 : vector<8x128xi1>, vector<8x128xf32>
    %cst_176 = arith.constant 4.000000e+00 : f32
    %444 = vector.broadcast %cst_176 : f32 to vector<8x128xf32>
    %445 = arith.mulf %441, %444 : vector<8x128xf32>
    %446 = arith.addf %436, %445 : vector<8x128xf32>
    %447 = arith.addf %424, %441 : vector<8x128xf32>
    %c19_i32 = arith.constant 19 : i32
    %cst_177 = arith.constant 2.000000e-02 : f32
    %448 = vector.broadcast %cst_177 : f32 to vector<8x128xf32>
    %449 = arith.mulf %448, %443 : vector<8x128xf32>
    %cst_178 = arith.constant 3.500000e+00 : f32
    %450 = vector.broadcast %cst_178 : f32 to vector<8x128xf32>
    %451 = arith.addf %450, %449 : vector<8x128xf32>
    %452 = arith.mulf %443, %451 : vector<8x128xf32>
    %453 = arith.subf %7, %446 : vector<8x128xf32>
    %454 = arith.addf %452, %453 : vector<8x128xf32>
    %cst_179 = arith.constant 9.900000e-01 : f32
    %455 = vector.broadcast %cst_179 : f32 to vector<8x128xf32>
    %456 = arith.mulf %455, %446 : vector<8x128xf32>
    %cst_180 = arith.constant 1.000000e-03 : f32
    %457 = vector.broadcast %cst_180 : f32 to vector<8x128xf32>
    %458 = arith.mulf %457, %454 : vector<8x128xf32>
    %459 = arith.addf %456, %458 : vector<8x128xf32>
    %cst_181 = arith.constant 3.000000e+01 : f32
    %460 = vector.broadcast %cst_181 : f32 to vector<8x128xf32>
    %461 = arith.cmpf ogt, %454, %460 : vector<8x128xf32>
    %cst_182 = arith.constant 1.000000e+00 : f32
    %cst_183 = arith.constant 0.000000e+00 : f32
    %462 = vector.broadcast %cst_182 : f32 to vector<8x128xf32>
    %463 = vector.broadcast %cst_183 : f32 to vector<8x128xf32>
    %464 = arith.select %461, %462, %463 : vector<8x128xi1>, vector<8x128xf32>
    %cst_184 = arith.constant -6.500000e+01 : f32
    %465 = vector.broadcast %cst_184 : f32 to vector<8x128xf32>
    %466 = arith.select %461, %465, %454 : vector<8x128xi1>, vector<8x128xf32>
    %cst_185 = arith.constant 4.000000e+00 : f32
    %467 = vector.broadcast %cst_185 : f32 to vector<8x128xf32>
    %468 = arith.mulf %464, %467 : vector<8x128xf32>
    %469 = arith.addf %459, %468 : vector<8x128xf32>
    %470 = arith.addf %447, %464 : vector<8x128xf32>
    %c20_i32 = arith.constant 20 : i32
    %cst_186 = arith.constant 2.000000e-02 : f32
    %471 = vector.broadcast %cst_186 : f32 to vector<8x128xf32>
    %472 = arith.mulf %471, %466 : vector<8x128xf32>
    %cst_187 = arith.constant 3.500000e+00 : f32
    %473 = vector.broadcast %cst_187 : f32 to vector<8x128xf32>
    %474 = arith.addf %473, %472 : vector<8x128xf32>
    %475 = arith.mulf %466, %474 : vector<8x128xf32>
    %476 = arith.subf %7, %469 : vector<8x128xf32>
    %477 = arith.addf %475, %476 : vector<8x128xf32>
    %cst_188 = arith.constant 9.900000e-01 : f32
    %478 = vector.broadcast %cst_188 : f32 to vector<8x128xf32>
    %479 = arith.mulf %478, %469 : vector<8x128xf32>
    %cst_189 = arith.constant 1.000000e-03 : f32
    %480 = vector.broadcast %cst_189 : f32 to vector<8x128xf32>
    %481 = arith.mulf %480, %477 : vector<8x128xf32>
    %482 = arith.addf %479, %481 : vector<8x128xf32>
    %cst_190 = arith.constant 3.000000e+01 : f32
    %483 = vector.broadcast %cst_190 : f32 to vector<8x128xf32>
    %484 = arith.cmpf ogt, %477, %483 : vector<8x128xf32>
    %cst_191 = arith.constant 1.000000e+00 : f32
    %cst_192 = arith.constant 0.000000e+00 : f32
    %485 = vector.broadcast %cst_191 : f32 to vector<8x128xf32>
    %486 = vector.broadcast %cst_192 : f32 to vector<8x128xf32>
    %487 = arith.select %484, %485, %486 : vector<8x128xi1>, vector<8x128xf32>
    %cst_193 = arith.constant -6.500000e+01 : f32
    %488 = vector.broadcast %cst_193 : f32 to vector<8x128xf32>
    %489 = arith.select %484, %488, %477 : vector<8x128xi1>, vector<8x128xf32>
    %cst_194 = arith.constant 4.000000e+00 : f32
    %490 = vector.broadcast %cst_194 : f32 to vector<8x128xf32>
    %491 = arith.mulf %487, %490 : vector<8x128xf32>
    %492 = arith.addf %482, %491 : vector<8x128xf32>
    %493 = arith.addf %470, %487 : vector<8x128xf32>
    %c21_i32 = arith.constant 21 : i32
    %cst_195 = arith.constant 2.000000e-02 : f32
    %494 = vector.broadcast %cst_195 : f32 to vector<8x128xf32>
    %495 = arith.mulf %494, %489 : vector<8x128xf32>
    %cst_196 = arith.constant 3.500000e+00 : f32
    %496 = vector.broadcast %cst_196 : f32 to vector<8x128xf32>
    %497 = arith.addf %496, %495 : vector<8x128xf32>
    %498 = arith.mulf %489, %497 : vector<8x128xf32>
    %499 = arith.subf %7, %492 : vector<8x128xf32>
    %500 = arith.addf %498, %499 : vector<8x128xf32>
    %cst_197 = arith.constant 9.900000e-01 : f32
    %501 = vector.broadcast %cst_197 : f32 to vector<8x128xf32>
    %502 = arith.mulf %501, %492 : vector<8x128xf32>
    %cst_198 = arith.constant 1.000000e-03 : f32
    %503 = vector.broadcast %cst_198 : f32 to vector<8x128xf32>
    %504 = arith.mulf %503, %500 : vector<8x128xf32>
    %505 = arith.addf %502, %504 : vector<8x128xf32>
    %cst_199 = arith.constant 3.000000e+01 : f32
    %506 = vector.broadcast %cst_199 : f32 to vector<8x128xf32>
    %507 = arith.cmpf ogt, %500, %506 : vector<8x128xf32>
    %cst_200 = arith.constant 1.000000e+00 : f32
    %cst_201 = arith.constant 0.000000e+00 : f32
    %508 = vector.broadcast %cst_200 : f32 to vector<8x128xf32>
    %509 = vector.broadcast %cst_201 : f32 to vector<8x128xf32>
    %510 = arith.select %507, %508, %509 : vector<8x128xi1>, vector<8x128xf32>
    %cst_202 = arith.constant -6.500000e+01 : f32
    %511 = vector.broadcast %cst_202 : f32 to vector<8x128xf32>
    %512 = arith.select %507, %511, %500 : vector<8x128xi1>, vector<8x128xf32>
    %cst_203 = arith.constant 4.000000e+00 : f32
    %513 = vector.broadcast %cst_203 : f32 to vector<8x128xf32>
    %514 = arith.mulf %510, %513 : vector<8x128xf32>
    %515 = arith.addf %505, %514 : vector<8x128xf32>
    %516 = arith.addf %493, %510 : vector<8x128xf32>
    %c22_i32 = arith.constant 22 : i32
    %cst_204 = arith.constant 2.000000e-02 : f32
    %517 = vector.broadcast %cst_204 : f32 to vector<8x128xf32>
    %518 = arith.mulf %517, %512 : vector<8x128xf32>
    %cst_205 = arith.constant 3.500000e+00 : f32
    %519 = vector.broadcast %cst_205 : f32 to vector<8x128xf32>
    %520 = arith.addf %519, %518 : vector<8x128xf32>
    %521 = arith.mulf %512, %520 : vector<8x128xf32>
    %522 = arith.subf %7, %515 : vector<8x128xf32>
    %523 = arith.addf %521, %522 : vector<8x128xf32>
    %cst_206 = arith.constant 9.900000e-01 : f32
    %524 = vector.broadcast %cst_206 : f32 to vector<8x128xf32>
    %525 = arith.mulf %524, %515 : vector<8x128xf32>
    %cst_207 = arith.constant 1.000000e-03 : f32
    %526 = vector.broadcast %cst_207 : f32 to vector<8x128xf32>
    %527 = arith.mulf %526, %523 : vector<8x128xf32>
    %528 = arith.addf %525, %527 : vector<8x128xf32>
    %cst_208 = arith.constant 3.000000e+01 : f32
    %529 = vector.broadcast %cst_208 : f32 to vector<8x128xf32>
    %530 = arith.cmpf ogt, %523, %529 : vector<8x128xf32>
    %cst_209 = arith.constant 1.000000e+00 : f32
    %cst_210 = arith.constant 0.000000e+00 : f32
    %531 = vector.broadcast %cst_209 : f32 to vector<8x128xf32>
    %532 = vector.broadcast %cst_210 : f32 to vector<8x128xf32>
    %533 = arith.select %530, %531, %532 : vector<8x128xi1>, vector<8x128xf32>
    %cst_211 = arith.constant -6.500000e+01 : f32
    %534 = vector.broadcast %cst_211 : f32 to vector<8x128xf32>
    %535 = arith.select %530, %534, %523 : vector<8x128xi1>, vector<8x128xf32>
    %cst_212 = arith.constant 4.000000e+00 : f32
    %536 = vector.broadcast %cst_212 : f32 to vector<8x128xf32>
    %537 = arith.mulf %533, %536 : vector<8x128xf32>
    %538 = arith.addf %528, %537 : vector<8x128xf32>
    %539 = arith.addf %516, %533 : vector<8x128xf32>
    %c23_i32 = arith.constant 23 : i32
    %cst_213 = arith.constant 2.000000e-02 : f32
    %540 = vector.broadcast %cst_213 : f32 to vector<8x128xf32>
    %541 = arith.mulf %540, %535 : vector<8x128xf32>
    %cst_214 = arith.constant 3.500000e+00 : f32
    %542 = vector.broadcast %cst_214 : f32 to vector<8x128xf32>
    %543 = arith.addf %542, %541 : vector<8x128xf32>
    %544 = arith.mulf %535, %543 : vector<8x128xf32>
    %545 = arith.subf %7, %538 : vector<8x128xf32>
    %546 = arith.addf %544, %545 : vector<8x128xf32>
    %cst_215 = arith.constant 9.900000e-01 : f32
    %547 = vector.broadcast %cst_215 : f32 to vector<8x128xf32>
    %548 = arith.mulf %547, %538 : vector<8x128xf32>
    %cst_216 = arith.constant 1.000000e-03 : f32
    %549 = vector.broadcast %cst_216 : f32 to vector<8x128xf32>
    %550 = arith.mulf %549, %546 : vector<8x128xf32>
    %551 = arith.addf %548, %550 : vector<8x128xf32>
    %cst_217 = arith.constant 3.000000e+01 : f32
    %552 = vector.broadcast %cst_217 : f32 to vector<8x128xf32>
    %553 = arith.cmpf ogt, %546, %552 : vector<8x128xf32>
    %cst_218 = arith.constant 1.000000e+00 : f32
    %cst_219 = arith.constant 0.000000e+00 : f32
    %554 = vector.broadcast %cst_218 : f32 to vector<8x128xf32>
    %555 = vector.broadcast %cst_219 : f32 to vector<8x128xf32>
    %556 = arith.select %553, %554, %555 : vector<8x128xi1>, vector<8x128xf32>
    %cst_220 = arith.constant -6.500000e+01 : f32
    %557 = vector.broadcast %cst_220 : f32 to vector<8x128xf32>
    %558 = arith.select %553, %557, %546 : vector<8x128xi1>, vector<8x128xf32>
    %cst_221 = arith.constant 4.000000e+00 : f32
    %559 = vector.broadcast %cst_221 : f32 to vector<8x128xf32>
    %560 = arith.mulf %556, %559 : vector<8x128xf32>
    %561 = arith.addf %551, %560 : vector<8x128xf32>
    %562 = arith.addf %539, %556 : vector<8x128xf32>
    %c24_i32 = arith.constant 24 : i32
    %cst_222 = arith.constant 2.000000e-02 : f32
    %563 = vector.broadcast %cst_222 : f32 to vector<8x128xf32>
    %564 = arith.mulf %563, %558 : vector<8x128xf32>
    %cst_223 = arith.constant 3.500000e+00 : f32
    %565 = vector.broadcast %cst_223 : f32 to vector<8x128xf32>
    %566 = arith.addf %565, %564 : vector<8x128xf32>
    %567 = arith.mulf %558, %566 : vector<8x128xf32>
    %568 = arith.subf %7, %561 : vector<8x128xf32>
    %569 = arith.addf %567, %568 : vector<8x128xf32>
    %cst_224 = arith.constant 9.900000e-01 : f32
    %570 = vector.broadcast %cst_224 : f32 to vector<8x128xf32>
    %571 = arith.mulf %570, %561 : vector<8x128xf32>
    %cst_225 = arith.constant 1.000000e-03 : f32
    %572 = vector.broadcast %cst_225 : f32 to vector<8x128xf32>
    %573 = arith.mulf %572, %569 : vector<8x128xf32>
    %574 = arith.addf %571, %573 : vector<8x128xf32>
    %cst_226 = arith.constant 3.000000e+01 : f32
    %575 = vector.broadcast %cst_226 : f32 to vector<8x128xf32>
    %576 = arith.cmpf ogt, %569, %575 : vector<8x128xf32>
    %cst_227 = arith.constant 1.000000e+00 : f32
    %cst_228 = arith.constant 0.000000e+00 : f32
    %577 = vector.broadcast %cst_227 : f32 to vector<8x128xf32>
    %578 = vector.broadcast %cst_228 : f32 to vector<8x128xf32>
    %579 = arith.select %576, %577, %578 : vector<8x128xi1>, vector<8x128xf32>
    %cst_229 = arith.constant -6.500000e+01 : f32
    %580 = vector.broadcast %cst_229 : f32 to vector<8x128xf32>
    %581 = arith.select %576, %580, %569 : vector<8x128xi1>, vector<8x128xf32>
    %cst_230 = arith.constant 4.000000e+00 : f32
    %582 = vector.broadcast %cst_230 : f32 to vector<8x128xf32>
    %583 = arith.mulf %579, %582 : vector<8x128xf32>
    %584 = arith.addf %574, %583 : vector<8x128xf32>
    %585 = arith.addf %562, %579 : vector<8x128xf32>
    %c25_i32 = arith.constant 25 : i32
    %cst_231 = arith.constant 2.000000e-02 : f32
    %586 = vector.broadcast %cst_231 : f32 to vector<8x128xf32>
    %587 = arith.mulf %586, %581 : vector<8x128xf32>
    %cst_232 = arith.constant 3.500000e+00 : f32
    %588 = vector.broadcast %cst_232 : f32 to vector<8x128xf32>
    %589 = arith.addf %588, %587 : vector<8x128xf32>
    %590 = arith.mulf %581, %589 : vector<8x128xf32>
    %591 = arith.subf %7, %584 : vector<8x128xf32>
    %592 = arith.addf %590, %591 : vector<8x128xf32>
    %cst_233 = arith.constant 9.900000e-01 : f32
    %593 = vector.broadcast %cst_233 : f32 to vector<8x128xf32>
    %594 = arith.mulf %593, %584 : vector<8x128xf32>
    %cst_234 = arith.constant 1.000000e-03 : f32
    %595 = vector.broadcast %cst_234 : f32 to vector<8x128xf32>
    %596 = arith.mulf %595, %592 : vector<8x128xf32>
    %597 = arith.addf %594, %596 : vector<8x128xf32>
    %cst_235 = arith.constant 3.000000e+01 : f32
    %598 = vector.broadcast %cst_235 : f32 to vector<8x128xf32>
    %599 = arith.cmpf ogt, %592, %598 : vector<8x128xf32>
    %cst_236 = arith.constant 1.000000e+00 : f32
    %cst_237 = arith.constant 0.000000e+00 : f32
    %600 = vector.broadcast %cst_236 : f32 to vector<8x128xf32>
    %601 = vector.broadcast %cst_237 : f32 to vector<8x128xf32>
    %602 = arith.select %599, %600, %601 : vector<8x128xi1>, vector<8x128xf32>
    %cst_238 = arith.constant -6.500000e+01 : f32
    %603 = vector.broadcast %cst_238 : f32 to vector<8x128xf32>
    %604 = arith.select %599, %603, %592 : vector<8x128xi1>, vector<8x128xf32>
    %cst_239 = arith.constant 4.000000e+00 : f32
    %605 = vector.broadcast %cst_239 : f32 to vector<8x128xf32>
    %606 = arith.mulf %602, %605 : vector<8x128xf32>
    %607 = arith.addf %597, %606 : vector<8x128xf32>
    %608 = arith.addf %585, %602 : vector<8x128xf32>
    %c26_i32 = arith.constant 26 : i32
    %cst_240 = arith.constant 2.000000e-02 : f32
    %609 = vector.broadcast %cst_240 : f32 to vector<8x128xf32>
    %610 = arith.mulf %609, %604 : vector<8x128xf32>
    %cst_241 = arith.constant 3.500000e+00 : f32
    %611 = vector.broadcast %cst_241 : f32 to vector<8x128xf32>
    %612 = arith.addf %611, %610 : vector<8x128xf32>
    %613 = arith.mulf %604, %612 : vector<8x128xf32>
    %614 = arith.subf %7, %607 : vector<8x128xf32>
    %615 = arith.addf %613, %614 : vector<8x128xf32>
    %cst_242 = arith.constant 9.900000e-01 : f32
    %616 = vector.broadcast %cst_242 : f32 to vector<8x128xf32>
    %617 = arith.mulf %616, %607 : vector<8x128xf32>
    %cst_243 = arith.constant 1.000000e-03 : f32
    %618 = vector.broadcast %cst_243 : f32 to vector<8x128xf32>
    %619 = arith.mulf %618, %615 : vector<8x128xf32>
    %620 = arith.addf %617, %619 : vector<8x128xf32>
    %cst_244 = arith.constant 3.000000e+01 : f32
    %621 = vector.broadcast %cst_244 : f32 to vector<8x128xf32>
    %622 = arith.cmpf ogt, %615, %621 : vector<8x128xf32>
    %cst_245 = arith.constant 1.000000e+00 : f32
    %cst_246 = arith.constant 0.000000e+00 : f32
    %623 = vector.broadcast %cst_245 : f32 to vector<8x128xf32>
    %624 = vector.broadcast %cst_246 : f32 to vector<8x128xf32>
    %625 = arith.select %622, %623, %624 : vector<8x128xi1>, vector<8x128xf32>
    %cst_247 = arith.constant -6.500000e+01 : f32
    %626 = vector.broadcast %cst_247 : f32 to vector<8x128xf32>
    %627 = arith.select %622, %626, %615 : vector<8x128xi1>, vector<8x128xf32>
    %cst_248 = arith.constant 4.000000e+00 : f32
    %628 = vector.broadcast %cst_248 : f32 to vector<8x128xf32>
    %629 = arith.mulf %625, %628 : vector<8x128xf32>
    %630 = arith.addf %620, %629 : vector<8x128xf32>
    %631 = arith.addf %608, %625 : vector<8x128xf32>
    %c27_i32 = arith.constant 27 : i32
    %cst_249 = arith.constant 2.000000e-02 : f32
    %632 = vector.broadcast %cst_249 : f32 to vector<8x128xf32>
    %633 = arith.mulf %632, %627 : vector<8x128xf32>
    %cst_250 = arith.constant 3.500000e+00 : f32
    %634 = vector.broadcast %cst_250 : f32 to vector<8x128xf32>
    %635 = arith.addf %634, %633 : vector<8x128xf32>
    %636 = arith.mulf %627, %635 : vector<8x128xf32>
    %637 = arith.subf %7, %630 : vector<8x128xf32>
    %638 = arith.addf %636, %637 : vector<8x128xf32>
    %cst_251 = arith.constant 9.900000e-01 : f32
    %639 = vector.broadcast %cst_251 : f32 to vector<8x128xf32>
    %640 = arith.mulf %639, %630 : vector<8x128xf32>
    %cst_252 = arith.constant 1.000000e-03 : f32
    %641 = vector.broadcast %cst_252 : f32 to vector<8x128xf32>
    %642 = arith.mulf %641, %638 : vector<8x128xf32>
    %643 = arith.addf %640, %642 : vector<8x128xf32>
    %cst_253 = arith.constant 3.000000e+01 : f32
    %644 = vector.broadcast %cst_253 : f32 to vector<8x128xf32>
    %645 = arith.cmpf ogt, %638, %644 : vector<8x128xf32>
    %cst_254 = arith.constant 1.000000e+00 : f32
    %cst_255 = arith.constant 0.000000e+00 : f32
    %646 = vector.broadcast %cst_254 : f32 to vector<8x128xf32>
    %647 = vector.broadcast %cst_255 : f32 to vector<8x128xf32>
    %648 = arith.select %645, %646, %647 : vector<8x128xi1>, vector<8x128xf32>
    %cst_256 = arith.constant -6.500000e+01 : f32
    %649 = vector.broadcast %cst_256 : f32 to vector<8x128xf32>
    %650 = arith.select %645, %649, %638 : vector<8x128xi1>, vector<8x128xf32>
    %cst_257 = arith.constant 4.000000e+00 : f32
    %651 = vector.broadcast %cst_257 : f32 to vector<8x128xf32>
    %652 = arith.mulf %648, %651 : vector<8x128xf32>
    %653 = arith.addf %643, %652 : vector<8x128xf32>
    %654 = arith.addf %631, %648 : vector<8x128xf32>
    %c28_i32 = arith.constant 28 : i32
    %cst_258 = arith.constant 2.000000e-02 : f32
    %655 = vector.broadcast %cst_258 : f32 to vector<8x128xf32>
    %656 = arith.mulf %655, %650 : vector<8x128xf32>
    %cst_259 = arith.constant 3.500000e+00 : f32
    %657 = vector.broadcast %cst_259 : f32 to vector<8x128xf32>
    %658 = arith.addf %657, %656 : vector<8x128xf32>
    %659 = arith.mulf %650, %658 : vector<8x128xf32>
    %660 = arith.subf %7, %653 : vector<8x128xf32>
    %661 = arith.addf %659, %660 : vector<8x128xf32>
    %cst_260 = arith.constant 9.900000e-01 : f32
    %662 = vector.broadcast %cst_260 : f32 to vector<8x128xf32>
    %663 = arith.mulf %662, %653 : vector<8x128xf32>
    %cst_261 = arith.constant 1.000000e-03 : f32
    %664 = vector.broadcast %cst_261 : f32 to vector<8x128xf32>
    %665 = arith.mulf %664, %661 : vector<8x128xf32>
    %666 = arith.addf %663, %665 : vector<8x128xf32>
    %cst_262 = arith.constant 3.000000e+01 : f32
    %667 = vector.broadcast %cst_262 : f32 to vector<8x128xf32>
    %668 = arith.cmpf ogt, %661, %667 : vector<8x128xf32>
    %cst_263 = arith.constant 1.000000e+00 : f32
    %cst_264 = arith.constant 0.000000e+00 : f32
    %669 = vector.broadcast %cst_263 : f32 to vector<8x128xf32>
    %670 = vector.broadcast %cst_264 : f32 to vector<8x128xf32>
    %671 = arith.select %668, %669, %670 : vector<8x128xi1>, vector<8x128xf32>
    %cst_265 = arith.constant -6.500000e+01 : f32
    %672 = vector.broadcast %cst_265 : f32 to vector<8x128xf32>
    %673 = arith.select %668, %672, %661 : vector<8x128xi1>, vector<8x128xf32>
    %cst_266 = arith.constant 4.000000e+00 : f32
    %674 = vector.broadcast %cst_266 : f32 to vector<8x128xf32>
    %675 = arith.mulf %671, %674 : vector<8x128xf32>
    %676 = arith.addf %666, %675 : vector<8x128xf32>
    %677 = arith.addf %654, %671 : vector<8x128xf32>
    %c29_i32 = arith.constant 29 : i32
    %cst_267 = arith.constant 2.000000e-02 : f32
    %678 = vector.broadcast %cst_267 : f32 to vector<8x128xf32>
    %679 = arith.mulf %678, %673 : vector<8x128xf32>
    %cst_268 = arith.constant 3.500000e+00 : f32
    %680 = vector.broadcast %cst_268 : f32 to vector<8x128xf32>
    %681 = arith.addf %680, %679 : vector<8x128xf32>
    %682 = arith.mulf %673, %681 : vector<8x128xf32>
    %683 = arith.subf %7, %676 : vector<8x128xf32>
    %684 = arith.addf %682, %683 : vector<8x128xf32>
    %cst_269 = arith.constant 9.900000e-01 : f32
    %685 = vector.broadcast %cst_269 : f32 to vector<8x128xf32>
    %686 = arith.mulf %685, %676 : vector<8x128xf32>
    %cst_270 = arith.constant 1.000000e-03 : f32
    %687 = vector.broadcast %cst_270 : f32 to vector<8x128xf32>
    %688 = arith.mulf %687, %684 : vector<8x128xf32>
    %689 = arith.addf %686, %688 : vector<8x128xf32>
    %cst_271 = arith.constant 3.000000e+01 : f32
    %690 = vector.broadcast %cst_271 : f32 to vector<8x128xf32>
    %691 = arith.cmpf ogt, %684, %690 : vector<8x128xf32>
    %cst_272 = arith.constant 1.000000e+00 : f32
    %cst_273 = arith.constant 0.000000e+00 : f32
    %692 = vector.broadcast %cst_272 : f32 to vector<8x128xf32>
    %693 = vector.broadcast %cst_273 : f32 to vector<8x128xf32>
    %694 = arith.select %691, %692, %693 : vector<8x128xi1>, vector<8x128xf32>
    %cst_274 = arith.constant -6.500000e+01 : f32
    %695 = vector.broadcast %cst_274 : f32 to vector<8x128xf32>
    %696 = arith.select %691, %695, %684 : vector<8x128xi1>, vector<8x128xf32>
    %cst_275 = arith.constant 4.000000e+00 : f32
    %697 = vector.broadcast %cst_275 : f32 to vector<8x128xf32>
    %698 = arith.mulf %694, %697 : vector<8x128xf32>
    %699 = arith.addf %689, %698 : vector<8x128xf32>
    %700 = arith.addf %677, %694 : vector<8x128xf32>
    %c30_i32 = arith.constant 30 : i32
    %cst_276 = arith.constant 2.000000e-02 : f32
    %701 = vector.broadcast %cst_276 : f32 to vector<8x128xf32>
    %702 = arith.mulf %701, %696 : vector<8x128xf32>
    %cst_277 = arith.constant 3.500000e+00 : f32
    %703 = vector.broadcast %cst_277 : f32 to vector<8x128xf32>
    %704 = arith.addf %703, %702 : vector<8x128xf32>
    %705 = arith.mulf %696, %704 : vector<8x128xf32>
    %706 = arith.subf %7, %699 : vector<8x128xf32>
    %707 = arith.addf %705, %706 : vector<8x128xf32>
    %cst_278 = arith.constant 9.900000e-01 : f32
    %708 = vector.broadcast %cst_278 : f32 to vector<8x128xf32>
    %709 = arith.mulf %708, %699 : vector<8x128xf32>
    %cst_279 = arith.constant 1.000000e-03 : f32
    %710 = vector.broadcast %cst_279 : f32 to vector<8x128xf32>
    %711 = arith.mulf %710, %707 : vector<8x128xf32>
    %712 = arith.addf %709, %711 : vector<8x128xf32>
    %cst_280 = arith.constant 3.000000e+01 : f32
    %713 = vector.broadcast %cst_280 : f32 to vector<8x128xf32>
    %714 = arith.cmpf ogt, %707, %713 : vector<8x128xf32>
    %cst_281 = arith.constant 1.000000e+00 : f32
    %cst_282 = arith.constant 0.000000e+00 : f32
    %715 = vector.broadcast %cst_281 : f32 to vector<8x128xf32>
    %716 = vector.broadcast %cst_282 : f32 to vector<8x128xf32>
    %717 = arith.select %714, %715, %716 : vector<8x128xi1>, vector<8x128xf32>
    %cst_283 = arith.constant -6.500000e+01 : f32
    %718 = vector.broadcast %cst_283 : f32 to vector<8x128xf32>
    %719 = arith.select %714, %718, %707 : vector<8x128xi1>, vector<8x128xf32>
    %cst_284 = arith.constant 4.000000e+00 : f32
    %720 = vector.broadcast %cst_284 : f32 to vector<8x128xf32>
    %721 = arith.mulf %717, %720 : vector<8x128xf32>
    %722 = arith.addf %712, %721 : vector<8x128xf32>
    %723 = arith.addf %700, %717 : vector<8x128xf32>
    %c31_i32 = arith.constant 31 : i32
    %cst_285 = arith.constant 2.000000e-02 : f32
    %724 = vector.broadcast %cst_285 : f32 to vector<8x128xf32>
    %725 = arith.mulf %724, %719 : vector<8x128xf32>
    %cst_286 = arith.constant 3.500000e+00 : f32
    %726 = vector.broadcast %cst_286 : f32 to vector<8x128xf32>
    %727 = arith.addf %726, %725 : vector<8x128xf32>
    %728 = arith.mulf %719, %727 : vector<8x128xf32>
    %729 = arith.subf %7, %722 : vector<8x128xf32>
    %730 = arith.addf %728, %729 : vector<8x128xf32>
    %cst_287 = arith.constant 9.900000e-01 : f32
    %731 = vector.broadcast %cst_287 : f32 to vector<8x128xf32>
    %732 = arith.mulf %731, %722 : vector<8x128xf32>
    %cst_288 = arith.constant 1.000000e-03 : f32
    %733 = vector.broadcast %cst_288 : f32 to vector<8x128xf32>
    %734 = arith.mulf %733, %730 : vector<8x128xf32>
    %735 = arith.addf %732, %734 : vector<8x128xf32>
    %cst_289 = arith.constant 3.000000e+01 : f32
    %736 = vector.broadcast %cst_289 : f32 to vector<8x128xf32>
    %737 = arith.cmpf ogt, %730, %736 : vector<8x128xf32>
    %cst_290 = arith.constant 1.000000e+00 : f32
    %cst_291 = arith.constant 0.000000e+00 : f32
    %738 = vector.broadcast %cst_290 : f32 to vector<8x128xf32>
    %739 = vector.broadcast %cst_291 : f32 to vector<8x128xf32>
    %740 = arith.select %737, %738, %739 : vector<8x128xi1>, vector<8x128xf32>
    %cst_292 = arith.constant -6.500000e+01 : f32
    %741 = vector.broadcast %cst_292 : f32 to vector<8x128xf32>
    %742 = arith.select %737, %741, %730 : vector<8x128xi1>, vector<8x128xf32>
    %cst_293 = arith.constant 4.000000e+00 : f32
    %743 = vector.broadcast %cst_293 : f32 to vector<8x128xf32>
    %744 = arith.mulf %740, %743 : vector<8x128xf32>
    %745 = arith.addf %735, %744 : vector<8x128xf32>
    %746 = arith.addf %723, %740 : vector<8x128xf32>
    %c32_i32 = arith.constant 32 : i32
    %cst_294 = arith.constant 2.000000e-02 : f32
    %747 = vector.broadcast %cst_294 : f32 to vector<8x128xf32>
    %748 = arith.mulf %747, %742 : vector<8x128xf32>
    %cst_295 = arith.constant 3.500000e+00 : f32
    %749 = vector.broadcast %cst_295 : f32 to vector<8x128xf32>
    %750 = arith.addf %749, %748 : vector<8x128xf32>
    %751 = arith.mulf %742, %750 : vector<8x128xf32>
    %752 = arith.subf %7, %745 : vector<8x128xf32>
    %753 = arith.addf %751, %752 : vector<8x128xf32>
    %cst_296 = arith.constant 9.900000e-01 : f32
    %754 = vector.broadcast %cst_296 : f32 to vector<8x128xf32>
    %755 = arith.mulf %754, %745 : vector<8x128xf32>
    %cst_297 = arith.constant 1.000000e-03 : f32
    %756 = vector.broadcast %cst_297 : f32 to vector<8x128xf32>
    %757 = arith.mulf %756, %753 : vector<8x128xf32>
    %758 = arith.addf %755, %757 : vector<8x128xf32>
    %cst_298 = arith.constant 3.000000e+01 : f32
    %759 = vector.broadcast %cst_298 : f32 to vector<8x128xf32>
    %760 = arith.cmpf ogt, %753, %759 : vector<8x128xf32>
    %cst_299 = arith.constant 1.000000e+00 : f32
    %cst_300 = arith.constant 0.000000e+00 : f32
    %761 = vector.broadcast %cst_299 : f32 to vector<8x128xf32>
    %762 = vector.broadcast %cst_300 : f32 to vector<8x128xf32>
    %763 = arith.select %760, %761, %762 : vector<8x128xi1>, vector<8x128xf32>
    %cst_301 = arith.constant -6.500000e+01 : f32
    %764 = vector.broadcast %cst_301 : f32 to vector<8x128xf32>
    %765 = arith.select %760, %764, %753 : vector<8x128xi1>, vector<8x128xf32>
    %cst_302 = arith.constant 4.000000e+00 : f32
    %766 = vector.broadcast %cst_302 : f32 to vector<8x128xf32>
    %767 = arith.mulf %763, %766 : vector<8x128xf32>
    %768 = arith.addf %758, %767 : vector<8x128xf32>
    %769 = arith.addf %746, %763 : vector<8x128xf32>
    %c33_i32 = arith.constant 33 : i32
    %cst_303 = arith.constant 2.000000e-02 : f32
    %770 = vector.broadcast %cst_303 : f32 to vector<8x128xf32>
    %771 = arith.mulf %770, %765 : vector<8x128xf32>
    %cst_304 = arith.constant 3.500000e+00 : f32
    %772 = vector.broadcast %cst_304 : f32 to vector<8x128xf32>
    %773 = arith.addf %772, %771 : vector<8x128xf32>
    %774 = arith.mulf %765, %773 : vector<8x128xf32>
    %775 = arith.subf %7, %768 : vector<8x128xf32>
    %776 = arith.addf %774, %775 : vector<8x128xf32>
    %cst_305 = arith.constant 9.900000e-01 : f32
    %777 = vector.broadcast %cst_305 : f32 to vector<8x128xf32>
    %778 = arith.mulf %777, %768 : vector<8x128xf32>
    %cst_306 = arith.constant 1.000000e-03 : f32
    %779 = vector.broadcast %cst_306 : f32 to vector<8x128xf32>
    %780 = arith.mulf %779, %776 : vector<8x128xf32>
    %781 = arith.addf %778, %780 : vector<8x128xf32>
    %cst_307 = arith.constant 3.000000e+01 : f32
    %782 = vector.broadcast %cst_307 : f32 to vector<8x128xf32>
    %783 = arith.cmpf ogt, %776, %782 : vector<8x128xf32>
    %cst_308 = arith.constant 1.000000e+00 : f32
    %cst_309 = arith.constant 0.000000e+00 : f32
    %784 = vector.broadcast %cst_308 : f32 to vector<8x128xf32>
    %785 = vector.broadcast %cst_309 : f32 to vector<8x128xf32>
    %786 = arith.select %783, %784, %785 : vector<8x128xi1>, vector<8x128xf32>
    %cst_310 = arith.constant -6.500000e+01 : f32
    %787 = vector.broadcast %cst_310 : f32 to vector<8x128xf32>
    %788 = arith.select %783, %787, %776 : vector<8x128xi1>, vector<8x128xf32>
    %cst_311 = arith.constant 4.000000e+00 : f32
    %789 = vector.broadcast %cst_311 : f32 to vector<8x128xf32>
    %790 = arith.mulf %786, %789 : vector<8x128xf32>
    %791 = arith.addf %781, %790 : vector<8x128xf32>
    %792 = arith.addf %769, %786 : vector<8x128xf32>
    %c34_i32 = arith.constant 34 : i32
    %cst_312 = arith.constant 2.000000e-02 : f32
    %793 = vector.broadcast %cst_312 : f32 to vector<8x128xf32>
    %794 = arith.mulf %793, %788 : vector<8x128xf32>
    %cst_313 = arith.constant 3.500000e+00 : f32
    %795 = vector.broadcast %cst_313 : f32 to vector<8x128xf32>
    %796 = arith.addf %795, %794 : vector<8x128xf32>
    %797 = arith.mulf %788, %796 : vector<8x128xf32>
    %798 = arith.subf %7, %791 : vector<8x128xf32>
    %799 = arith.addf %797, %798 : vector<8x128xf32>
    %cst_314 = arith.constant 9.900000e-01 : f32
    %800 = vector.broadcast %cst_314 : f32 to vector<8x128xf32>
    %801 = arith.mulf %800, %791 : vector<8x128xf32>
    %cst_315 = arith.constant 1.000000e-03 : f32
    %802 = vector.broadcast %cst_315 : f32 to vector<8x128xf32>
    %803 = arith.mulf %802, %799 : vector<8x128xf32>
    %804 = arith.addf %801, %803 : vector<8x128xf32>
    %cst_316 = arith.constant 3.000000e+01 : f32
    %805 = vector.broadcast %cst_316 : f32 to vector<8x128xf32>
    %806 = arith.cmpf ogt, %799, %805 : vector<8x128xf32>
    %cst_317 = arith.constant 1.000000e+00 : f32
    %cst_318 = arith.constant 0.000000e+00 : f32
    %807 = vector.broadcast %cst_317 : f32 to vector<8x128xf32>
    %808 = vector.broadcast %cst_318 : f32 to vector<8x128xf32>
    %809 = arith.select %806, %807, %808 : vector<8x128xi1>, vector<8x128xf32>
    %cst_319 = arith.constant -6.500000e+01 : f32
    %810 = vector.broadcast %cst_319 : f32 to vector<8x128xf32>
    %811 = arith.select %806, %810, %799 : vector<8x128xi1>, vector<8x128xf32>
    %cst_320 = arith.constant 4.000000e+00 : f32
    %812 = vector.broadcast %cst_320 : f32 to vector<8x128xf32>
    %813 = arith.mulf %809, %812 : vector<8x128xf32>
    %814 = arith.addf %804, %813 : vector<8x128xf32>
    %815 = arith.addf %792, %809 : vector<8x128xf32>
    %c35_i32 = arith.constant 35 : i32
    %cst_321 = arith.constant 2.000000e-02 : f32
    %816 = vector.broadcast %cst_321 : f32 to vector<8x128xf32>
    %817 = arith.mulf %816, %811 : vector<8x128xf32>
    %cst_322 = arith.constant 3.500000e+00 : f32
    %818 = vector.broadcast %cst_322 : f32 to vector<8x128xf32>
    %819 = arith.addf %818, %817 : vector<8x128xf32>
    %820 = arith.mulf %811, %819 : vector<8x128xf32>
    %821 = arith.subf %7, %814 : vector<8x128xf32>
    %822 = arith.addf %820, %821 : vector<8x128xf32>
    %cst_323 = arith.constant 9.900000e-01 : f32
    %823 = vector.broadcast %cst_323 : f32 to vector<8x128xf32>
    %824 = arith.mulf %823, %814 : vector<8x128xf32>
    %cst_324 = arith.constant 1.000000e-03 : f32
    %825 = vector.broadcast %cst_324 : f32 to vector<8x128xf32>
    %826 = arith.mulf %825, %822 : vector<8x128xf32>
    %827 = arith.addf %824, %826 : vector<8x128xf32>
    %cst_325 = arith.constant 3.000000e+01 : f32
    %828 = vector.broadcast %cst_325 : f32 to vector<8x128xf32>
    %829 = arith.cmpf ogt, %822, %828 : vector<8x128xf32>
    %cst_326 = arith.constant 1.000000e+00 : f32
    %cst_327 = arith.constant 0.000000e+00 : f32
    %830 = vector.broadcast %cst_326 : f32 to vector<8x128xf32>
    %831 = vector.broadcast %cst_327 : f32 to vector<8x128xf32>
    %832 = arith.select %829, %830, %831 : vector<8x128xi1>, vector<8x128xf32>
    %cst_328 = arith.constant -6.500000e+01 : f32
    %833 = vector.broadcast %cst_328 : f32 to vector<8x128xf32>
    %834 = arith.select %829, %833, %822 : vector<8x128xi1>, vector<8x128xf32>
    %cst_329 = arith.constant 4.000000e+00 : f32
    %835 = vector.broadcast %cst_329 : f32 to vector<8x128xf32>
    %836 = arith.mulf %832, %835 : vector<8x128xf32>
    %837 = arith.addf %827, %836 : vector<8x128xf32>
    %838 = arith.addf %815, %832 : vector<8x128xf32>
    %c36_i32 = arith.constant 36 : i32
    %cst_330 = arith.constant 2.000000e-02 : f32
    %839 = vector.broadcast %cst_330 : f32 to vector<8x128xf32>
    %840 = arith.mulf %839, %834 : vector<8x128xf32>
    %cst_331 = arith.constant 3.500000e+00 : f32
    %841 = vector.broadcast %cst_331 : f32 to vector<8x128xf32>
    %842 = arith.addf %841, %840 : vector<8x128xf32>
    %843 = arith.mulf %834, %842 : vector<8x128xf32>
    %844 = arith.subf %7, %837 : vector<8x128xf32>
    %845 = arith.addf %843, %844 : vector<8x128xf32>
    %cst_332 = arith.constant 9.900000e-01 : f32
    %846 = vector.broadcast %cst_332 : f32 to vector<8x128xf32>
    %847 = arith.mulf %846, %837 : vector<8x128xf32>
    %cst_333 = arith.constant 1.000000e-03 : f32
    %848 = vector.broadcast %cst_333 : f32 to vector<8x128xf32>
    %849 = arith.mulf %848, %845 : vector<8x128xf32>
    %850 = arith.addf %847, %849 : vector<8x128xf32>
    %cst_334 = arith.constant 3.000000e+01 : f32
    %851 = vector.broadcast %cst_334 : f32 to vector<8x128xf32>
    %852 = arith.cmpf ogt, %845, %851 : vector<8x128xf32>
    %cst_335 = arith.constant 1.000000e+00 : f32
    %cst_336 = arith.constant 0.000000e+00 : f32
    %853 = vector.broadcast %cst_335 : f32 to vector<8x128xf32>
    %854 = vector.broadcast %cst_336 : f32 to vector<8x128xf32>
    %855 = arith.select %852, %853, %854 : vector<8x128xi1>, vector<8x128xf32>
    %cst_337 = arith.constant -6.500000e+01 : f32
    %856 = vector.broadcast %cst_337 : f32 to vector<8x128xf32>
    %857 = arith.select %852, %856, %845 : vector<8x128xi1>, vector<8x128xf32>
    %cst_338 = arith.constant 4.000000e+00 : f32
    %858 = vector.broadcast %cst_338 : f32 to vector<8x128xf32>
    %859 = arith.mulf %855, %858 : vector<8x128xf32>
    %860 = arith.addf %850, %859 : vector<8x128xf32>
    %861 = arith.addf %838, %855 : vector<8x128xf32>
    %c37_i32 = arith.constant 37 : i32
    %cst_339 = arith.constant 2.000000e-02 : f32
    %862 = vector.broadcast %cst_339 : f32 to vector<8x128xf32>
    %863 = arith.mulf %862, %857 : vector<8x128xf32>
    %cst_340 = arith.constant 3.500000e+00 : f32
    %864 = vector.broadcast %cst_340 : f32 to vector<8x128xf32>
    %865 = arith.addf %864, %863 : vector<8x128xf32>
    %866 = arith.mulf %857, %865 : vector<8x128xf32>
    %867 = arith.subf %7, %860 : vector<8x128xf32>
    %868 = arith.addf %866, %867 : vector<8x128xf32>
    %cst_341 = arith.constant 9.900000e-01 : f32
    %869 = vector.broadcast %cst_341 : f32 to vector<8x128xf32>
    %870 = arith.mulf %869, %860 : vector<8x128xf32>
    %cst_342 = arith.constant 1.000000e-03 : f32
    %871 = vector.broadcast %cst_342 : f32 to vector<8x128xf32>
    %872 = arith.mulf %871, %868 : vector<8x128xf32>
    %873 = arith.addf %870, %872 : vector<8x128xf32>
    %cst_343 = arith.constant 3.000000e+01 : f32
    %874 = vector.broadcast %cst_343 : f32 to vector<8x128xf32>
    %875 = arith.cmpf ogt, %868, %874 : vector<8x128xf32>
    %cst_344 = arith.constant 1.000000e+00 : f32
    %cst_345 = arith.constant 0.000000e+00 : f32
    %876 = vector.broadcast %cst_344 : f32 to vector<8x128xf32>
    %877 = vector.broadcast %cst_345 : f32 to vector<8x128xf32>
    %878 = arith.select %875, %876, %877 : vector<8x128xi1>, vector<8x128xf32>
    %cst_346 = arith.constant -6.500000e+01 : f32
    %879 = vector.broadcast %cst_346 : f32 to vector<8x128xf32>
    %880 = arith.select %875, %879, %868 : vector<8x128xi1>, vector<8x128xf32>
    %cst_347 = arith.constant 4.000000e+00 : f32
    %881 = vector.broadcast %cst_347 : f32 to vector<8x128xf32>
    %882 = arith.mulf %878, %881 : vector<8x128xf32>
    %883 = arith.addf %873, %882 : vector<8x128xf32>
    %884 = arith.addf %861, %878 : vector<8x128xf32>
    %c38_i32 = arith.constant 38 : i32
    %cst_348 = arith.constant 2.000000e-02 : f32
    %885 = vector.broadcast %cst_348 : f32 to vector<8x128xf32>
    %886 = arith.mulf %885, %880 : vector<8x128xf32>
    %cst_349 = arith.constant 3.500000e+00 : f32
    %887 = vector.broadcast %cst_349 : f32 to vector<8x128xf32>
    %888 = arith.addf %887, %886 : vector<8x128xf32>
    %889 = arith.mulf %880, %888 : vector<8x128xf32>
    %890 = arith.subf %7, %883 : vector<8x128xf32>
    %891 = arith.addf %889, %890 : vector<8x128xf32>
    %cst_350 = arith.constant 9.900000e-01 : f32
    %892 = vector.broadcast %cst_350 : f32 to vector<8x128xf32>
    %893 = arith.mulf %892, %883 : vector<8x128xf32>
    %cst_351 = arith.constant 1.000000e-03 : f32
    %894 = vector.broadcast %cst_351 : f32 to vector<8x128xf32>
    %895 = arith.mulf %894, %891 : vector<8x128xf32>
    %896 = arith.addf %893, %895 : vector<8x128xf32>
    %cst_352 = arith.constant 3.000000e+01 : f32
    %897 = vector.broadcast %cst_352 : f32 to vector<8x128xf32>
    %898 = arith.cmpf ogt, %891, %897 : vector<8x128xf32>
    %cst_353 = arith.constant 1.000000e+00 : f32
    %cst_354 = arith.constant 0.000000e+00 : f32
    %899 = vector.broadcast %cst_353 : f32 to vector<8x128xf32>
    %900 = vector.broadcast %cst_354 : f32 to vector<8x128xf32>
    %901 = arith.select %898, %899, %900 : vector<8x128xi1>, vector<8x128xf32>
    %cst_355 = arith.constant -6.500000e+01 : f32
    %902 = vector.broadcast %cst_355 : f32 to vector<8x128xf32>
    %903 = arith.select %898, %902, %891 : vector<8x128xi1>, vector<8x128xf32>
    %cst_356 = arith.constant 4.000000e+00 : f32
    %904 = vector.broadcast %cst_356 : f32 to vector<8x128xf32>
    %905 = arith.mulf %901, %904 : vector<8x128xf32>
    %906 = arith.addf %896, %905 : vector<8x128xf32>
    %907 = arith.addf %884, %901 : vector<8x128xf32>
    %c39_i32 = arith.constant 39 : i32
    %cst_357 = arith.constant 2.000000e-02 : f32
    %908 = vector.broadcast %cst_357 : f32 to vector<8x128xf32>
    %909 = arith.mulf %908, %903 : vector<8x128xf32>
    %cst_358 = arith.constant 3.500000e+00 : f32
    %910 = vector.broadcast %cst_358 : f32 to vector<8x128xf32>
    %911 = arith.addf %910, %909 : vector<8x128xf32>
    %912 = arith.mulf %903, %911 : vector<8x128xf32>
    %913 = arith.subf %7, %906 : vector<8x128xf32>
    %914 = arith.addf %912, %913 : vector<8x128xf32>
    %cst_359 = arith.constant 9.900000e-01 : f32
    %915 = vector.broadcast %cst_359 : f32 to vector<8x128xf32>
    %916 = arith.mulf %915, %906 : vector<8x128xf32>
    %cst_360 = arith.constant 1.000000e-03 : f32
    %917 = vector.broadcast %cst_360 : f32 to vector<8x128xf32>
    %918 = arith.mulf %917, %914 : vector<8x128xf32>
    %919 = arith.addf %916, %918 : vector<8x128xf32>
    %cst_361 = arith.constant 3.000000e+01 : f32
    %920 = vector.broadcast %cst_361 : f32 to vector<8x128xf32>
    %921 = arith.cmpf ogt, %914, %920 : vector<8x128xf32>
    %cst_362 = arith.constant 1.000000e+00 : f32
    %cst_363 = arith.constant 0.000000e+00 : f32
    %922 = vector.broadcast %cst_362 : f32 to vector<8x128xf32>
    %923 = vector.broadcast %cst_363 : f32 to vector<8x128xf32>
    %924 = arith.select %921, %922, %923 : vector<8x128xi1>, vector<8x128xf32>
    %cst_364 = arith.constant -6.500000e+01 : f32
    %925 = vector.broadcast %cst_364 : f32 to vector<8x128xf32>
    %926 = arith.select %921, %925, %914 : vector<8x128xi1>, vector<8x128xf32>
    %cst_365 = arith.constant 4.000000e+00 : f32
    %927 = vector.broadcast %cst_365 : f32 to vector<8x128xf32>
    %928 = arith.mulf %924, %927 : vector<8x128xf32>
    %929 = arith.addf %919, %928 : vector<8x128xf32>
    %930 = arith.addf %907, %924 : vector<8x128xf32>
    %c40_i32 = arith.constant 40 : i32
    %cst_366 = arith.constant 2.000000e-02 : f32
    %931 = vector.broadcast %cst_366 : f32 to vector<8x128xf32>
    %932 = arith.mulf %931, %926 : vector<8x128xf32>
    %cst_367 = arith.constant 3.500000e+00 : f32
    %933 = vector.broadcast %cst_367 : f32 to vector<8x128xf32>
    %934 = arith.addf %933, %932 : vector<8x128xf32>
    %935 = arith.mulf %926, %934 : vector<8x128xf32>
    %936 = arith.subf %7, %929 : vector<8x128xf32>
    %937 = arith.addf %935, %936 : vector<8x128xf32>
    %cst_368 = arith.constant 9.900000e-01 : f32
    %938 = vector.broadcast %cst_368 : f32 to vector<8x128xf32>
    %939 = arith.mulf %938, %929 : vector<8x128xf32>
    %cst_369 = arith.constant 1.000000e-03 : f32
    %940 = vector.broadcast %cst_369 : f32 to vector<8x128xf32>
    %941 = arith.mulf %940, %937 : vector<8x128xf32>
    %942 = arith.addf %939, %941 : vector<8x128xf32>
    %cst_370 = arith.constant 3.000000e+01 : f32
    %943 = vector.broadcast %cst_370 : f32 to vector<8x128xf32>
    %944 = arith.cmpf ogt, %937, %943 : vector<8x128xf32>
    %cst_371 = arith.constant 1.000000e+00 : f32
    %cst_372 = arith.constant 0.000000e+00 : f32
    %945 = vector.broadcast %cst_371 : f32 to vector<8x128xf32>
    %946 = vector.broadcast %cst_372 : f32 to vector<8x128xf32>
    %947 = arith.select %944, %945, %946 : vector<8x128xi1>, vector<8x128xf32>
    %cst_373 = arith.constant -6.500000e+01 : f32
    %948 = vector.broadcast %cst_373 : f32 to vector<8x128xf32>
    %949 = arith.select %944, %948, %937 : vector<8x128xi1>, vector<8x128xf32>
    %cst_374 = arith.constant 4.000000e+00 : f32
    %950 = vector.broadcast %cst_374 : f32 to vector<8x128xf32>
    %951 = arith.mulf %947, %950 : vector<8x128xf32>
    %952 = arith.addf %942, %951 : vector<8x128xf32>
    %953 = arith.addf %930, %947 : vector<8x128xf32>
    %c41_i32 = arith.constant 41 : i32
    %cst_375 = arith.constant 2.000000e-02 : f32
    %954 = vector.broadcast %cst_375 : f32 to vector<8x128xf32>
    %955 = arith.mulf %954, %949 : vector<8x128xf32>
    %cst_376 = arith.constant 3.500000e+00 : f32
    %956 = vector.broadcast %cst_376 : f32 to vector<8x128xf32>
    %957 = arith.addf %956, %955 : vector<8x128xf32>
    %958 = arith.mulf %949, %957 : vector<8x128xf32>
    %959 = arith.subf %7, %952 : vector<8x128xf32>
    %960 = arith.addf %958, %959 : vector<8x128xf32>
    %cst_377 = arith.constant 9.900000e-01 : f32
    %961 = vector.broadcast %cst_377 : f32 to vector<8x128xf32>
    %962 = arith.mulf %961, %952 : vector<8x128xf32>
    %cst_378 = arith.constant 1.000000e-03 : f32
    %963 = vector.broadcast %cst_378 : f32 to vector<8x128xf32>
    %964 = arith.mulf %963, %960 : vector<8x128xf32>
    %965 = arith.addf %962, %964 : vector<8x128xf32>
    %cst_379 = arith.constant 3.000000e+01 : f32
    %966 = vector.broadcast %cst_379 : f32 to vector<8x128xf32>
    %967 = arith.cmpf ogt, %960, %966 : vector<8x128xf32>
    %cst_380 = arith.constant 1.000000e+00 : f32
    %cst_381 = arith.constant 0.000000e+00 : f32
    %968 = vector.broadcast %cst_380 : f32 to vector<8x128xf32>
    %969 = vector.broadcast %cst_381 : f32 to vector<8x128xf32>
    %970 = arith.select %967, %968, %969 : vector<8x128xi1>, vector<8x128xf32>
    %cst_382 = arith.constant -6.500000e+01 : f32
    %971 = vector.broadcast %cst_382 : f32 to vector<8x128xf32>
    %972 = arith.select %967, %971, %960 : vector<8x128xi1>, vector<8x128xf32>
    %cst_383 = arith.constant 4.000000e+00 : f32
    %973 = vector.broadcast %cst_383 : f32 to vector<8x128xf32>
    %974 = arith.mulf %970, %973 : vector<8x128xf32>
    %975 = arith.addf %965, %974 : vector<8x128xf32>
    %976 = arith.addf %953, %970 : vector<8x128xf32>
    %c42_i32 = arith.constant 42 : i32
    %cst_384 = arith.constant 2.000000e-02 : f32
    %977 = vector.broadcast %cst_384 : f32 to vector<8x128xf32>
    %978 = arith.mulf %977, %972 : vector<8x128xf32>
    %cst_385 = arith.constant 3.500000e+00 : f32
    %979 = vector.broadcast %cst_385 : f32 to vector<8x128xf32>
    %980 = arith.addf %979, %978 : vector<8x128xf32>
    %981 = arith.mulf %972, %980 : vector<8x128xf32>
    %982 = arith.subf %7, %975 : vector<8x128xf32>
    %983 = arith.addf %981, %982 : vector<8x128xf32>
    %cst_386 = arith.constant 9.900000e-01 : f32
    %984 = vector.broadcast %cst_386 : f32 to vector<8x128xf32>
    %985 = arith.mulf %984, %975 : vector<8x128xf32>
    %cst_387 = arith.constant 1.000000e-03 : f32
    %986 = vector.broadcast %cst_387 : f32 to vector<8x128xf32>
    %987 = arith.mulf %986, %983 : vector<8x128xf32>
    %988 = arith.addf %985, %987 : vector<8x128xf32>
    %cst_388 = arith.constant 3.000000e+01 : f32
    %989 = vector.broadcast %cst_388 : f32 to vector<8x128xf32>
    %990 = arith.cmpf ogt, %983, %989 : vector<8x128xf32>
    %cst_389 = arith.constant 1.000000e+00 : f32
    %cst_390 = arith.constant 0.000000e+00 : f32
    %991 = vector.broadcast %cst_389 : f32 to vector<8x128xf32>
    %992 = vector.broadcast %cst_390 : f32 to vector<8x128xf32>
    %993 = arith.select %990, %991, %992 : vector<8x128xi1>, vector<8x128xf32>
    %cst_391 = arith.constant -6.500000e+01 : f32
    %994 = vector.broadcast %cst_391 : f32 to vector<8x128xf32>
    %995 = arith.select %990, %994, %983 : vector<8x128xi1>, vector<8x128xf32>
    %cst_392 = arith.constant 4.000000e+00 : f32
    %996 = vector.broadcast %cst_392 : f32 to vector<8x128xf32>
    %997 = arith.mulf %993, %996 : vector<8x128xf32>
    %998 = arith.addf %988, %997 : vector<8x128xf32>
    %999 = arith.addf %976, %993 : vector<8x128xf32>
    %c43_i32 = arith.constant 43 : i32
    %cst_393 = arith.constant 2.000000e-02 : f32
    %1000 = vector.broadcast %cst_393 : f32 to vector<8x128xf32>
    %1001 = arith.mulf %1000, %995 : vector<8x128xf32>
    %cst_394 = arith.constant 3.500000e+00 : f32
    %1002 = vector.broadcast %cst_394 : f32 to vector<8x128xf32>
    %1003 = arith.addf %1002, %1001 : vector<8x128xf32>
    %1004 = arith.mulf %995, %1003 : vector<8x128xf32>
    %1005 = arith.subf %7, %998 : vector<8x128xf32>
    %1006 = arith.addf %1004, %1005 : vector<8x128xf32>
    %cst_395 = arith.constant 9.900000e-01 : f32
    %1007 = vector.broadcast %cst_395 : f32 to vector<8x128xf32>
    %1008 = arith.mulf %1007, %998 : vector<8x128xf32>
    %cst_396 = arith.constant 1.000000e-03 : f32
    %1009 = vector.broadcast %cst_396 : f32 to vector<8x128xf32>
    %1010 = arith.mulf %1009, %1006 : vector<8x128xf32>
    %1011 = arith.addf %1008, %1010 : vector<8x128xf32>
    %cst_397 = arith.constant 3.000000e+01 : f32
    %1012 = vector.broadcast %cst_397 : f32 to vector<8x128xf32>
    %1013 = arith.cmpf ogt, %1006, %1012 : vector<8x128xf32>
    %cst_398 = arith.constant 1.000000e+00 : f32
    %cst_399 = arith.constant 0.000000e+00 : f32
    %1014 = vector.broadcast %cst_398 : f32 to vector<8x128xf32>
    %1015 = vector.broadcast %cst_399 : f32 to vector<8x128xf32>
    %1016 = arith.select %1013, %1014, %1015 : vector<8x128xi1>, vector<8x128xf32>
    %cst_400 = arith.constant -6.500000e+01 : f32
    %1017 = vector.broadcast %cst_400 : f32 to vector<8x128xf32>
    %1018 = arith.select %1013, %1017, %1006 : vector<8x128xi1>, vector<8x128xf32>
    %cst_401 = arith.constant 4.000000e+00 : f32
    %1019 = vector.broadcast %cst_401 : f32 to vector<8x128xf32>
    %1020 = arith.mulf %1016, %1019 : vector<8x128xf32>
    %1021 = arith.addf %1011, %1020 : vector<8x128xf32>
    %1022 = arith.addf %999, %1016 : vector<8x128xf32>
    %c44_i32 = arith.constant 44 : i32
    %cst_402 = arith.constant 2.000000e-02 : f32
    %1023 = vector.broadcast %cst_402 : f32 to vector<8x128xf32>
    %1024 = arith.mulf %1023, %1018 : vector<8x128xf32>
    %cst_403 = arith.constant 3.500000e+00 : f32
    %1025 = vector.broadcast %cst_403 : f32 to vector<8x128xf32>
    %1026 = arith.addf %1025, %1024 : vector<8x128xf32>
    %1027 = arith.mulf %1018, %1026 : vector<8x128xf32>
    %1028 = arith.subf %7, %1021 : vector<8x128xf32>
    %1029 = arith.addf %1027, %1028 : vector<8x128xf32>
    %cst_404 = arith.constant 9.900000e-01 : f32
    %1030 = vector.broadcast %cst_404 : f32 to vector<8x128xf32>
    %1031 = arith.mulf %1030, %1021 : vector<8x128xf32>
    %cst_405 = arith.constant 1.000000e-03 : f32
    %1032 = vector.broadcast %cst_405 : f32 to vector<8x128xf32>
    %1033 = arith.mulf %1032, %1029 : vector<8x128xf32>
    %1034 = arith.addf %1031, %1033 : vector<8x128xf32>
    %cst_406 = arith.constant 3.000000e+01 : f32
    %1035 = vector.broadcast %cst_406 : f32 to vector<8x128xf32>
    %1036 = arith.cmpf ogt, %1029, %1035 : vector<8x128xf32>
    %cst_407 = arith.constant 1.000000e+00 : f32
    %cst_408 = arith.constant 0.000000e+00 : f32
    %1037 = vector.broadcast %cst_407 : f32 to vector<8x128xf32>
    %1038 = vector.broadcast %cst_408 : f32 to vector<8x128xf32>
    %1039 = arith.select %1036, %1037, %1038 : vector<8x128xi1>, vector<8x128xf32>
    %cst_409 = arith.constant -6.500000e+01 : f32
    %1040 = vector.broadcast %cst_409 : f32 to vector<8x128xf32>
    %1041 = arith.select %1036, %1040, %1029 : vector<8x128xi1>, vector<8x128xf32>
    %cst_410 = arith.constant 4.000000e+00 : f32
    %1042 = vector.broadcast %cst_410 : f32 to vector<8x128xf32>
    %1043 = arith.mulf %1039, %1042 : vector<8x128xf32>
    %1044 = arith.addf %1034, %1043 : vector<8x128xf32>
    %1045 = arith.addf %1022, %1039 : vector<8x128xf32>
    %c45_i32 = arith.constant 45 : i32
    %cst_411 = arith.constant 2.000000e-02 : f32
    %1046 = vector.broadcast %cst_411 : f32 to vector<8x128xf32>
    %1047 = arith.mulf %1046, %1041 : vector<8x128xf32>
    %cst_412 = arith.constant 3.500000e+00 : f32
    %1048 = vector.broadcast %cst_412 : f32 to vector<8x128xf32>
    %1049 = arith.addf %1048, %1047 : vector<8x128xf32>
    %1050 = arith.mulf %1041, %1049 : vector<8x128xf32>
    %1051 = arith.subf %7, %1044 : vector<8x128xf32>
    %1052 = arith.addf %1050, %1051 : vector<8x128xf32>
    %cst_413 = arith.constant 9.900000e-01 : f32
    %1053 = vector.broadcast %cst_413 : f32 to vector<8x128xf32>
    %1054 = arith.mulf %1053, %1044 : vector<8x128xf32>
    %cst_414 = arith.constant 1.000000e-03 : f32
    %1055 = vector.broadcast %cst_414 : f32 to vector<8x128xf32>
    %1056 = arith.mulf %1055, %1052 : vector<8x128xf32>
    %1057 = arith.addf %1054, %1056 : vector<8x128xf32>
    %cst_415 = arith.constant 3.000000e+01 : f32
    %1058 = vector.broadcast %cst_415 : f32 to vector<8x128xf32>
    %1059 = arith.cmpf ogt, %1052, %1058 : vector<8x128xf32>
    %cst_416 = arith.constant 1.000000e+00 : f32
    %cst_417 = arith.constant 0.000000e+00 : f32
    %1060 = vector.broadcast %cst_416 : f32 to vector<8x128xf32>
    %1061 = vector.broadcast %cst_417 : f32 to vector<8x128xf32>
    %1062 = arith.select %1059, %1060, %1061 : vector<8x128xi1>, vector<8x128xf32>
    %cst_418 = arith.constant -6.500000e+01 : f32
    %1063 = vector.broadcast %cst_418 : f32 to vector<8x128xf32>
    %1064 = arith.select %1059, %1063, %1052 : vector<8x128xi1>, vector<8x128xf32>
    %cst_419 = arith.constant 4.000000e+00 : f32
    %1065 = vector.broadcast %cst_419 : f32 to vector<8x128xf32>
    %1066 = arith.mulf %1062, %1065 : vector<8x128xf32>
    %1067 = arith.addf %1057, %1066 : vector<8x128xf32>
    %1068 = arith.addf %1045, %1062 : vector<8x128xf32>
    %c46_i32 = arith.constant 46 : i32
    %cst_420 = arith.constant 2.000000e-02 : f32
    %1069 = vector.broadcast %cst_420 : f32 to vector<8x128xf32>
    %1070 = arith.mulf %1069, %1064 : vector<8x128xf32>
    %cst_421 = arith.constant 3.500000e+00 : f32
    %1071 = vector.broadcast %cst_421 : f32 to vector<8x128xf32>
    %1072 = arith.addf %1071, %1070 : vector<8x128xf32>
    %1073 = arith.mulf %1064, %1072 : vector<8x128xf32>
    %1074 = arith.subf %7, %1067 : vector<8x128xf32>
    %1075 = arith.addf %1073, %1074 : vector<8x128xf32>
    %cst_422 = arith.constant 9.900000e-01 : f32
    %1076 = vector.broadcast %cst_422 : f32 to vector<8x128xf32>
    %1077 = arith.mulf %1076, %1067 : vector<8x128xf32>
    %cst_423 = arith.constant 1.000000e-03 : f32
    %1078 = vector.broadcast %cst_423 : f32 to vector<8x128xf32>
    %1079 = arith.mulf %1078, %1075 : vector<8x128xf32>
    %1080 = arith.addf %1077, %1079 : vector<8x128xf32>
    %cst_424 = arith.constant 3.000000e+01 : f32
    %1081 = vector.broadcast %cst_424 : f32 to vector<8x128xf32>
    %1082 = arith.cmpf ogt, %1075, %1081 : vector<8x128xf32>
    %cst_425 = arith.constant 1.000000e+00 : f32
    %cst_426 = arith.constant 0.000000e+00 : f32
    %1083 = vector.broadcast %cst_425 : f32 to vector<8x128xf32>
    %1084 = vector.broadcast %cst_426 : f32 to vector<8x128xf32>
    %1085 = arith.select %1082, %1083, %1084 : vector<8x128xi1>, vector<8x128xf32>
    %cst_427 = arith.constant -6.500000e+01 : f32
    %1086 = vector.broadcast %cst_427 : f32 to vector<8x128xf32>
    %1087 = arith.select %1082, %1086, %1075 : vector<8x128xi1>, vector<8x128xf32>
    %cst_428 = arith.constant 4.000000e+00 : f32
    %1088 = vector.broadcast %cst_428 : f32 to vector<8x128xf32>
    %1089 = arith.mulf %1085, %1088 : vector<8x128xf32>
    %1090 = arith.addf %1080, %1089 : vector<8x128xf32>
    %1091 = arith.addf %1068, %1085 : vector<8x128xf32>
    %c47_i32 = arith.constant 47 : i32
    %cst_429 = arith.constant 2.000000e-02 : f32
    %1092 = vector.broadcast %cst_429 : f32 to vector<8x128xf32>
    %1093 = arith.mulf %1092, %1087 : vector<8x128xf32>
    %cst_430 = arith.constant 3.500000e+00 : f32
    %1094 = vector.broadcast %cst_430 : f32 to vector<8x128xf32>
    %1095 = arith.addf %1094, %1093 : vector<8x128xf32>
    %1096 = arith.mulf %1087, %1095 : vector<8x128xf32>
    %1097 = arith.subf %7, %1090 : vector<8x128xf32>
    %1098 = arith.addf %1096, %1097 : vector<8x128xf32>
    %cst_431 = arith.constant 9.900000e-01 : f32
    %1099 = vector.broadcast %cst_431 : f32 to vector<8x128xf32>
    %1100 = arith.mulf %1099, %1090 : vector<8x128xf32>
    %cst_432 = arith.constant 1.000000e-03 : f32
    %1101 = vector.broadcast %cst_432 : f32 to vector<8x128xf32>
    %1102 = arith.mulf %1101, %1098 : vector<8x128xf32>
    %1103 = arith.addf %1100, %1102 : vector<8x128xf32>
    %cst_433 = arith.constant 3.000000e+01 : f32
    %1104 = vector.broadcast %cst_433 : f32 to vector<8x128xf32>
    %1105 = arith.cmpf ogt, %1098, %1104 : vector<8x128xf32>
    %cst_434 = arith.constant 1.000000e+00 : f32
    %cst_435 = arith.constant 0.000000e+00 : f32
    %1106 = vector.broadcast %cst_434 : f32 to vector<8x128xf32>
    %1107 = vector.broadcast %cst_435 : f32 to vector<8x128xf32>
    %1108 = arith.select %1105, %1106, %1107 : vector<8x128xi1>, vector<8x128xf32>
    %cst_436 = arith.constant -6.500000e+01 : f32
    %1109 = vector.broadcast %cst_436 : f32 to vector<8x128xf32>
    %1110 = arith.select %1105, %1109, %1098 : vector<8x128xi1>, vector<8x128xf32>
    %cst_437 = arith.constant 4.000000e+00 : f32
    %1111 = vector.broadcast %cst_437 : f32 to vector<8x128xf32>
    %1112 = arith.mulf %1108, %1111 : vector<8x128xf32>
    %1113 = arith.addf %1103, %1112 : vector<8x128xf32>
    %1114 = arith.addf %1091, %1108 : vector<8x128xf32>
    %c48_i32 = arith.constant 48 : i32
    %cst_438 = arith.constant 2.000000e-02 : f32
    %1115 = vector.broadcast %cst_438 : f32 to vector<8x128xf32>
    %1116 = arith.mulf %1115, %1110 : vector<8x128xf32>
    %cst_439 = arith.constant 3.500000e+00 : f32
    %1117 = vector.broadcast %cst_439 : f32 to vector<8x128xf32>
    %1118 = arith.addf %1117, %1116 : vector<8x128xf32>
    %1119 = arith.mulf %1110, %1118 : vector<8x128xf32>
    %1120 = arith.subf %7, %1113 : vector<8x128xf32>
    %1121 = arith.addf %1119, %1120 : vector<8x128xf32>
    %cst_440 = arith.constant 9.900000e-01 : f32
    %1122 = vector.broadcast %cst_440 : f32 to vector<8x128xf32>
    %1123 = arith.mulf %1122, %1113 : vector<8x128xf32>
    %cst_441 = arith.constant 1.000000e-03 : f32
    %1124 = vector.broadcast %cst_441 : f32 to vector<8x128xf32>
    %1125 = arith.mulf %1124, %1121 : vector<8x128xf32>
    %1126 = arith.addf %1123, %1125 : vector<8x128xf32>
    %cst_442 = arith.constant 3.000000e+01 : f32
    %1127 = vector.broadcast %cst_442 : f32 to vector<8x128xf32>
    %1128 = arith.cmpf ogt, %1121, %1127 : vector<8x128xf32>
    %cst_443 = arith.constant 1.000000e+00 : f32
    %cst_444 = arith.constant 0.000000e+00 : f32
    %1129 = vector.broadcast %cst_443 : f32 to vector<8x128xf32>
    %1130 = vector.broadcast %cst_444 : f32 to vector<8x128xf32>
    %1131 = arith.select %1128, %1129, %1130 : vector<8x128xi1>, vector<8x128xf32>
    %cst_445 = arith.constant -6.500000e+01 : f32
    %1132 = vector.broadcast %cst_445 : f32 to vector<8x128xf32>
    %1133 = arith.select %1128, %1132, %1121 : vector<8x128xi1>, vector<8x128xf32>
    %cst_446 = arith.constant 4.000000e+00 : f32
    %1134 = vector.broadcast %cst_446 : f32 to vector<8x128xf32>
    %1135 = arith.mulf %1131, %1134 : vector<8x128xf32>
    %1136 = arith.addf %1126, %1135 : vector<8x128xf32>
    %1137 = arith.addf %1114, %1131 : vector<8x128xf32>
    %c49_i32 = arith.constant 49 : i32
    %cst_447 = arith.constant 2.000000e-02 : f32
    %1138 = vector.broadcast %cst_447 : f32 to vector<8x128xf32>
    %1139 = arith.mulf %1138, %1133 : vector<8x128xf32>
    %cst_448 = arith.constant 3.500000e+00 : f32
    %1140 = vector.broadcast %cst_448 : f32 to vector<8x128xf32>
    %1141 = arith.addf %1140, %1139 : vector<8x128xf32>
    %1142 = arith.mulf %1133, %1141 : vector<8x128xf32>
    %1143 = arith.subf %7, %1136 : vector<8x128xf32>
    %1144 = arith.addf %1142, %1143 : vector<8x128xf32>
    %cst_449 = arith.constant 9.900000e-01 : f32
    %1145 = vector.broadcast %cst_449 : f32 to vector<8x128xf32>
    %1146 = arith.mulf %1145, %1136 : vector<8x128xf32>
    %cst_450 = arith.constant 1.000000e-03 : f32
    %1147 = vector.broadcast %cst_450 : f32 to vector<8x128xf32>
    %1148 = arith.mulf %1147, %1144 : vector<8x128xf32>
    %1149 = arith.addf %1146, %1148 : vector<8x128xf32>
    %cst_451 = arith.constant 3.000000e+01 : f32
    %1150 = vector.broadcast %cst_451 : f32 to vector<8x128xf32>
    %1151 = arith.cmpf ogt, %1144, %1150 : vector<8x128xf32>
    %cst_452 = arith.constant 1.000000e+00 : f32
    %cst_453 = arith.constant 0.000000e+00 : f32
    %1152 = vector.broadcast %cst_452 : f32 to vector<8x128xf32>
    %1153 = vector.broadcast %cst_453 : f32 to vector<8x128xf32>
    %1154 = arith.select %1151, %1152, %1153 : vector<8x128xi1>, vector<8x128xf32>
    %cst_454 = arith.constant -6.500000e+01 : f32
    %1155 = vector.broadcast %cst_454 : f32 to vector<8x128xf32>
    %1156 = arith.select %1151, %1155, %1144 : vector<8x128xi1>, vector<8x128xf32>
    %cst_455 = arith.constant 4.000000e+00 : f32
    %1157 = vector.broadcast %cst_455 : f32 to vector<8x128xf32>
    %1158 = arith.mulf %1154, %1157 : vector<8x128xf32>
    %1159 = arith.addf %1149, %1158 : vector<8x128xf32>
    %1160 = arith.addf %1137, %1154 : vector<8x128xf32>
    %c50_i32 = arith.constant 50 : i32
    %cst_456 = arith.constant 2.000000e-02 : f32
    %1161 = vector.broadcast %cst_456 : f32 to vector<8x128xf32>
    %1162 = arith.mulf %1161, %1156 : vector<8x128xf32>
    %cst_457 = arith.constant 3.500000e+00 : f32
    %1163 = vector.broadcast %cst_457 : f32 to vector<8x128xf32>
    %1164 = arith.addf %1163, %1162 : vector<8x128xf32>
    %1165 = arith.mulf %1156, %1164 : vector<8x128xf32>
    %1166 = arith.subf %7, %1159 : vector<8x128xf32>
    %1167 = arith.addf %1165, %1166 : vector<8x128xf32>
    %cst_458 = arith.constant 9.900000e-01 : f32
    %1168 = vector.broadcast %cst_458 : f32 to vector<8x128xf32>
    %1169 = arith.mulf %1168, %1159 : vector<8x128xf32>
    %cst_459 = arith.constant 1.000000e-03 : f32
    %1170 = vector.broadcast %cst_459 : f32 to vector<8x128xf32>
    %1171 = arith.mulf %1170, %1167 : vector<8x128xf32>
    %1172 = arith.addf %1169, %1171 : vector<8x128xf32>
    %cst_460 = arith.constant 3.000000e+01 : f32
    %1173 = vector.broadcast %cst_460 : f32 to vector<8x128xf32>
    %1174 = arith.cmpf ogt, %1167, %1173 : vector<8x128xf32>
    %cst_461 = arith.constant 1.000000e+00 : f32
    %cst_462 = arith.constant 0.000000e+00 : f32
    %1175 = vector.broadcast %cst_461 : f32 to vector<8x128xf32>
    %1176 = vector.broadcast %cst_462 : f32 to vector<8x128xf32>
    %1177 = arith.select %1174, %1175, %1176 : vector<8x128xi1>, vector<8x128xf32>
    %cst_463 = arith.constant -6.500000e+01 : f32
    %1178 = vector.broadcast %cst_463 : f32 to vector<8x128xf32>
    %1179 = arith.select %1174, %1178, %1167 : vector<8x128xi1>, vector<8x128xf32>
    %cst_464 = arith.constant 4.000000e+00 : f32
    %1180 = vector.broadcast %cst_464 : f32 to vector<8x128xf32>
    %1181 = arith.mulf %1177, %1180 : vector<8x128xf32>
    %1182 = arith.addf %1172, %1181 : vector<8x128xf32>
    %1183 = arith.addf %1160, %1177 : vector<8x128xf32>
    %c51_i32 = arith.constant 51 : i32
    %cst_465 = arith.constant 2.000000e-02 : f32
    %1184 = vector.broadcast %cst_465 : f32 to vector<8x128xf32>
    %1185 = arith.mulf %1184, %1179 : vector<8x128xf32>
    %cst_466 = arith.constant 3.500000e+00 : f32
    %1186 = vector.broadcast %cst_466 : f32 to vector<8x128xf32>
    %1187 = arith.addf %1186, %1185 : vector<8x128xf32>
    %1188 = arith.mulf %1179, %1187 : vector<8x128xf32>
    %1189 = arith.subf %7, %1182 : vector<8x128xf32>
    %1190 = arith.addf %1188, %1189 : vector<8x128xf32>
    %cst_467 = arith.constant 9.900000e-01 : f32
    %1191 = vector.broadcast %cst_467 : f32 to vector<8x128xf32>
    %1192 = arith.mulf %1191, %1182 : vector<8x128xf32>
    %cst_468 = arith.constant 1.000000e-03 : f32
    %1193 = vector.broadcast %cst_468 : f32 to vector<8x128xf32>
    %1194 = arith.mulf %1193, %1190 : vector<8x128xf32>
    %1195 = arith.addf %1192, %1194 : vector<8x128xf32>
    %cst_469 = arith.constant 3.000000e+01 : f32
    %1196 = vector.broadcast %cst_469 : f32 to vector<8x128xf32>
    %1197 = arith.cmpf ogt, %1190, %1196 : vector<8x128xf32>
    %cst_470 = arith.constant 1.000000e+00 : f32
    %cst_471 = arith.constant 0.000000e+00 : f32
    %1198 = vector.broadcast %cst_470 : f32 to vector<8x128xf32>
    %1199 = vector.broadcast %cst_471 : f32 to vector<8x128xf32>
    %1200 = arith.select %1197, %1198, %1199 : vector<8x128xi1>, vector<8x128xf32>
    %cst_472 = arith.constant -6.500000e+01 : f32
    %1201 = vector.broadcast %cst_472 : f32 to vector<8x128xf32>
    %1202 = arith.select %1197, %1201, %1190 : vector<8x128xi1>, vector<8x128xf32>
    %cst_473 = arith.constant 4.000000e+00 : f32
    %1203 = vector.broadcast %cst_473 : f32 to vector<8x128xf32>
    %1204 = arith.mulf %1200, %1203 : vector<8x128xf32>
    %1205 = arith.addf %1195, %1204 : vector<8x128xf32>
    %1206 = arith.addf %1183, %1200 : vector<8x128xf32>
    %c52_i32 = arith.constant 52 : i32
    %cst_474 = arith.constant 2.000000e-02 : f32
    %1207 = vector.broadcast %cst_474 : f32 to vector<8x128xf32>
    %1208 = arith.mulf %1207, %1202 : vector<8x128xf32>
    %cst_475 = arith.constant 3.500000e+00 : f32
    %1209 = vector.broadcast %cst_475 : f32 to vector<8x128xf32>
    %1210 = arith.addf %1209, %1208 : vector<8x128xf32>
    %1211 = arith.mulf %1202, %1210 : vector<8x128xf32>
    %1212 = arith.subf %7, %1205 : vector<8x128xf32>
    %1213 = arith.addf %1211, %1212 : vector<8x128xf32>
    %cst_476 = arith.constant 9.900000e-01 : f32
    %1214 = vector.broadcast %cst_476 : f32 to vector<8x128xf32>
    %1215 = arith.mulf %1214, %1205 : vector<8x128xf32>
    %cst_477 = arith.constant 1.000000e-03 : f32
    %1216 = vector.broadcast %cst_477 : f32 to vector<8x128xf32>
    %1217 = arith.mulf %1216, %1213 : vector<8x128xf32>
    %1218 = arith.addf %1215, %1217 : vector<8x128xf32>
    %cst_478 = arith.constant 3.000000e+01 : f32
    %1219 = vector.broadcast %cst_478 : f32 to vector<8x128xf32>
    %1220 = arith.cmpf ogt, %1213, %1219 : vector<8x128xf32>
    %cst_479 = arith.constant 1.000000e+00 : f32
    %cst_480 = arith.constant 0.000000e+00 : f32
    %1221 = vector.broadcast %cst_479 : f32 to vector<8x128xf32>
    %1222 = vector.broadcast %cst_480 : f32 to vector<8x128xf32>
    %1223 = arith.select %1220, %1221, %1222 : vector<8x128xi1>, vector<8x128xf32>
    %cst_481 = arith.constant -6.500000e+01 : f32
    %1224 = vector.broadcast %cst_481 : f32 to vector<8x128xf32>
    %1225 = arith.select %1220, %1224, %1213 : vector<8x128xi1>, vector<8x128xf32>
    %cst_482 = arith.constant 4.000000e+00 : f32
    %1226 = vector.broadcast %cst_482 : f32 to vector<8x128xf32>
    %1227 = arith.mulf %1223, %1226 : vector<8x128xf32>
    %1228 = arith.addf %1218, %1227 : vector<8x128xf32>
    %1229 = arith.addf %1206, %1223 : vector<8x128xf32>
    %c53_i32 = arith.constant 53 : i32
    %cst_483 = arith.constant 2.000000e-02 : f32
    %1230 = vector.broadcast %cst_483 : f32 to vector<8x128xf32>
    %1231 = arith.mulf %1230, %1225 : vector<8x128xf32>
    %cst_484 = arith.constant 3.500000e+00 : f32
    %1232 = vector.broadcast %cst_484 : f32 to vector<8x128xf32>
    %1233 = arith.addf %1232, %1231 : vector<8x128xf32>
    %1234 = arith.mulf %1225, %1233 : vector<8x128xf32>
    %1235 = arith.subf %7, %1228 : vector<8x128xf32>
    %1236 = arith.addf %1234, %1235 : vector<8x128xf32>
    %cst_485 = arith.constant 9.900000e-01 : f32
    %1237 = vector.broadcast %cst_485 : f32 to vector<8x128xf32>
    %1238 = arith.mulf %1237, %1228 : vector<8x128xf32>
    %cst_486 = arith.constant 1.000000e-03 : f32
    %1239 = vector.broadcast %cst_486 : f32 to vector<8x128xf32>
    %1240 = arith.mulf %1239, %1236 : vector<8x128xf32>
    %1241 = arith.addf %1238, %1240 : vector<8x128xf32>
    %cst_487 = arith.constant 3.000000e+01 : f32
    %1242 = vector.broadcast %cst_487 : f32 to vector<8x128xf32>
    %1243 = arith.cmpf ogt, %1236, %1242 : vector<8x128xf32>
    %cst_488 = arith.constant 1.000000e+00 : f32
    %cst_489 = arith.constant 0.000000e+00 : f32
    %1244 = vector.broadcast %cst_488 : f32 to vector<8x128xf32>
    %1245 = vector.broadcast %cst_489 : f32 to vector<8x128xf32>
    %1246 = arith.select %1243, %1244, %1245 : vector<8x128xi1>, vector<8x128xf32>
    %cst_490 = arith.constant -6.500000e+01 : f32
    %1247 = vector.broadcast %cst_490 : f32 to vector<8x128xf32>
    %1248 = arith.select %1243, %1247, %1236 : vector<8x128xi1>, vector<8x128xf32>
    %cst_491 = arith.constant 4.000000e+00 : f32
    %1249 = vector.broadcast %cst_491 : f32 to vector<8x128xf32>
    %1250 = arith.mulf %1246, %1249 : vector<8x128xf32>
    %1251 = arith.addf %1241, %1250 : vector<8x128xf32>
    %1252 = arith.addf %1229, %1246 : vector<8x128xf32>
    %c54_i32 = arith.constant 54 : i32
    %cst_492 = arith.constant 2.000000e-02 : f32
    %1253 = vector.broadcast %cst_492 : f32 to vector<8x128xf32>
    %1254 = arith.mulf %1253, %1248 : vector<8x128xf32>
    %cst_493 = arith.constant 3.500000e+00 : f32
    %1255 = vector.broadcast %cst_493 : f32 to vector<8x128xf32>
    %1256 = arith.addf %1255, %1254 : vector<8x128xf32>
    %1257 = arith.mulf %1248, %1256 : vector<8x128xf32>
    %1258 = arith.subf %7, %1251 : vector<8x128xf32>
    %1259 = arith.addf %1257, %1258 : vector<8x128xf32>
    %cst_494 = arith.constant 9.900000e-01 : f32
    %1260 = vector.broadcast %cst_494 : f32 to vector<8x128xf32>
    %1261 = arith.mulf %1260, %1251 : vector<8x128xf32>
    %cst_495 = arith.constant 1.000000e-03 : f32
    %1262 = vector.broadcast %cst_495 : f32 to vector<8x128xf32>
    %1263 = arith.mulf %1262, %1259 : vector<8x128xf32>
    %1264 = arith.addf %1261, %1263 : vector<8x128xf32>
    %cst_496 = arith.constant 3.000000e+01 : f32
    %1265 = vector.broadcast %cst_496 : f32 to vector<8x128xf32>
    %1266 = arith.cmpf ogt, %1259, %1265 : vector<8x128xf32>
    %cst_497 = arith.constant 1.000000e+00 : f32
    %cst_498 = arith.constant 0.000000e+00 : f32
    %1267 = vector.broadcast %cst_497 : f32 to vector<8x128xf32>
    %1268 = vector.broadcast %cst_498 : f32 to vector<8x128xf32>
    %1269 = arith.select %1266, %1267, %1268 : vector<8x128xi1>, vector<8x128xf32>
    %cst_499 = arith.constant -6.500000e+01 : f32
    %1270 = vector.broadcast %cst_499 : f32 to vector<8x128xf32>
    %1271 = arith.select %1266, %1270, %1259 : vector<8x128xi1>, vector<8x128xf32>
    %cst_500 = arith.constant 4.000000e+00 : f32
    %1272 = vector.broadcast %cst_500 : f32 to vector<8x128xf32>
    %1273 = arith.mulf %1269, %1272 : vector<8x128xf32>
    %1274 = arith.addf %1264, %1273 : vector<8x128xf32>
    %1275 = arith.addf %1252, %1269 : vector<8x128xf32>
    %c55_i32 = arith.constant 55 : i32
    %cst_501 = arith.constant 2.000000e-02 : f32
    %1276 = vector.broadcast %cst_501 : f32 to vector<8x128xf32>
    %1277 = arith.mulf %1276, %1271 : vector<8x128xf32>
    %cst_502 = arith.constant 3.500000e+00 : f32
    %1278 = vector.broadcast %cst_502 : f32 to vector<8x128xf32>
    %1279 = arith.addf %1278, %1277 : vector<8x128xf32>
    %1280 = arith.mulf %1271, %1279 : vector<8x128xf32>
    %1281 = arith.subf %7, %1274 : vector<8x128xf32>
    %1282 = arith.addf %1280, %1281 : vector<8x128xf32>
    %cst_503 = arith.constant 9.900000e-01 : f32
    %1283 = vector.broadcast %cst_503 : f32 to vector<8x128xf32>
    %1284 = arith.mulf %1283, %1274 : vector<8x128xf32>
    %cst_504 = arith.constant 1.000000e-03 : f32
    %1285 = vector.broadcast %cst_504 : f32 to vector<8x128xf32>
    %1286 = arith.mulf %1285, %1282 : vector<8x128xf32>
    %1287 = arith.addf %1284, %1286 : vector<8x128xf32>
    %cst_505 = arith.constant 3.000000e+01 : f32
    %1288 = vector.broadcast %cst_505 : f32 to vector<8x128xf32>
    %1289 = arith.cmpf ogt, %1282, %1288 : vector<8x128xf32>
    %cst_506 = arith.constant 1.000000e+00 : f32
    %cst_507 = arith.constant 0.000000e+00 : f32
    %1290 = vector.broadcast %cst_506 : f32 to vector<8x128xf32>
    %1291 = vector.broadcast %cst_507 : f32 to vector<8x128xf32>
    %1292 = arith.select %1289, %1290, %1291 : vector<8x128xi1>, vector<8x128xf32>
    %cst_508 = arith.constant -6.500000e+01 : f32
    %1293 = vector.broadcast %cst_508 : f32 to vector<8x128xf32>
    %1294 = arith.select %1289, %1293, %1282 : vector<8x128xi1>, vector<8x128xf32>
    %cst_509 = arith.constant 4.000000e+00 : f32
    %1295 = vector.broadcast %cst_509 : f32 to vector<8x128xf32>
    %1296 = arith.mulf %1292, %1295 : vector<8x128xf32>
    %1297 = arith.addf %1287, %1296 : vector<8x128xf32>
    %1298 = arith.addf %1275, %1292 : vector<8x128xf32>
    %c56_i32 = arith.constant 56 : i32
    %cst_510 = arith.constant 2.000000e-02 : f32
    %1299 = vector.broadcast %cst_510 : f32 to vector<8x128xf32>
    %1300 = arith.mulf %1299, %1294 : vector<8x128xf32>
    %cst_511 = arith.constant 3.500000e+00 : f32
    %1301 = vector.broadcast %cst_511 : f32 to vector<8x128xf32>
    %1302 = arith.addf %1301, %1300 : vector<8x128xf32>
    %1303 = arith.mulf %1294, %1302 : vector<8x128xf32>
    %1304 = arith.subf %7, %1297 : vector<8x128xf32>
    %1305 = arith.addf %1303, %1304 : vector<8x128xf32>
    %cst_512 = arith.constant 9.900000e-01 : f32
    %1306 = vector.broadcast %cst_512 : f32 to vector<8x128xf32>
    %1307 = arith.mulf %1306, %1297 : vector<8x128xf32>
    %cst_513 = arith.constant 1.000000e-03 : f32
    %1308 = vector.broadcast %cst_513 : f32 to vector<8x128xf32>
    %1309 = arith.mulf %1308, %1305 : vector<8x128xf32>
    %1310 = arith.addf %1307, %1309 : vector<8x128xf32>
    %cst_514 = arith.constant 3.000000e+01 : f32
    %1311 = vector.broadcast %cst_514 : f32 to vector<8x128xf32>
    %1312 = arith.cmpf ogt, %1305, %1311 : vector<8x128xf32>
    %cst_515 = arith.constant 1.000000e+00 : f32
    %cst_516 = arith.constant 0.000000e+00 : f32
    %1313 = vector.broadcast %cst_515 : f32 to vector<8x128xf32>
    %1314 = vector.broadcast %cst_516 : f32 to vector<8x128xf32>
    %1315 = arith.select %1312, %1313, %1314 : vector<8x128xi1>, vector<8x128xf32>
    %cst_517 = arith.constant -6.500000e+01 : f32
    %1316 = vector.broadcast %cst_517 : f32 to vector<8x128xf32>
    %1317 = arith.select %1312, %1316, %1305 : vector<8x128xi1>, vector<8x128xf32>
    %cst_518 = arith.constant 4.000000e+00 : f32
    %1318 = vector.broadcast %cst_518 : f32 to vector<8x128xf32>
    %1319 = arith.mulf %1315, %1318 : vector<8x128xf32>
    %1320 = arith.addf %1310, %1319 : vector<8x128xf32>
    %1321 = arith.addf %1298, %1315 : vector<8x128xf32>
    %c57_i32 = arith.constant 57 : i32
    %cst_519 = arith.constant 2.000000e-02 : f32
    %1322 = vector.broadcast %cst_519 : f32 to vector<8x128xf32>
    %1323 = arith.mulf %1322, %1317 : vector<8x128xf32>
    %cst_520 = arith.constant 3.500000e+00 : f32
    %1324 = vector.broadcast %cst_520 : f32 to vector<8x128xf32>
    %1325 = arith.addf %1324, %1323 : vector<8x128xf32>
    %1326 = arith.mulf %1317, %1325 : vector<8x128xf32>
    %1327 = arith.subf %7, %1320 : vector<8x128xf32>
    %1328 = arith.addf %1326, %1327 : vector<8x128xf32>
    %cst_521 = arith.constant 9.900000e-01 : f32
    %1329 = vector.broadcast %cst_521 : f32 to vector<8x128xf32>
    %1330 = arith.mulf %1329, %1320 : vector<8x128xf32>
    %cst_522 = arith.constant 1.000000e-03 : f32
    %1331 = vector.broadcast %cst_522 : f32 to vector<8x128xf32>
    %1332 = arith.mulf %1331, %1328 : vector<8x128xf32>
    %1333 = arith.addf %1330, %1332 : vector<8x128xf32>
    %cst_523 = arith.constant 3.000000e+01 : f32
    %1334 = vector.broadcast %cst_523 : f32 to vector<8x128xf32>
    %1335 = arith.cmpf ogt, %1328, %1334 : vector<8x128xf32>
    %cst_524 = arith.constant 1.000000e+00 : f32
    %cst_525 = arith.constant 0.000000e+00 : f32
    %1336 = vector.broadcast %cst_524 : f32 to vector<8x128xf32>
    %1337 = vector.broadcast %cst_525 : f32 to vector<8x128xf32>
    %1338 = arith.select %1335, %1336, %1337 : vector<8x128xi1>, vector<8x128xf32>
    %cst_526 = arith.constant -6.500000e+01 : f32
    %1339 = vector.broadcast %cst_526 : f32 to vector<8x128xf32>
    %1340 = arith.select %1335, %1339, %1328 : vector<8x128xi1>, vector<8x128xf32>
    %cst_527 = arith.constant 4.000000e+00 : f32
    %1341 = vector.broadcast %cst_527 : f32 to vector<8x128xf32>
    %1342 = arith.mulf %1338, %1341 : vector<8x128xf32>
    %1343 = arith.addf %1333, %1342 : vector<8x128xf32>
    %1344 = arith.addf %1321, %1338 : vector<8x128xf32>
    %c58_i32 = arith.constant 58 : i32
    %cst_528 = arith.constant 2.000000e-02 : f32
    %1345 = vector.broadcast %cst_528 : f32 to vector<8x128xf32>
    %1346 = arith.mulf %1345, %1340 : vector<8x128xf32>
    %cst_529 = arith.constant 3.500000e+00 : f32
    %1347 = vector.broadcast %cst_529 : f32 to vector<8x128xf32>
    %1348 = arith.addf %1347, %1346 : vector<8x128xf32>
    %1349 = arith.mulf %1340, %1348 : vector<8x128xf32>
    %1350 = arith.subf %7, %1343 : vector<8x128xf32>
    %1351 = arith.addf %1349, %1350 : vector<8x128xf32>
    %cst_530 = arith.constant 9.900000e-01 : f32
    %1352 = vector.broadcast %cst_530 : f32 to vector<8x128xf32>
    %1353 = arith.mulf %1352, %1343 : vector<8x128xf32>
    %cst_531 = arith.constant 1.000000e-03 : f32
    %1354 = vector.broadcast %cst_531 : f32 to vector<8x128xf32>
    %1355 = arith.mulf %1354, %1351 : vector<8x128xf32>
    %1356 = arith.addf %1353, %1355 : vector<8x128xf32>
    %cst_532 = arith.constant 3.000000e+01 : f32
    %1357 = vector.broadcast %cst_532 : f32 to vector<8x128xf32>
    %1358 = arith.cmpf ogt, %1351, %1357 : vector<8x128xf32>
    %cst_533 = arith.constant 1.000000e+00 : f32
    %cst_534 = arith.constant 0.000000e+00 : f32
    %1359 = vector.broadcast %cst_533 : f32 to vector<8x128xf32>
    %1360 = vector.broadcast %cst_534 : f32 to vector<8x128xf32>
    %1361 = arith.select %1358, %1359, %1360 : vector<8x128xi1>, vector<8x128xf32>
    %cst_535 = arith.constant -6.500000e+01 : f32
    %1362 = vector.broadcast %cst_535 : f32 to vector<8x128xf32>
    %1363 = arith.select %1358, %1362, %1351 : vector<8x128xi1>, vector<8x128xf32>
    %cst_536 = arith.constant 4.000000e+00 : f32
    %1364 = vector.broadcast %cst_536 : f32 to vector<8x128xf32>
    %1365 = arith.mulf %1361, %1364 : vector<8x128xf32>
    %1366 = arith.addf %1356, %1365 : vector<8x128xf32>
    %1367 = arith.addf %1344, %1361 : vector<8x128xf32>
    %c59_i32 = arith.constant 59 : i32
    %cst_537 = arith.constant 2.000000e-02 : f32
    %1368 = vector.broadcast %cst_537 : f32 to vector<8x128xf32>
    %1369 = arith.mulf %1368, %1363 : vector<8x128xf32>
    %cst_538 = arith.constant 3.500000e+00 : f32
    %1370 = vector.broadcast %cst_538 : f32 to vector<8x128xf32>
    %1371 = arith.addf %1370, %1369 : vector<8x128xf32>
    %1372 = arith.mulf %1363, %1371 : vector<8x128xf32>
    %1373 = arith.subf %7, %1366 : vector<8x128xf32>
    %1374 = arith.addf %1372, %1373 : vector<8x128xf32>
    %cst_539 = arith.constant 9.900000e-01 : f32
    %1375 = vector.broadcast %cst_539 : f32 to vector<8x128xf32>
    %1376 = arith.mulf %1375, %1366 : vector<8x128xf32>
    %cst_540 = arith.constant 1.000000e-03 : f32
    %1377 = vector.broadcast %cst_540 : f32 to vector<8x128xf32>
    %1378 = arith.mulf %1377, %1374 : vector<8x128xf32>
    %1379 = arith.addf %1376, %1378 : vector<8x128xf32>
    %cst_541 = arith.constant 3.000000e+01 : f32
    %1380 = vector.broadcast %cst_541 : f32 to vector<8x128xf32>
    %1381 = arith.cmpf ogt, %1374, %1380 : vector<8x128xf32>
    %cst_542 = arith.constant 1.000000e+00 : f32
    %cst_543 = arith.constant 0.000000e+00 : f32
    %1382 = vector.broadcast %cst_542 : f32 to vector<8x128xf32>
    %1383 = vector.broadcast %cst_543 : f32 to vector<8x128xf32>
    %1384 = arith.select %1381, %1382, %1383 : vector<8x128xi1>, vector<8x128xf32>
    %cst_544 = arith.constant -6.500000e+01 : f32
    %1385 = vector.broadcast %cst_544 : f32 to vector<8x128xf32>
    %1386 = arith.select %1381, %1385, %1374 : vector<8x128xi1>, vector<8x128xf32>
    %cst_545 = arith.constant 4.000000e+00 : f32
    %1387 = vector.broadcast %cst_545 : f32 to vector<8x128xf32>
    %1388 = arith.mulf %1384, %1387 : vector<8x128xf32>
    %1389 = arith.addf %1379, %1388 : vector<8x128xf32>
    %1390 = arith.addf %1367, %1384 : vector<8x128xf32>
    %c60_i32 = arith.constant 60 : i32
    %cst_546 = arith.constant 2.000000e-02 : f32
    %1391 = vector.broadcast %cst_546 : f32 to vector<8x128xf32>
    %1392 = arith.mulf %1391, %1386 : vector<8x128xf32>
    %cst_547 = arith.constant 3.500000e+00 : f32
    %1393 = vector.broadcast %cst_547 : f32 to vector<8x128xf32>
    %1394 = arith.addf %1393, %1392 : vector<8x128xf32>
    %1395 = arith.mulf %1386, %1394 : vector<8x128xf32>
    %1396 = arith.subf %7, %1389 : vector<8x128xf32>
    %1397 = arith.addf %1395, %1396 : vector<8x128xf32>
    %cst_548 = arith.constant 9.900000e-01 : f32
    %1398 = vector.broadcast %cst_548 : f32 to vector<8x128xf32>
    %1399 = arith.mulf %1398, %1389 : vector<8x128xf32>
    %cst_549 = arith.constant 1.000000e-03 : f32
    %1400 = vector.broadcast %cst_549 : f32 to vector<8x128xf32>
    %1401 = arith.mulf %1400, %1397 : vector<8x128xf32>
    %1402 = arith.addf %1399, %1401 : vector<8x128xf32>
    %cst_550 = arith.constant 3.000000e+01 : f32
    %1403 = vector.broadcast %cst_550 : f32 to vector<8x128xf32>
    %1404 = arith.cmpf ogt, %1397, %1403 : vector<8x128xf32>
    %cst_551 = arith.constant 1.000000e+00 : f32
    %cst_552 = arith.constant 0.000000e+00 : f32
    %1405 = vector.broadcast %cst_551 : f32 to vector<8x128xf32>
    %1406 = vector.broadcast %cst_552 : f32 to vector<8x128xf32>
    %1407 = arith.select %1404, %1405, %1406 : vector<8x128xi1>, vector<8x128xf32>
    %cst_553 = arith.constant -6.500000e+01 : f32
    %1408 = vector.broadcast %cst_553 : f32 to vector<8x128xf32>
    %1409 = arith.select %1404, %1408, %1397 : vector<8x128xi1>, vector<8x128xf32>
    %cst_554 = arith.constant 4.000000e+00 : f32
    %1410 = vector.broadcast %cst_554 : f32 to vector<8x128xf32>
    %1411 = arith.mulf %1407, %1410 : vector<8x128xf32>
    %1412 = arith.addf %1402, %1411 : vector<8x128xf32>
    %1413 = arith.addf %1390, %1407 : vector<8x128xf32>
    %c61_i32 = arith.constant 61 : i32
    %cst_555 = arith.constant 2.000000e-02 : f32
    %1414 = vector.broadcast %cst_555 : f32 to vector<8x128xf32>
    %1415 = arith.mulf %1414, %1409 : vector<8x128xf32>
    %cst_556 = arith.constant 3.500000e+00 : f32
    %1416 = vector.broadcast %cst_556 : f32 to vector<8x128xf32>
    %1417 = arith.addf %1416, %1415 : vector<8x128xf32>
    %1418 = arith.mulf %1409, %1417 : vector<8x128xf32>
    %1419 = arith.subf %7, %1412 : vector<8x128xf32>
    %1420 = arith.addf %1418, %1419 : vector<8x128xf32>
    %cst_557 = arith.constant 9.900000e-01 : f32
    %1421 = vector.broadcast %cst_557 : f32 to vector<8x128xf32>
    %1422 = arith.mulf %1421, %1412 : vector<8x128xf32>
    %cst_558 = arith.constant 1.000000e-03 : f32
    %1423 = vector.broadcast %cst_558 : f32 to vector<8x128xf32>
    %1424 = arith.mulf %1423, %1420 : vector<8x128xf32>
    %1425 = arith.addf %1422, %1424 : vector<8x128xf32>
    %cst_559 = arith.constant 3.000000e+01 : f32
    %1426 = vector.broadcast %cst_559 : f32 to vector<8x128xf32>
    %1427 = arith.cmpf ogt, %1420, %1426 : vector<8x128xf32>
    %cst_560 = arith.constant 1.000000e+00 : f32
    %cst_561 = arith.constant 0.000000e+00 : f32
    %1428 = vector.broadcast %cst_560 : f32 to vector<8x128xf32>
    %1429 = vector.broadcast %cst_561 : f32 to vector<8x128xf32>
    %1430 = arith.select %1427, %1428, %1429 : vector<8x128xi1>, vector<8x128xf32>
    %cst_562 = arith.constant -6.500000e+01 : f32
    %1431 = vector.broadcast %cst_562 : f32 to vector<8x128xf32>
    %1432 = arith.select %1427, %1431, %1420 : vector<8x128xi1>, vector<8x128xf32>
    %cst_563 = arith.constant 4.000000e+00 : f32
    %1433 = vector.broadcast %cst_563 : f32 to vector<8x128xf32>
    %1434 = arith.mulf %1430, %1433 : vector<8x128xf32>
    %1435 = arith.addf %1425, %1434 : vector<8x128xf32>
    %1436 = arith.addf %1413, %1430 : vector<8x128xf32>
    %c62_i32 = arith.constant 62 : i32
    %cst_564 = arith.constant 2.000000e-02 : f32
    %1437 = vector.broadcast %cst_564 : f32 to vector<8x128xf32>
    %1438 = arith.mulf %1437, %1432 : vector<8x128xf32>
    %cst_565 = arith.constant 3.500000e+00 : f32
    %1439 = vector.broadcast %cst_565 : f32 to vector<8x128xf32>
    %1440 = arith.addf %1439, %1438 : vector<8x128xf32>
    %1441 = arith.mulf %1432, %1440 : vector<8x128xf32>
    %1442 = arith.subf %7, %1435 : vector<8x128xf32>
    %1443 = arith.addf %1441, %1442 : vector<8x128xf32>
    %cst_566 = arith.constant 9.900000e-01 : f32
    %1444 = vector.broadcast %cst_566 : f32 to vector<8x128xf32>
    %1445 = arith.mulf %1444, %1435 : vector<8x128xf32>
    %cst_567 = arith.constant 1.000000e-03 : f32
    %1446 = vector.broadcast %cst_567 : f32 to vector<8x128xf32>
    %1447 = arith.mulf %1446, %1443 : vector<8x128xf32>
    %1448 = arith.addf %1445, %1447 : vector<8x128xf32>
    %cst_568 = arith.constant 3.000000e+01 : f32
    %1449 = vector.broadcast %cst_568 : f32 to vector<8x128xf32>
    %1450 = arith.cmpf ogt, %1443, %1449 : vector<8x128xf32>
    %cst_569 = arith.constant 1.000000e+00 : f32
    %cst_570 = arith.constant 0.000000e+00 : f32
    %1451 = vector.broadcast %cst_569 : f32 to vector<8x128xf32>
    %1452 = vector.broadcast %cst_570 : f32 to vector<8x128xf32>
    %1453 = arith.select %1450, %1451, %1452 : vector<8x128xi1>, vector<8x128xf32>
    %cst_571 = arith.constant -6.500000e+01 : f32
    %1454 = vector.broadcast %cst_571 : f32 to vector<8x128xf32>
    %1455 = arith.select %1450, %1454, %1443 : vector<8x128xi1>, vector<8x128xf32>
    %cst_572 = arith.constant 4.000000e+00 : f32
    %1456 = vector.broadcast %cst_572 : f32 to vector<8x128xf32>
    %1457 = arith.mulf %1453, %1456 : vector<8x128xf32>
    %1458 = arith.addf %1448, %1457 : vector<8x128xf32>
    %1459 = arith.addf %1436, %1453 : vector<8x128xf32>
    %c63_i32 = arith.constant 63 : i32
    %cst_573 = arith.constant 2.000000e-02 : f32
    %1460 = vector.broadcast %cst_573 : f32 to vector<8x128xf32>
    %1461 = arith.mulf %1460, %1455 : vector<8x128xf32>
    %cst_574 = arith.constant 3.500000e+00 : f32
    %1462 = vector.broadcast %cst_574 : f32 to vector<8x128xf32>
    %1463 = arith.addf %1462, %1461 : vector<8x128xf32>
    %1464 = arith.mulf %1455, %1463 : vector<8x128xf32>
    %1465 = arith.subf %7, %1458 : vector<8x128xf32>
    %1466 = arith.addf %1464, %1465 : vector<8x128xf32>
    %cst_575 = arith.constant 9.900000e-01 : f32
    %1467 = vector.broadcast %cst_575 : f32 to vector<8x128xf32>
    %1468 = arith.mulf %1467, %1458 : vector<8x128xf32>
    %cst_576 = arith.constant 1.000000e-03 : f32
    %1469 = vector.broadcast %cst_576 : f32 to vector<8x128xf32>
    %1470 = arith.mulf %1469, %1466 : vector<8x128xf32>
    %1471 = arith.addf %1468, %1470 : vector<8x128xf32>
    %cst_577 = arith.constant 3.000000e+01 : f32
    %1472 = vector.broadcast %cst_577 : f32 to vector<8x128xf32>
    %1473 = arith.cmpf ogt, %1466, %1472 : vector<8x128xf32>
    %cst_578 = arith.constant 1.000000e+00 : f32
    %cst_579 = arith.constant 0.000000e+00 : f32
    %1474 = vector.broadcast %cst_578 : f32 to vector<8x128xf32>
    %1475 = vector.broadcast %cst_579 : f32 to vector<8x128xf32>
    %1476 = arith.select %1473, %1474, %1475 : vector<8x128xi1>, vector<8x128xf32>
    %cst_580 = arith.constant -6.500000e+01 : f32
    %1477 = vector.broadcast %cst_580 : f32 to vector<8x128xf32>
    %1478 = arith.select %1473, %1477, %1466 : vector<8x128xi1>, vector<8x128xf32>
    %cst_581 = arith.constant 4.000000e+00 : f32
    %1479 = vector.broadcast %cst_581 : f32 to vector<8x128xf32>
    %1480 = arith.mulf %1476, %1479 : vector<8x128xf32>
    %1481 = arith.addf %1471, %1480 : vector<8x128xf32>
    %1482 = arith.addf %1459, %1476 : vector<8x128xf32>
    %cst_582 = arith.constant 1.562500e-02 : f32
    %1483 = vector.broadcast %cst_582 : f32 to vector<8x128xf32>
    %1484 = arith.mulf %1482, %1483 : vector<8x128xf32>
    %c0_583 = arith.constant 0 : index
    %c0_584 = arith.constant 0 : index
    %1485 = vector.load %arg2[%c0_583, %c0_584] : memref<8x128xf32, #tpu.memory_space<vmem>>, vector<8x128xf32>
    tpu.vector_store %arg2[%c0_583, %c0_584], %1484 {strides = array<i32>} : memref<8x128xf32, #tpu.memory_space<vmem>>, vector<8x128xf32>,
    return
  }
  func.func @transform_0(%arg0: i32) -> (i32, i32) {
    %c0_i32 = arith.constant 0 : i32
    %c0_i32_0 = arith.constant 0 : i32
    return %arg0, %c0_i32 : i32, i32
  }
  func.func @transform_1(%arg0: i32) -> (i32, i32) {
    %c0_i32 = arith.constant 0 : i32
    %c0_i32_0 = arith.constant 0 : i32
    return %arg0, %c0_i32 : i32, i32
  }
}

</mosaic_0001>

<bundles_post_ra>
// kernel: tpu_custom_call.1
= control target key start
LH: loop header
LB: loop body
LE: loop exit
PB: predicated region body
PF: predicated region fallthrough
CT: control target
= control target key end

     0   :  { %6 = vsyncpa [#allocation3], 0  ;;  %s1152_s0 = inlined_call_operand.hbm [shape: f32[8,128], index: 0, kind: input, shape index: {}]   ;;  %s1153_s1 = inlined_call_operand.hbm [shape: f32[8,128], index: 1, kind: output, shape index: {}]  }
   0x1   :  { %7 = vsyncpa [#allocation4], 0  ;;  %s982_s6 = smov [#allocation2]   ;;  %s934_s10 = scalar_lea.hbm %s1152_s0, 128 }
   0x2   :  { %s14_s7 = sshll.u32 %s982_s6, 4  ;;  %p935_p0 = scmp.ne.s32.totalorder %s1152_s0, %s934_s10  ;;  %s15_s7 = int_to_ptr.vmem [resolvable:$true] %s14_s7 }
   0x3   :  { %p938_p1 = scmp.lt.u32.totalorder %s934_s10, %s1152_s0 }
   0x5   :  { %p940_p2 = pnand %p938_p1, %p935_p0 }
   0x7   :  { %943 = shalt.err (!%p940_p2)
}
   0x8   :  { %s944_s15 = scalar_lea.vmem %s15_s7, 128  ;;  %p949_p4 = scmp.lt.s32.totalorder %s15_s7, %s15_s7 }
   0x9   :  { %p945_p3 = scmp.ne.s32.totalorder %s15_s7, %s944_s15  ;;  %p950_p5 = scmp.lt.s32.totalorder %s944_s15, %s944_s15 }
   0xb   :  { %p951_p6 = por %p950_p5, %p949_p4 }
   0xd   :  { %p952_p7 = pnand %p951_p6, %p945_p3 }
   0xf   :  { %955 = shalt.err (!%p952_p7)
}
  0x10   :  { %17 = dma.hbm_to_vmem [thread:$0]  %s1152_s0, 128, %s15_s7, [#allocation3]  }
  0x11   :  { %978 = dma.done.wait [#allocation3], 128  }
  0x12   :  { %979 = vsyncadd [#allocation3], 4294967168  ;;  %v21_v0 = vld [vmem:[#allocation2] sm:$0xff]  ;;  %v983_v8 = vmov 0.0   ;;  %s984_s0 = smov [#allocation5]  }
  0x13   :  { %v22_v1 = vmul.f32 20.0, %v21_v0  ;;  %s920_s18 = sshll.u32 %s984_s0, 4  ;;  %s921_s18 = int_to_ptr.vmem [resolvable:$true] %s920_s18 }
  0x14   :  { %s956_s19 = scalar_lea.vmem %s921_s18, 128  ;;  %p961_p9 = scmp.lt.s32.totalorder %s921_s18, %s921_s18 }
  0x15   :  { %v930_v2 = vround.rtne.f32 %v22_v1  ;;  %p957_p8 = scmp.ne.s32.totalorder %s921_s18, %s956_s19  ;;  %p962_p10 = scmp.lt.s32.totalorder %s956_s19, %s956_s19 }
  0x17   :  { %v24_v3 = vadd.f32 140.0, %v930_v2  ;;  %p963_p11 = por %p962_p10, %p961_p9 }
  0x19   :  { %v1007_v4 = vmul.f32 0.5, %v24_v3  ;;  %p964_p12 = pnand %p963_p11, %p957_p8 }
  0x1b   :  { %v929_v5 = vadd.f32 7.0, %v1007_v4 }
  0x1d   :  { %v27_v6 = vadd.f32 -147.0, %v929_v5 }
  0x1f   :  { %v28_v7 = vmul.f32 0.001, %v27_v6  ;;  %vm30_vm0 = vcmp.gt.f32.partialorder %v27_v6, 30.0 }
  0x20   :  { %v31_v9 = vsel %vm30_vm0, 1.0, %v983_v8  ;;  %v32_v10 = vsel %vm30_vm0, -65.0, %v27_v6 }
  0x21   :  { %v29_v11 = vadd.f32 -6.9300003, %v28_v7  ;;  %v33_v12 = vmul.f32 4.0, %v31_v9  ;;  %v36_v13 = vmul.f32 0.02, %v32_v10 }
  0x23   :  { %v34_v14 = vadd.f32 %v33_v12, %v29_v11  ;;  %v37_v15 = vadd.f32 3.5, %v36_v13 }
  0x25   :  { %v38_v16 = vmul.f32 %v37_v15, %v32_v10  ;;  %v39_v17 = vsub.f32 %v1007_v4, %v34_v14  ;;  %v41_v19 = vmul.f32 0.99, %v34_v14 }
  0x27   :  { %v40_v18 = vadd.f32 %v39_v17, %v38_v16 }
  0x29   :  { %v42_v20 = vmul.f32 0.001, %v40_v18  ;;  %vm44_vm1 = vcmp.gt.f32.partialorder %v40_v18, 30.0 }
  0x2a   :  { %v45_v21 = vsel %vm44_vm1, 1.0, %v983_v8  ;;  %v46_v22 = vsel %vm44_vm1, -65.0, %v40_v18 }
  0x2b   :  { %v43_v23 = vadd.f32 %v42_v20, %v41_v19  ;;  %v47_v24 = vmul.f32 4.0, %v45_v21  ;;  %v49_v25 = vadd.f32 %v45_v21, %v31_v9  ;;  %v50_v26 = vmul.f32 0.02, %v46_v22 }
  0x2d   :  { %v48_v27 = vadd.f32 %v47_v24, %v43_v23  ;;  %v51_v28 = vadd.f32 3.5, %v50_v26 }
  0x2f   :  { %v52_v29 = vmul.f32 %v51_v28, %v46_v22  ;;  %v53_v30 = vsub.f32 %v1007_v4, %v48_v27  ;;  %v55_v32 = vmul.f32 0.99, %v48_v27 }
  0x31   :  { %v54_v31 = vadd.f32 %v53_v30, %v52_v29 }
  0x33   :  { %v56_v33 = vmul.f32 0.001, %v54_v31  ;;  %vm58_vm2 = vcmp.gt.f32.partialorder %v54_v31, 30.0 }
  0x34   :  { %v59_v34 = vsel %vm58_vm2, 1.0, %v983_v8  ;;  %v60_v35 = vsel %vm58_vm2, -65.0, %v54_v31 }
  0x35   :  { %v57_v36 = vadd.f32 %v56_v33, %v55_v32  ;;  %v61_v37 = vmul.f32 4.0, %v59_v34  ;;  %v63_v38 = vadd.f32 %v59_v34, %v49_v25  ;;  %v64_v39 = vmul.f32 0.02, %v60_v35 }
  0x37   :  { %v62_v40 = vadd.f32 %v61_v37, %v57_v36  ;;  %v65_v41 = vadd.f32 3.5, %v64_v39 }
  0x39   :  { %v66_v42 = vmul.f32 %v65_v41, %v60_v35  ;;  %v67_v43 = vsub.f32 %v1007_v4, %v62_v40  ;;  %v69_v45 = vmul.f32 0.99, %v62_v40 }
  0x3b   :  { %v68_v44 = vadd.f32 %v67_v43, %v66_v42 }
  0x3d   :  { %v70_v46 = vmul.f32 0.001, %v68_v44  ;;  %vm72_vm3 = vcmp.gt.f32.partialorder %v68_v44, 30.0 }
  0x3e   :  { %v73_v47 = vsel %vm72_vm3, 1.0, %v983_v8  ;;  %v74_v48 = vsel %vm72_vm3, -65.0, %v68_v44 }
  0x3f   :  { %v71_v49 = vadd.f32 %v70_v46, %v69_v45  ;;  %v75_v50 = vmul.f32 4.0, %v73_v47  ;;  %v77_v51 = vadd.f32 %v73_v47, %v63_v38  ;;  %v78_v52 = vmul.f32 0.02, %v74_v48 }
  0x41   :  { %v76_v53 = vadd.f32 %v75_v50, %v71_v49  ;;  %v79_v54 = vadd.f32 3.5, %v78_v52 }
  0x43   :  { %v80_v55 = vmul.f32 %v79_v54, %v74_v48  ;;  %v81_v56 = vsub.f32 %v1007_v4, %v76_v53  ;;  %v83_v58 = vmul.f32 0.99, %v76_v53 }
  0x45   :  { %v82_v57 = vadd.f32 %v81_v56, %v80_v55 }
  0x47   :  { %v84_v59 = vmul.f32 0.001, %v82_v57  ;;  %vm86_vm4 = vcmp.gt.f32.partialorder %v82_v57, 30.0 }
  0x48   :  { %v87_v60 = vsel %vm86_vm4, 1.0, %v983_v8  ;;  %v88_v61 = vsel %vm86_vm4, -65.0, %v82_v57 }
  0x49   :  { %v85_v62 = vadd.f32 %v84_v59, %v83_v58  ;;  %v89_v63 = vmul.f32 4.0, %v87_v60  ;;  %v91_v0 = vadd.f32 %v87_v60, %v77_v51  ;;  %v92_v1 = vmul.f32 0.02, %v88_v61 }
  0x4b   :  { %v90_v2 = vadd.f32 %v89_v63, %v85_v62  ;;  %v93_v3 = vadd.f32 3.5, %v92_v1 }
  0x4d   :  { %v94_v5 = vmul.f32 %v93_v3, %v88_v61  ;;  %v95_v6 = vsub.f32 %v1007_v4, %v90_v2  ;;  %v97_v9 = vmul.f32 0.99, %v90_v2 }
  0x4f   :  { %v96_v7 = vadd.f32 %v95_v6, %v94_v5 }
  0x51   :  { %v98_v10 = vmul.f32 0.001, %v96_v7  ;;  %vm100_vm5 = vcmp.gt.f32.partialorder %v96_v7, 30.0 }
  0x52   :  { %v101_v11 = vsel %vm100_vm5, 1.0, %v983_v8  ;;  %v102_v12 = vsel %vm100_vm5, -65.0, %v96_v7 }
  0x53   :  { %v99_v13 = vadd.f32 %v98_v10, %v97_v9  ;;  %v103_v14 = vmul.f32 4.0, %v101_v11  ;;  %v105_v15 = vadd.f32 %v101_v11, %v91_v0  ;;  %v106_v16 = vmul.f32 0.02, %v102_v12 }
  0x55   :  { %v104_v17 = vadd.f32 %v103_v14, %v99_v13  ;;  %v107_v18 = vadd.f32 3.5, %v106_v16 }
  0x57   :  { %v108_v19 = vmul.f32 %v107_v18, %v102_v12  ;;  %v109_v20 = vsub.f32 %v1007_v4, %v104_v17  ;;  %v111_v22 = vmul.f32 0.99, %v104_v17 }
  0x59   :  { %v110_v21 = vadd.f32 %v109_v20, %v108_v19 }
  0x5b   :  { %v112_v23 = vmul.f32 0.001, %v110_v21  ;;  %vm114_vm6 = vcmp.gt.f32.partialorder %v110_v21, 30.0 }
  0x5c   :  { %v115_v24 = vsel %vm114_vm6, 1.0, %v983_v8  ;;  %v116_v25 = vsel %vm114_vm6, -65.0, %v110_v21 }
  0x5d   :  { %v113_v26 = vadd.f32 %v112_v23, %v111_v22  ;;  %v117_v27 = vmul.f32 4.0, %v115_v24  ;;  %v119_v28 = vadd.f32 %v115_v24, %v105_v15  ;;  %v120_v29 = vmul.f32 0.02, %v116_v25 }
  0x5f   :  { %v118_v30 = vadd.f32 %v117_v27, %v113_v26  ;;  %v121_v31 = vadd.f32 3.5, %v120_v29 }
  0x61   :  { %v122_v32 = vmul.f32 %v121_v31, %v116_v25  ;;  %v123_v33 = vsub.f32 %v1007_v4, %v118_v30  ;;  %v125_v35 = vmul.f32 0.99, %v118_v30 }
  0x63   :  { %v124_v34 = vadd.f32 %v123_v33, %v122_v32 }
  0x65   :  { %v126_v36 = vmul.f32 0.001, %v124_v34  ;;  %vm128_vm7 = vcmp.gt.f32.partialorder %v124_v34, 30.0 }
  0x66   :  { %v129_v37 = vsel %vm128_vm7, 1.0, %v983_v8  ;;  %v130_v38 = vsel %vm128_vm7, -65.0, %v124_v34 }
  0x67   :  { %v127_v39 = vadd.f32 %v126_v36, %v125_v35  ;;  %v131_v40 = vmul.f32 4.0, %v129_v37  ;;  %v133_v41 = vadd.f32 %v129_v37, %v119_v28  ;;  %v134_v42 = vmul.f32 0.02, %v130_v38 }
  0x69   :  { %v132_v43 = vadd.f32 %v131_v40, %v127_v39  ;;  %v135_v44 = vadd.f32 3.5, %v134_v42 }
  0x6b   :  { %v136_v45 = vmul.f32 %v135_v44, %v130_v38  ;;  %v137_v46 = vsub.f32 %v1007_v4, %v132_v43  ;;  %v139_v48 = vmul.f32 0.99, %v132_v43 }
  0x6d   :  { %v138_v47 = vadd.f32 %v137_v46, %v136_v45 }
  0x6f   :  { %v140_v49 = vmul.f32 0.001, %v138_v47  ;;  %vm142_vm8 = vcmp.gt.f32.partialorder %v138_v47, 30.0 }
  0x70   :  { %v143_v50 = vsel %vm142_vm8, 1.0, %v983_v8  ;;  %v144_v51 = vsel %vm142_vm8, -65.0, %v138_v47 }
  0x71   :  { %v141_v52 = vadd.f32 %v140_v49, %v139_v48  ;;  %v145_v53 = vmul.f32 4.0, %v143_v50  ;;  %v147_v54 = vadd.f32 %v143_v50, %v133_v41  ;;  %v148_v55 = vmul.f32 0.02, %v144_v51 }
  0x73   :  { %v146_v56 = vadd.f32 %v145_v53, %v141_v52  ;;  %v149_v57 = vadd.f32 3.5, %v148_v55 }
  0x75   :  { %v150_v58 = vmul.f32 %v149_v57, %v144_v51  ;;  %v151_v59 = vsub.f32 %v1007_v4, %v146_v56  ;;  %v153_v61 = vmul.f32 0.99, %v146_v56 }
  0x77   :  { %v152_v60 = vadd.f32 %v151_v59, %v150_v58 }
  0x79   :  { %v154_v62 = vmul.f32 0.001, %v152_v60  ;;  %vm156_vm9 = vcmp.gt.f32.partialorder %v152_v60, 30.0 }
  0x7a   :  { %v157_v63 = vsel %vm156_vm9, 1.0, %v983_v8  ;;  %v158_v0 = vsel %vm156_vm9, -65.0, %v152_v60 }
  0x7b   :  { %v155_v1 = vadd.f32 %v154_v62, %v153_v61  ;;  %v159_v2 = vmul.f32 4.0, %v157_v63  ;;  %v161_v3 = vadd.f32 %v157_v63, %v147_v54  ;;  %v162_v5 = vmul.f32 0.02, %v158_v0 }
  0x7d   :  { %v160_v6 = vadd.f32 %v159_v2, %v155_v1  ;;  %v163_v7 = vadd.f32 3.5, %v162_v5 }
  0x7f   :  { %v164_v9 = vmul.f32 %v163_v7, %v158_v0  ;;  %v165_v10 = vsub.f32 %v1007_v4, %v160_v6  ;;  %v167_v12 = vmul.f32 0.99, %v160_v6 }
  0x81   :  { %v166_v11 = vadd.f32 %v165_v10, %v164_v9 }
  0x83   :  { %v168_v13 = vmul.f32 0.001, %v166_v11  ;;  %vm170_vm10 = vcmp.gt.f32.partialorder %v166_v11, 30.0 }
  0x84   :  { %v171_v14 = vsel %vm170_vm10, 1.0, %v983_v8  ;;  %v172_v15 = vsel %vm170_vm10, -65.0, %v166_v11 }
  0x85   :  { %v169_v16 = vadd.f32 %v168_v13, %v167_v12  ;;  %v173_v17 = vmul.f32 4.0, %v171_v14  ;;  %v175_v18 = vadd.f32 %v171_v14, %v161_v3  ;;  %v176_v19 = vmul.f32 0.02, %v172_v15 }
  0x87   :  { %v174_v20 = vadd.f32 %v173_v17, %v169_v16  ;;  %v177_v21 = vadd.f32 3.5, %v176_v19 }
  0x89   :  { %v178_v22 = vmul.f32 %v177_v21, %v172_v15  ;;  %v179_v23 = vsub.f32 %v1007_v4, %v174_v20  ;;  %v181_v25 = vmul.f32 0.99, %v174_v20 }
  0x8b   :  { %v180_v24 = vadd.f32 %v179_v23, %v178_v22 }
  0x8d   :  { %v182_v26 = vmul.f32 0.001, %v180_v24  ;;  %vm184_vm11 = vcmp.gt.f32.partialorder %v180_v24, 30.0 }
  0x8e   :  { %v185_v27 = vsel %vm184_vm11, 1.0, %v983_v8  ;;  %v186_v28 = vsel %vm184_vm11, -65.0, %v180_v24 }
  0x8f   :  { %v183_v29 = vadd.f32 %v182_v26, %v181_v25  ;;  %v187_v30 = vmul.f32 4.0, %v185_v27  ;;  %v189_v31 = vadd.f32 %v185_v27, %v175_v18  ;;  %v190_v32 = vmul.f32 0.02, %v186_v28 }
  0x91   :  { %v188_v33 = vadd.f32 %v187_v30, %v183_v29  ;;  %v191_v34 = vadd.f32 3.5, %v190_v32 }
  0x93   :  { %v192_v35 = vmul.f32 %v191_v34, %v186_v28  ;;  %v193_v36 = vsub.f32 %v1007_v4, %v188_v33  ;;  %v195_v38 = vmul.f32 0.99, %v188_v33 }
  0x95   :  { %v194_v37 = vadd.f32 %v193_v36, %v192_v35 }
  0x97   :  { %v196_v39 = vmul.f32 0.001, %v194_v37  ;;  %vm198_vm12 = vcmp.gt.f32.partialorder %v194_v37, 30.0 }
  0x98   :  { %v199_v40 = vsel %vm198_vm12, 1.0, %v983_v8  ;;  %v200_v41 = vsel %vm198_vm12, -65.0, %v194_v37 }
  0x99   :  { %v197_v42 = vadd.f32 %v196_v39, %v195_v38  ;;  %v201_v43 = vmul.f32 4.0, %v199_v40  ;;  %v203_v44 = vadd.f32 %v199_v40, %v189_v31  ;;  %v204_v45 = vmul.f32 0.02, %v200_v41 }
  0x9b   :  { %v202_v46 = vadd.f32 %v201_v43, %v197_v42  ;;  %v205_v47 = vadd.f32 3.5, %v204_v45 }
  0x9d   :  { %v206_v48 = vmul.f32 %v205_v47, %v200_v41  ;;  %v207_v49 = vsub.f32 %v1007_v4, %v202_v46  ;;  %v209_v51 = vmul.f32 0.99, %v202_v46 }
  0x9f   :  { %v208_v50 = vadd.f32 %v207_v49, %v206_v48 }
  0xa1   :  { %v210_v52 = vmul.f32 0.001, %v208_v50  ;;  %vm212_vm13 = vcmp.gt.f32.partialorder %v208_v50, 30.0 }
  0xa2   :  { %v213_v53 = vsel %vm212_vm13, 1.0, %v983_v8  ;;  %v214_v54 = vsel %vm212_vm13, -65.0, %v208_v50 }
  0xa3   :  { %v211_v55 = vadd.f32 %v210_v52, %v209_v51  ;;  %v215_v56 = vmul.f32 4.0, %v213_v53  ;;  %v217_v57 = vadd.f32 %v213_v53, %v203_v44  ;;  %v218_v58 = vmul.f32 0.02, %v214_v54 }
  0xa5   :  { %v216_v59 = vadd.f32 %v215_v56, %v211_v55  ;;  %v219_v60 = vadd.f32 3.5, %v218_v58 }
  0xa7   :  { %v220_v61 = vmul.f32 %v219_v60, %v214_v54  ;;  %v221_v62 = vsub.f32 %v1007_v4, %v216_v59  ;;  %v223_v0 = vmul.f32 0.99, %v216_v59 }
  0xa9   :  { %v222_v63 = vadd.f32 %v221_v62, %v220_v61 }
  0xab   :  { %v224_v1 = vmul.f32 0.001, %v222_v63  ;;  %vm226_vm14 = vcmp.gt.f32.partialorder %v222_v63, 30.0 }
  0xac   :  { %v227_v2 = vsel %vm226_vm14, 1.0, %v983_v8  ;;  %v228_v3 = vsel %vm226_vm14, -65.0, %v222_v63 }
  0xad   :  { %v225_v5 = vadd.f32 %v224_v1, %v223_v0  ;;  %v229_v6 = vmul.f32 4.0, %v227_v2  ;;  %v231_v7 = vadd.f32 %v227_v2, %v217_v57  ;;  %v232_v9 = vmul.f32 0.02, %v228_v3 }
  0xaf   :  { %v230_v10 = vadd.f32 %v229_v6, %v225_v5  ;;  %v233_v11 = vadd.f32 3.5, %v232_v9 }
  0xb1   :  { %v234_v12 = vmul.f32 %v233_v11, %v228_v3  ;;  %v235_v13 = vsub.f32 %v1007_v4, %v230_v10  ;;  %v237_v15 = vmul.f32 0.99, %v230_v10 }
  0xb3   :  { %v236_v14 = vadd.f32 %v235_v13, %v234_v12 }
  0xb5   :  { %v238_v16 = vmul.f32 0.001, %v236_v14  ;;  %vm240_vm15 = vcmp.gt.f32.partialorder %v236_v14, 30.0 }
  0xb6   :  { %v241_v17 = vsel %vm240_vm15, 1.0, %v983_v8  ;;  %v242_v18 = vsel %vm240_vm15, -65.0, %v236_v14 }
  0xb7   :  { %v239_v19 = vadd.f32 %v238_v16, %v237_v15  ;;  %v243_v20 = vmul.f32 4.0, %v241_v17  ;;  %v245_v21 = vadd.f32 %v241_v17, %v231_v7  ;;  %v246_v22 = vmul.f32 0.02, %v242_v18 }
  0xb9   :  { %v244_v23 = vadd.f32 %v243_v20, %v239_v19  ;;  %v247_v24 = vadd.f32 3.5, %v246_v22 }
  0xbb   :  { %v248_v25 = vmul.f32 %v247_v24, %v242_v18  ;;  %v249_v26 = vsub.f32 %v1007_v4, %v244_v23  ;;  %v251_v28 = vmul.f32 0.99, %v244_v23 }
  0xbd   :  { %v250_v27 = vadd.f32 %v249_v26, %v248_v25 }
  0xbf   :  { %v252_v29 = vmul.f32 0.001, %v250_v27  ;;  %vm254_vm0 = vcmp.gt.f32.partialorder %v250_v27, 30.0 }
  0xc0   :  { %v255_v30 = vsel %vm254_vm0, 1.0, %v983_v8  ;;  %v256_v31 = vsel %vm254_vm0, -65.0, %v250_v27 }
  0xc1   :  { %v253_v32 = vadd.f32 %v252_v29, %v251_v28  ;;  %v257_v33 = vmul.f32 4.0, %v255_v30  ;;  %v259_v34 = vadd.f32 %v255_v30, %v245_v21  ;;  %v260_v35 = vmul.f32 0.02, %v256_v31 }
  0xc3   :  { %v258_v36 = vadd.f32 %v257_v33, %v253_v32  ;;  %v261_v37 = vadd.f32 3.5, %v260_v35 }
  0xc5   :  { %v262_v38 = vmul.f32 %v261_v37, %v256_v31  ;;  %v263_v39 = vsub.f32 %v1007_v4, %v258_v36  ;;  %v265_v41 = vmul.f32 0.99, %v258_v36 }
  0xc7   :  { %v264_v40 = vadd.f32 %v263_v39, %v262_v38 }
  0xc9   :  { %v266_v42 = vmul.f32 0.001, %v264_v40  ;;  %vm268_vm1 = vcmp.gt.f32.partialorder %v264_v40, 30.0 }
  0xca   :  { %v269_v43 = vsel %vm268_vm1, 1.0, %v983_v8  ;;  %v270_v44 = vsel %vm268_vm1, -65.0, %v264_v40 }
  0xcb   :  { %v267_v45 = vadd.f32 %v266_v42, %v265_v41  ;;  %v271_v46 = vmul.f32 4.0, %v269_v43  ;;  %v273_v47 = vadd.f32 %v269_v43, %v259_v34  ;;  %v274_v48 = vmul.f32 0.02, %v270_v44 }
  0xcd   :  { %v272_v49 = vadd.f32 %v271_v46, %v267_v45  ;;  %v275_v50 = vadd.f32 3.5, %v274_v48 }
  0xcf   :  { %v276_v51 = vmul.f32 %v275_v50, %v270_v44  ;;  %v277_v52 = vsub.f32 %v1007_v4, %v272_v49  ;;  %v279_v54 = vmul.f32 0.99, %v272_v49 }
  0xd1   :  { %v278_v53 = vadd.f32 %v277_v52, %v276_v51 }
  0xd3   :  { %v280_v55 = vmul.f32 0.001, %v278_v53  ;;  %vm282_vm2 = vcmp.gt.f32.partialorder %v278_v53, 30.0 }
  0xd4   :  { %v283_v56 = vsel %vm282_vm2, 1.0, %v983_v8  ;;  %v284_v57 = vsel %vm282_vm2, -65.0, %v278_v53 }
  0xd5   :  { %v281_v58 = vadd.f32 %v280_v55, %v279_v54  ;;  %v285_v59 = vmul.f32 4.0, %v283_v56  ;;  %v287_v60 = vadd.f32 %v283_v56, %v273_v47  ;;  %v288_v61 = vmul.f32 0.02, %v284_v57 }
  0xd7   :  { %v286_v62 = vadd.f32 %v285_v59, %v281_v58  ;;  %v289_v63 = vadd.f32 3.5, %v288_v61 }
  0xd9   :  { %v290_v0 = vmul.f32 %v289_v63, %v284_v57  ;;  %v291_v1 = vsub.f32 %v1007_v4, %v286_v62  ;;  %v293_v3 = vmul.f32 0.99, %v286_v62 }
  0xdb   :  { %v292_v2 = vadd.f32 %v291_v1, %v290_v0 }
  0xdd   :  { %v294_v5 = vmul.f32 0.001, %v292_v2  ;;  %vm296_vm3 = vcmp.gt.f32.partialorder %v292_v2, 30.0 }
  0xde   :  { %v297_v6 = vsel %vm296_vm3, 1.0, %v983_v8  ;;  %v298_v7 = vsel %vm296_vm3, -65.0, %v292_v2 }
  0xdf   :  { %v295_v9 = vadd.f32 %v294_v5, %v293_v3  ;;  %v299_v10 = vmul.f32 4.0, %v297_v6  ;;  %v301_v11 = vadd.f32 %v297_v6, %v287_v60  ;;  %v302_v12 = vmul.f32 0.02, %v298_v7 }
  0xe1   :  { %v300_v13 = vadd.f32 %v299_v10, %v295_v9  ;;  %v303_v14 = vadd.f32 3.5, %v302_v12 }
  0xe3   :  { %v304_v15 = vmul.f32 %v303_v14, %v298_v7  ;;  %v305_v16 = vsub.f32 %v1007_v4, %v300_v13  ;;  %v307_v18 = vmul.f32 0.99, %v300_v13 }
  0xe5   :  { %v306_v17 = vadd.f32 %v305_v16, %v304_v15 }
  0xe7   :  { %v308_v19 = vmul.f32 0.001, %v306_v17  ;;  %vm310_vm4 = vcmp.gt.f32.partialorder %v306_v17, 30.0 }
  0xe8   :  { %v311_v20 = vsel %vm310_vm4, 1.0, %v983_v8  ;;  %v312_v21 = vsel %vm310_vm4, -65.0, %v306_v17 }
  0xe9   :  { %v309_v22 = vadd.f32 %v308_v19, %v307_v18  ;;  %v313_v23 = vmul.f32 4.0, %v311_v20  ;;  %v315_v24 = vadd.f32 %v311_v20, %v301_v11  ;;  %v316_v25 = vmul.f32 0.02, %v312_v21 }
  0xeb   :  { %v314_v26 = vadd.f32 %v313_v23, %v309_v22  ;;  %v317_v27 = vadd.f32 3.5, %v316_v25 }
  0xed   :  { %v318_v28 = vmul.f32 %v317_v27, %v312_v21  ;;  %v319_v29 = vsub.f32 %v1007_v4, %v314_v26  ;;  %v321_v31 = vmul.f32 0.99, %v314_v26 }
  0xef   :  { %v320_v30 = vadd.f32 %v319_v29, %v318_v28 }
  0xf1   :  { %v322_v32 = vmul.f32 0.001, %v320_v30  ;;  %vm324_vm5 = vcmp.gt.f32.partialorder %v320_v30, 30.0 }
  0xf2   :  { %v325_v33 = vsel %vm324_vm5, 1.0, %v983_v8  ;;  %v326_v34 = vsel %vm324_vm5, -65.0, %v320_v30 }
  0xf3   :  { %v323_v35 = vadd.f32 %v322_v32, %v321_v31  ;;  %v327_v36 = vmul.f32 4.0, %v325_v33  ;;  %v329_v37 = vadd.f32 %v325_v33, %v315_v24  ;;  %v330_v38 = vmul.f32 0.02, %v326_v34 }
  0xf5   :  { %v328_v39 = vadd.f32 %v327_v36, %v323_v35  ;;  %v331_v40 = vadd.f32 3.5, %v330_v38 }
  0xf7   :  { %v332_v41 = vmul.f32 %v331_v40, %v326_v34  ;;  %v333_v42 = vsub.f32 %v1007_v4, %v328_v39  ;;  %v335_v44 = vmul.f32 0.99, %v328_v39 }
  0xf9   :  { %v334_v43 = vadd.f32 %v333_v42, %v332_v41 }
  0xfb   :  { %v336_v45 = vmul.f32 0.001, %v334_v43  ;;  %vm338_vm6 = vcmp.gt.f32.partialorder %v334_v43, 30.0 }
  0xfc   :  { %v339_v46 = vsel %vm338_vm6, 1.0, %v983_v8  ;;  %v340_v47 = vsel %vm338_vm6, -65.0, %v334_v43 }
  0xfd   :  { %v337_v48 = vadd.f32 %v336_v45, %v335_v44  ;;  %v341_v49 = vmul.f32 4.0, %v339_v46  ;;  %v343_v50 = vadd.f32 %v339_v46, %v329_v37  ;;  %v344_v51 = vmul.f32 0.02, %v340_v47 }
  0xff   :  { %v342_v52 = vadd.f32 %v341_v49, %v337_v48  ;;  %v345_v53 = vadd.f32 3.5, %v344_v51 }
 0x101   :  { %v346_v54 = vmul.f32 %v345_v53, %v340_v47  ;;  %v347_v55 = vsub.f32 %v1007_v4, %v342_v52  ;;  %v349_v57 = vmul.f32 0.99, %v342_v52 }
 0x103   :  { %v348_v56 = vadd.f32 %v347_v55, %v346_v54 }
 0x105   :  { %v350_v58 = vmul.f32 0.001, %v348_v56  ;;  %vm352_vm7 = vcmp.gt.f32.partialorder %v348_v56, 30.0 }
 0x106   :  { %v353_v59 = vsel %vm352_vm7, 1.0, %v983_v8  ;;  %v354_v60 = vsel %vm352_vm7, -65.0, %v348_v56 }
 0x107   :  { %v351_v61 = vadd.f32 %v350_v58, %v349_v57  ;;  %v355_v62 = vmul.f32 4.0, %v353_v59  ;;  %v357_v63 = vadd.f32 %v353_v59, %v343_v50  ;;  %v358_v0 = vmul.f32 0.02, %v354_v60 }
 0x109   :  { %v356_v1 = vadd.f32 %v355_v62, %v351_v61  ;;  %v359_v2 = vadd.f32 3.5, %v358_v0 }
 0x10b   :  { %v360_v3 = vmul.f32 %v359_v2, %v354_v60  ;;  %v361_v5 = vsub.f32 %v1007_v4, %v356_v1  ;;  %v363_v7 = vmul.f32 0.99, %v356_v1 }
 0x10d   :  { %v362_v6 = vadd.f32 %v361_v5, %v360_v3 }
 0x10f   :  { %v364_v9 = vmul.f32 0.001, %v362_v6  ;;  %vm366_vm8 = vcmp.gt.f32.partialorder %v362_v6, 30.0 }
 0x110   :  { %v367_v10 = vsel %vm366_vm8, 1.0, %v983_v8  ;;  %v368_v11 = vsel %vm366_vm8, -65.0, %v362_v6 }
 0x111   :  { %v365_v12 = vadd.f32 %v364_v9, %v363_v7  ;;  %v369_v13 = vmul.f32 4.0, %v367_v10  ;;  %v371_v14 = vadd.f32 %v367_v10, %v357_v63  ;;  %v372_v15 = vmul.f32 0.02, %v368_v11 }
 0x113   :  { %v370_v16 = vadd.f32 %v369_v13, %v365_v12  ;;  %v373_v17 = vadd.f32 3.5, %v372_v15 }
 0x115   :  { %v374_v18 = vmul.f32 %v373_v17, %v368_v11  ;;  %v375_v19 = vsub.f32 %v1007_v4, %v370_v16  ;;  %v377_v21 = vmul.f32 0.99, %v370_v16 }
 0x117   :  { %v376_v20 = vadd.f32 %v375_v19, %v374_v18 }
 0x119   :  { %v378_v22 = vmul.f32 0.001, %v376_v20  ;;  %vm380_vm9 = vcmp.gt.f32.partialorder %v376_v20, 30.0 }
 0x11a   :  { %v381_v23 = vsel %vm380_vm9, 1.0, %v983_v8  ;;  %v382_v24 = vsel %vm380_vm9, -65.0, %v376_v20 }
 0x11b   :  { %v379_v25 = vadd.f32 %v378_v22, %v377_v21  ;;  %v383_v26 = vmul.f32 4.0, %v381_v23  ;;  %v385_v27 = vadd.f32 %v381_v23, %v371_v14  ;;  %v386_v28 = vmul.f32 0.02, %v382_v24 }
 0x11d   :  { %v384_v29 = vadd.f32 %v383_v26, %v379_v25  ;;  %v387_v30 = vadd.f32 3.5, %v386_v28 }
 0x11f   :  { %v388_v31 = vmul.f32 %v387_v30, %v382_v24  ;;  %v389_v32 = vsub.f32 %v1007_v4, %v384_v29  ;;  %v391_v34 = vmul.f32 0.99, %v384_v29 }
 0x121   :  { %v390_v33 = vadd.f32 %v389_v32, %v388_v31 }
 0x123   :  { %v392_v35 = vmul.f32 0.001, %v390_v33  ;;  %vm394_vm10 = vcmp.gt.f32.partialorder %v390_v33, 30.0 }
 0x124   :  { %v395_v36 = vsel %vm394_vm10, 1.0, %v983_v8  ;;  %v396_v37 = vsel %vm394_vm10, -65.0, %v390_v33 }
 0x125   :  { %v393_v38 = vadd.f32 %v392_v35, %v391_v34  ;;  %v397_v39 = vmul.f32 4.0, %v395_v36  ;;  %v399_v40 = vadd.f32 %v395_v36, %v385_v27  ;;  %v400_v41 = vmul.f32 0.02, %v396_v37 }
 0x127   :  { %v398_v42 = vadd.f32 %v397_v39, %v393_v38  ;;  %v401_v43 = vadd.f32 3.5, %v400_v41 }
 0x129   :  { %v402_v44 = vmul.f32 %v401_v43, %v396_v37  ;;  %v403_v45 = vsub.f32 %v1007_v4, %v398_v42  ;;  %v405_v47 = vmul.f32 0.99, %v398_v42 }
 0x12b   :  { %v404_v46 = vadd.f32 %v403_v45, %v402_v44 }
 0x12d   :  { %v406_v48 = vmul.f32 0.001, %v404_v46  ;;  %vm408_vm11 = vcmp.gt.f32.partialorder %v404_v46, 30.0 }
 0x12e   :  { %v409_v49 = vsel %vm408_vm11, 1.0, %v983_v8  ;;  %v410_v50 = vsel %vm408_vm11, -65.0, %v404_v46 }
 0x12f   :  { %v407_v51 = vadd.f32 %v406_v48, %v405_v47  ;;  %v411_v52 = vmul.f32 4.0, %v409_v49  ;;  %v413_v53 = vadd.f32 %v409_v49, %v399_v40  ;;  %v414_v54 = vmul.f32 0.02, %v410_v50 }
 0x131   :  { %v412_v55 = vadd.f32 %v411_v52, %v407_v51  ;;  %v415_v56 = vadd.f32 3.5, %v414_v54 }
 0x133   :  { %v416_v57 = vmul.f32 %v415_v56, %v410_v50  ;;  %v417_v58 = vsub.f32 %v1007_v4, %v412_v55  ;;  %v419_v60 = vmul.f32 0.99, %v412_v55 }
 0x135   :  { %v418_v59 = vadd.f32 %v417_v58, %v416_v57 }
 0x137   :  { %v420_v61 = vmul.f32 0.001, %v418_v59  ;;  %vm422_vm12 = vcmp.gt.f32.partialorder %v418_v59, 30.0 }
 0x138   :  { %v423_v62 = vsel %vm422_vm12, 1.0, %v983_v8  ;;  %v424_v63 = vsel %vm422_vm12, -65.0, %v418_v59 }
 0x139   :  { %v421_v0 = vadd.f32 %v420_v61, %v419_v60  ;;  %v425_v1 = vmul.f32 4.0, %v423_v62  ;;  %v427_v2 = vadd.f32 %v423_v62, %v413_v53  ;;  %v428_v3 = vmul.f32 0.02, %v424_v63 }
 0x13b   :  { %v426_v5 = vadd.f32 %v425_v1, %v421_v0  ;;  %v429_v6 = vadd.f32 3.5, %v428_v3 }
 0x13d   :  { %v430_v7 = vmul.f32 %v429_v6, %v424_v63  ;;  %v431_v9 = vsub.f32 %v1007_v4, %v426_v5  ;;  %v433_v11 = vmul.f32 0.99, %v426_v5 }
 0x13f   :  { %v432_v10 = vadd.f32 %v431_v9, %v430_v7 }
 0x141   :  { %v434_v12 = vmul.f32 0.001, %v432_v10  ;;  %vm436_vm13 = vcmp.gt.f32.partialorder %v432_v10, 30.0 }
 0x142   :  { %v437_v13 = vsel %vm436_vm13, 1.0, %v983_v8  ;;  %v438_v14 = vsel %vm436_vm13, -65.0, %v432_v10 }
 0x143   :  { %v435_v15 = vadd.f32 %v434_v12, %v433_v11  ;;  %v439_v16 = vmul.f32 4.0, %v437_v13  ;;  %v441_v17 = vadd.f32 %v437_v13, %v427_v2  ;;  %v442_v18 = vmul.f32 0.02, %v438_v14 }
 0x145   :  { %v440_v19 = vadd.f32 %v439_v16, %v435_v15  ;;  %v443_v20 = vadd.f32 3.5, %v442_v18 }
 0x147   :  { %v444_v21 = vmul.f32 %v443_v20, %v438_v14  ;;  %v445_v22 = vsub.f32 %v1007_v4, %v440_v19  ;;  %v447_v24 = vmul.f32 0.99, %v440_v19 }
 0x149   :  { %v446_v23 = vadd.f32 %v445_v22, %v444_v21 }
 0x14b   :  { %v448_v25 = vmul.f32 0.001, %v446_v23  ;;  %vm450_vm14 = vcmp.gt.f32.partialorder %v446_v23, 30.0 }
 0x14c   :  { %v451_v26 = vsel %vm450_vm14, 1.0, %v983_v8  ;;  %v452_v27 = vsel %vm450_vm14, -65.0, %v446_v23 }
 0x14d   :  { %v449_v28 = vadd.f32 %v448_v25, %v447_v24  ;;  %v453_v29 = vmul.f32 4.0, %v451_v26  ;;  %v455_v30 = vadd.f32 %v451_v26, %v441_v17  ;;  %v456_v31 = vmul.f32 0.02, %v452_v27 }
 0x14f   :  { %v454_v32 = vadd.f32 %v453_v29, %v449_v28  ;;  %v457_v33 = vadd.f32 3.5, %v456_v31 }
 0x151   :  { %v458_v34 = vmul.f32 %v457_v33, %v452_v27  ;;  %v459_v35 = vsub.f32 %v1007_v4, %v454_v32  ;;  %v461_v37 = vmul.f32 0.99, %v454_v32 }
 0x153   :  { %v460_v36 = vadd.f32 %v459_v35, %v458_v34 }
 0x155   :  { %v462_v38 = vmul.f32 0.001, %v460_v36  ;;  %vm464_vm15 = vcmp.gt.f32.partialorder %v460_v36, 30.0 }
 0x156   :  { %v465_v39 = vsel %vm464_vm15, 1.0, %v983_v8  ;;  %v466_v40 = vsel %vm464_vm15, -65.0, %v460_v36 }
 0x157   :  { %v463_v41 = vadd.f32 %v462_v38, %v461_v37  ;;  %v467_v42 = vmul.f32 4.0, %v465_v39  ;;  %v469_v43 = vadd.f32 %v465_v39, %v455_v30  ;;  %v470_v44 = vmul.f32 0.02, %v466_v40 }
 0x159   :  { %v468_v45 = vadd.f32 %v467_v42, %v463_v41  ;;  %v471_v46 = vadd.f32 3.5, %v470_v44 }
 0x15b   :  { %v472_v47 = vmul.f32 %v471_v46, %v466_v40  ;;  %v473_v48 = vsub.f32 %v1007_v4, %v468_v45  ;;  %v475_v50 = vmul.f32 0.99, %v468_v45 }
 0x15d   :  { %v474_v49 = vadd.f32 %v473_v48, %v472_v47 }
 0x15f   :  { %v476_v51 = vmul.f32 0.001, %v474_v49  ;;  %vm478_vm0 = vcmp.gt.f32.partialorder %v474_v49, 30.0 }
 0x160   :  { %v479_v52 = vsel %vm478_vm0, 1.0, %v983_v8  ;;  %v480_v53 = vsel %vm478_vm0, -65.0, %v474_v49 }
 0x161   :  { %v477_v54 = vadd.f32 %v476_v51, %v475_v50  ;;  %v481_v55 = vmul.f32 4.0, %v479_v52  ;;  %v483_v56 = vadd.f32 %v479_v52, %v469_v43  ;;  %v484_v57 = vmul.f32 0.02, %v480_v53 }
 0x163   :  { %v482_v58 = vadd.f32 %v481_v55, %v477_v54  ;;  %v485_v59 = vadd.f32 3.5, %v484_v57 }
 0x165   :  { %v486_v60 = vmul.f32 %v485_v59, %v480_v53  ;;  %v487_v61 = vsub.f32 %v1007_v4, %v482_v58  ;;  %v489_v63 = vmul.f32 0.99, %v482_v58 }
 0x167   :  { %v488_v62 = vadd.f32 %v487_v61, %v486_v60 }
 0x169   :  { %v490_v0 = vmul.f32 0.001, %v488_v62  ;;  %vm492_vm1 = vcmp.gt.f32.partialorder %v488_v62, 30.0 }
 0x16a   :  { %v493_v1 = vsel %vm492_vm1, 1.0, %v983_v8  ;;  %v494_v2 = vsel %vm492_vm1, -65.0, %v488_v62 }
 0x16b   :  { %v491_v3 = vadd.f32 %v490_v0, %v489_v63  ;;  %v495_v5 = vmul.f32 4.0, %v493_v1  ;;  %v497_v6 = vadd.f32 %v493_v1, %v483_v56  ;;  %v498_v7 = vmul.f32 0.02, %v494_v2 }
 0x16d   :  { %v496_v9 = vadd.f32 %v495_v5, %v491_v3  ;;  %v499_v10 = vadd.f32 3.5, %v498_v7 }
 0x16f   :  { %v500_v11 = vmul.f32 %v499_v10, %v494_v2  ;;  %v501_v12 = vsub.f32 %v1007_v4, %v496_v9  ;;  %v503_v14 = vmul.f32 0.99, %v496_v9 }
 0x171   :  { %v502_v13 = vadd.f32 %v501_v12, %v500_v11 }
 0x173   :  { %v504_v15 = vmul.f32 0.001, %v502_v13  ;;  %vm506_vm2 = vcmp.gt.f32.partialorder %v502_v13, 30.0 }
 0x174   :  { %v507_v16 = vsel %vm506_vm2, 1.0, %v983_v8  ;;  %v508_v17 = vsel %vm506_vm2, -65.0, %v502_v13 }
 0x175   :  { %v505_v18 = vadd.f32 %v504_v15, %v503_v14  ;;  %v509_v19 = vmul.f32 4.0, %v507_v16  ;;  %v511_v20 = vadd.f32 %v507_v16, %v497_v6  ;;  %v512_v21 = vmul.f32 0.02, %v508_v17 }
 0x177   :  { %v510_v22 = vadd.f32 %v509_v19, %v505_v18  ;;  %v513_v23 = vadd.f32 3.5, %v512_v21 }
 0x179   :  { %v514_v24 = vmul.f32 %v513_v23, %v508_v17  ;;  %v515_v25 = vsub.f32 %v1007_v4, %v510_v22  ;;  %v517_v27 = vmul.f32 0.99, %v510_v22 }
 0x17b   :  { %v516_v26 = vadd.f32 %v515_v25, %v514_v24 }
 0x17d   :  { %v518_v28 = vmul.f32 0.001, %v516_v26  ;;  %vm520_vm3 = vcmp.gt.f32.partialorder %v516_v26, 30.0 }
 0x17e   :  { %v521_v29 = vsel %vm520_vm3, 1.0, %v983_v8  ;;  %v522_v30 = vsel %vm520_vm3, -65.0, %v516_v26 }
 0x17f   :  { %v519_v31 = vadd.f32 %v518_v28, %v517_v27  ;;  %v523_v32 = vmul.f32 4.0, %v521_v29  ;;  %v525_v33 = vadd.f32 %v521_v29, %v511_v20  ;;  %v526_v34 = vmul.f32 0.02, %v522_v30 }
 0x181   :  { %v524_v35 = vadd.f32 %v523_v32, %v519_v31  ;;  %v527_v36 = vadd.f32 3.5, %v526_v34 }
 0x183   :  { %v528_v37 = vmul.f32 %v527_v36, %v522_v30  ;;  %v529_v38 = vsub.f32 %v1007_v4, %v524_v35  ;;  %v531_v40 = vmul.f32 0.99, %v524_v35 }
 0x185   :  { %v530_v39 = vadd.f32 %v529_v38, %v528_v37 }
 0x187   :  { %v532_v41 = vmul.f32 0.001, %v530_v39  ;;  %vm534_vm4 = vcmp.gt.f32.partialorder %v530_v39, 30.0 }
 0x188   :  { %v535_v42 = vsel %vm534_vm4, 1.0, %v983_v8  ;;  %v536_v43 = vsel %vm534_vm4, -65.0, %v530_v39 }
 0x189   :  { %v533_v44 = vadd.f32 %v532_v41, %v531_v40  ;;  %v537_v45 = vmul.f32 4.0, %v535_v42  ;;  %v539_v46 = vadd.f32 %v535_v42, %v525_v33  ;;  %v540_v47 = vmul.f32 0.02, %v536_v43 }
 0x18b   :  { %v538_v48 = vadd.f32 %v537_v45, %v533_v44  ;;  %v541_v49 = vadd.f32 3.5, %v540_v47 }
 0x18d   :  { %v542_v50 = vmul.f32 %v541_v49, %v536_v43  ;;  %v543_v51 = vsub.f32 %v1007_v4, %v538_v48  ;;  %v545_v53 = vmul.f32 0.99, %v538_v48 }
 0x18f   :  { %v544_v52 = vadd.f32 %v543_v51, %v542_v50 }
 0x191   :  { %v546_v54 = vmul.f32 0.001, %v544_v52  ;;  %vm548_vm5 = vcmp.gt.f32.partialorder %v544_v52, 30.0 }
 0x192   :  { %v549_v55 = vsel %vm548_vm5, 1.0, %v983_v8  ;;  %v550_v56 = vsel %vm548_vm5, -65.0, %v544_v52 }
 0x193   :  { %v547_v57 = vadd.f32 %v546_v54, %v545_v53  ;;  %v551_v58 = vmul.f32 4.0, %v549_v55  ;;  %v553_v59 = vadd.f32 %v549_v55, %v539_v46  ;;  %v554_v60 = vmul.f32 0.02, %v550_v56 }
 0x195   :  { %v552_v61 = vadd.f32 %v551_v58, %v547_v57  ;;  %v555_v62 = vadd.f32 3.5, %v554_v60 }
 0x197   :  { %v556_v63 = vmul.f32 %v555_v62, %v550_v56  ;;  %v557_v0 = vsub.f32 %v1007_v4, %v552_v61  ;;  %v559_v2 = vmul.f32 0.99, %v552_v61 }
 0x199   :  { %v558_v1 = vadd.f32 %v557_v0, %v556_v63 }
 0x19b   :  { %v560_v3 = vmul.f32 0.001, %v558_v1  ;;  %vm562_vm6 = vcmp.gt.f32.partialorder %v558_v1, 30.0 }
 0x19c   :  { %v563_v5 = vsel %vm562_vm6, 1.0, %v983_v8  ;;  %v564_v6 = vsel %vm562_vm6, -65.0, %v558_v1 }
 0x19d   :  { %v561_v7 = vadd.f32 %v560_v3, %v559_v2  ;;  %v565_v9 = vmul.f32 4.0, %v563_v5  ;;  %v567_v10 = vadd.f32 %v563_v5, %v553_v59  ;;  %v568_v11 = vmul.f32 0.02, %v564_v6 }
 0x19f   :  { %v566_v12 = vadd.f32 %v565_v9, %v561_v7  ;;  %v569_v13 = vadd.f32 3.5, %v568_v11 }
 0x1a1   :  { %v570_v14 = vmul.f32 %v569_v13, %v564_v6  ;;  %v571_v15 = vsub.f32 %v1007_v4, %v566_v12  ;;  %v573_v17 = vmul.f32 0.99, %v566_v12 }
 0x1a3   :  { %v572_v16 = vadd.f32 %v571_v15, %v570_v14 }
 0x1a5   :  { %v574_v18 = vmul.f32 0.001, %v572_v16  ;;  %vm576_vm7 = vcmp.gt.f32.partialorder %v572_v16, 30.0 }
 0x1a6   :  { %v577_v19 = vsel %vm576_vm7, 1.0, %v983_v8  ;;  %v578_v20 = vsel %vm576_vm7, -65.0, %v572_v16 }
 0x1a7   :  { %v575_v21 = vadd.f32 %v574_v18, %v573_v17  ;;  %v579_v22 = vmul.f32 4.0, %v577_v19  ;;  %v581_v23 = vadd.f32 %v577_v19, %v567_v10  ;;  %v582_v24 = vmul.f32 0.02, %v578_v20 }
 0x1a9   :  { %v580_v25 = vadd.f32 %v579_v22, %v575_v21  ;;  %v583_v26 = vadd.f32 3.5, %v582_v24 }
 0x1ab   :  { %v584_v27 = vmul.f32 %v583_v26, %v578_v20  ;;  %v585_v28 = vsub.f32 %v1007_v4, %v580_v25  ;;  %v587_v30 = vmul.f32 0.99, %v580_v25 }
 0x1ad   :  { %v586_v29 = vadd.f32 %v585_v28, %v584_v27 }
 0x1af   :  { %v588_v31 = vmul.f32 0.001, %v586_v29  ;;  %vm590_vm8 = vcmp.gt.f32.partialorder %v586_v29, 30.0 }
 0x1b0   :  { %v591_v32 = vsel %vm590_vm8, 1.0, %v983_v8  ;;  %v592_v33 = vsel %vm590_vm8, -65.0, %v586_v29 }
 0x1b1   :  { %v589_v34 = vadd.f32 %v588_v31, %v587_v30  ;;  %v593_v35 = vmul.f32 4.0, %v591_v32  ;;  %v595_v36 = vadd.f32 %v591_v32, %v581_v23  ;;  %v596_v37 = vmul.f32 0.02, %v592_v33 }
 0x1b3   :  { %v594_v38 = vadd.f32 %v593_v35, %v589_v34  ;;  %v597_v39 = vadd.f32 3.5, %v596_v37 }
 0x1b5   :  { %v598_v40 = vmul.f32 %v597_v39, %v592_v33  ;;  %v599_v41 = vsub.f32 %v1007_v4, %v594_v38  ;;  %v601_v43 = vmul.f32 0.99, %v594_v38 }
 0x1b7   :  { %v600_v42 = vadd.f32 %v599_v41, %v598_v40 }
 0x1b9   :  { %v602_v44 = vmul.f32 0.001, %v600_v42  ;;  %vm604_vm9 = vcmp.gt.f32.partialorder %v600_v42, 30.0 }
 0x1ba   :  { %v605_v45 = vsel %vm604_vm9, 1.0, %v983_v8  ;;  %v606_v46 = vsel %vm604_vm9, -65.0, %v600_v42 }
 0x1bb   :  { %v603_v47 = vadd.f32 %v602_v44, %v601_v43  ;;  %v607_v48 = vmul.f32 4.0, %v605_v45  ;;  %v609_v49 = vadd.f32 %v605_v45, %v595_v36  ;;  %v610_v50 = vmul.f32 0.02, %v606_v46 }
 0x1bd   :  { %v608_v51 = vadd.f32 %v607_v48, %v603_v47  ;;  %v611_v52 = vadd.f32 3.5, %v610_v50 }
 0x1bf   :  { %v612_v53 = vmul.f32 %v611_v52, %v606_v46  ;;  %v613_v54 = vsub.f32 %v1007_v4, %v608_v51  ;;  %v615_v56 = vmul.f32 0.99, %v608_v51 }
 0x1c1   :  { %v614_v55 = vadd.f32 %v613_v54, %v612_v53 }
 0x1c3   :  { %v616_v57 = vmul.f32 0.001, %v614_v55  ;;  %vm618_vm10 = vcmp.gt.f32.partialorder %v614_v55, 30.0 }
 0x1c4   :  { %v619_v58 = vsel %vm618_vm10, 1.0, %v983_v8  ;;  %v620_v59 = vsel %vm618_vm10, -65.0, %v614_v55 }
 0x1c5   :  { %v617_v60 = vadd.f32 %v616_v57, %v615_v56  ;;  %v621_v61 = vmul.f32 4.0, %v619_v58  ;;  %v623_v62 = vadd.f32 %v619_v58, %v609_v49  ;;  %v624_v63 = vmul.f32 0.02, %v620_v59 }
 0x1c7   :  { %v622_v0 = vadd.f32 %v621_v61, %v617_v60  ;;  %v625_v1 = vadd.f32 3.5, %v624_v63 }
 0x1c9   :  { %v626_v2 = vmul.f32 %v625_v1, %v620_v59  ;;  %v627_v3 = vsub.f32 %v1007_v4, %v622_v0  ;;  %v629_v6 = vmul.f32 0.99, %v622_v0 }
 0x1cb   :  { %v628_v5 = vadd.f32 %v627_v3, %v626_v2 }
 0x1cd   :  { %v630_v7 = vmul.f32 0.001, %v628_v5  ;;  %vm632_vm11 = vcmp.gt.f32.partialorder %v628_v5, 30.0 }
 0x1ce   :  { %v633_v9 = vsel %vm632_vm11, 1.0, %v983_v8  ;;  %v634_v10 = vsel %vm632_vm11, -65.0, %v628_v5 }
 0x1cf   :  { %v631_v11 = vadd.f32 %v630_v7, %v629_v6  ;;  %v635_v12 = vmul.f32 4.0, %v633_v9  ;;  %v637_v13 = vadd.f32 %v633_v9, %v623_v62  ;;  %v638_v14 = vmul.f32 0.02, %v634_v10 }
 0x1d1   :  { %v636_v15 = vadd.f32 %v635_v12, %v631_v11  ;;  %v639_v16 = vadd.f32 3.5, %v638_v14 }
 0x1d3   :  { %v640_v17 = vmul.f32 %v639_v16, %v634_v10  ;;  %v641_v18 = vsub.f32 %v1007_v4, %v636_v15  ;;  %v643_v20 = vmul.f32 0.99, %v636_v15 }
 0x1d5   :  { %v642_v19 = vadd.f32 %v641_v18, %v640_v17 }
 0x1d7   :  { %v644_v21 = vmul.f32 0.001, %v642_v19  ;;  %vm646_vm12 = vcmp.gt.f32.partialorder %v642_v19, 30.0 }
 0x1d8   :  { %v647_v22 = vsel %vm646_vm12, 1.0, %v983_v8  ;;  %v648_v23 = vsel %vm646_vm12, -65.0, %v642_v19 }
 0x1d9   :  { %v645_v24 = vadd.f32 %v644_v21, %v643_v20  ;;  %v649_v25 = vmul.f32 4.0, %v647_v22  ;;  %v651_v26 = vadd.f32 %v647_v22, %v637_v13  ;;  %v652_v27 = vmul.f32 0.02, %v648_v23 }
 0x1db   :  { %v650_v28 = vadd.f32 %v649_v25, %v645_v24  ;;  %v653_v29 = vadd.f32 3.5, %v652_v27 }
 0x1dd   :  { %v654_v30 = vmul.f32 %v653_v29, %v648_v23  ;;  %v655_v31 = vsub.f32 %v1007_v4, %v650_v28  ;;  %v657_v33 = vmul.f32 0.99, %v650_v28 }
 0x1df   :  { %v656_v32 = vadd.f32 %v655_v31, %v654_v30 }
 0x1e1   :  { %v658_v34 = vmul.f32 0.001, %v656_v32  ;;  %vm660_vm13 = vcmp.gt.f32.partialorder %v656_v32, 30.0 }
 0x1e2   :  { %v661_v35 = vsel %vm660_vm13, 1.0, %v983_v8  ;;  %v662_v36 = vsel %vm660_vm13, -65.0, %v656_v32 }
 0x1e3   :  { %v659_v37 = vadd.f32 %v658_v34, %v657_v33  ;;  %v663_v38 = vmul.f32 4.0, %v661_v35  ;;  %v665_v39 = vadd.f32 %v661_v35, %v651_v26  ;;  %v666_v40 = vmul.f32 0.02, %v662_v36 }
 0x1e5   :  { %v664_v41 = vadd.f32 %v663_v38, %v659_v37  ;;  %v667_v42 = vadd.f32 3.5, %v666_v40 }
 0x1e7   :  { %v668_v43 = vmul.f32 %v667_v42, %v662_v36  ;;  %v669_v44 = vsub.f32 %v1007_v4, %v664_v41  ;;  %v671_v46 = vmul.f32 0.99, %v664_v41 }
 0x1e9   :  { %v670_v45 = vadd.f32 %v669_v44, %v668_v43 }
 0x1eb   :  { %v672_v47 = vmul.f32 0.001, %v670_v45  ;;  %vm674_vm14 = vcmp.gt.f32.partialorder %v670_v45, 30.0 }
 0x1ec   :  { %v675_v48 = vsel %vm674_vm14, 1.0, %v983_v8  ;;  %v676_v49 = vsel %vm674_vm14, -65.0, %v670_v45 }
 0x1ed   :  { %v673_v50 = vadd.f32 %v672_v47, %v671_v46  ;;  %v677_v51 = vmul.f32 4.0, %v675_v48  ;;  %v679_v52 = vadd.f32 %v675_v48, %v665_v39  ;;  %v680_v53 = vmul.f32 0.02, %v676_v49 }
 0x1ef   :  { %v678_v54 = vadd.f32 %v677_v51, %v673_v50  ;;  %v681_v55 = vadd.f32 3.5, %v680_v53 }
 0x1f1   :  { %v682_v56 = vmul.f32 %v681_v55, %v676_v49  ;;  %v683_v57 = vsub.f32 %v1007_v4, %v678_v54  ;;  %v685_v59 = vmul.f32 0.99, %v678_v54 }
 0x1f3   :  { %v684_v58 = vadd.f32 %v683_v57, %v682_v56 }
 0x1f5   :  { %v686_v60 = vmul.f32 0.001, %v684_v58  ;;  %vm688_vm15 = vcmp.gt.f32.partialorder %v684_v58, 30.0 }
 0x1f6   :  { %v689_v61 = vsel %vm688_vm15, 1.0, %v983_v8  ;;  %v690_v62 = vsel %vm688_vm15, -65.0, %v684_v58 }
 0x1f7   :  { %v687_v63 = vadd.f32 %v686_v60, %v685_v59  ;;  %v691_v0 = vmul.f32 4.0, %v689_v61  ;;  %v693_v1 = vadd.f32 %v689_v61, %v679_v52  ;;  %v694_v2 = vmul.f32 0.02, %v690_v62 }
 0x1f9   :  { %v692_v3 = vadd.f32 %v691_v0, %v687_v63  ;;  %v695_v5 = vadd.f32 3.5, %v694_v2 }
 0x1fb   :  { %v696_v6 = vmul.f32 %v695_v5, %v690_v62  ;;  %v697_v7 = vsub.f32 %v1007_v4, %v692_v3  ;;  %v699_v10 = vmul.f32 0.99, %v692_v3 }
 0x1fd   :  { %v698_v9 = vadd.f32 %v697_v7, %v696_v6 }
 0x1ff   :  { %v700_v11 = vmul.f32 0.001, %v698_v9  ;;  %vm702_vm0 = vcmp.gt.f32.partialorder %v698_v9, 30.0 }
 0x200   :  { %v703_v12 = vsel %vm702_vm0, 1.0, %v983_v8  ;;  %v704_v13 = vsel %vm702_vm0, -65.0, %v698_v9 }
 0x201   :  { %v701_v14 = vadd.f32 %v700_v11, %v699_v10  ;;  %v705_v15 = vmul.f32 4.0, %v703_v12  ;;  %v707_v16 = vadd.f32 %v703_v12, %v693_v1  ;;  %v708_v17 = vmul.f32 0.02, %v704_v13 }
 0x203   :  { %v706_v18 = vadd.f32 %v705_v15, %v701_v14  ;;  %v709_v19 = vadd.f32 3.5, %v708_v17 }
 0x205   :  { %v710_v20 = vmul.f32 %v709_v19, %v704_v13  ;;  %v711_v21 = vsub.f32 %v1007_v4, %v706_v18  ;;  %v713_v23 = vmul.f32 0.99, %v706_v18 }
 0x207   :  { %v712_v22 = vadd.f32 %v711_v21, %v710_v20 }
 0x209   :  { %v714_v24 = vmul.f32 0.001, %v712_v22  ;;  %vm716_vm1 = vcmp.gt.f32.partialorder %v712_v22, 30.0 }
 0x20a   :  { %v717_v25 = vsel %vm716_vm1, 1.0, %v983_v8  ;;  %v718_v26 = vsel %vm716_vm1, -65.0, %v712_v22 }
 0x20b   :  { %v715_v27 = vadd.f32 %v714_v24, %v713_v23  ;;  %v719_v28 = vmul.f32 4.0, %v717_v25  ;;  %v721_v29 = vadd.f32 %v717_v25, %v707_v16  ;;  %v722_v30 = vmul.f32 0.02, %v718_v26 }
 0x20d   :  { %v720_v31 = vadd.f32 %v719_v28, %v715_v27  ;;  %v723_v32 = vadd.f32 3.5, %v722_v30 }
 0x20f   :  { %v724_v33 = vmul.f32 %v723_v32, %v718_v26  ;;  %v725_v34 = vsub.f32 %v1007_v4, %v720_v31  ;;  %v727_v36 = vmul.f32 0.99, %v720_v31 }
 0x211   :  { %v726_v35 = vadd.f32 %v725_v34, %v724_v33 }
 0x213   :  { %v728_v37 = vmul.f32 0.001, %v726_v35  ;;  %vm730_vm2 = vcmp.gt.f32.partialorder %v726_v35, 30.0 }
 0x214   :  { %v731_v38 = vsel %vm730_vm2, 1.0, %v983_v8  ;;  %v732_v39 = vsel %vm730_vm2, -65.0, %v726_v35 }
 0x215   :  { %v729_v40 = vadd.f32 %v728_v37, %v727_v36  ;;  %v733_v41 = vmul.f32 4.0, %v731_v38  ;;  %v735_v42 = vadd.f32 %v731_v38, %v721_v29  ;;  %v736_v43 = vmul.f32 0.02, %v732_v39 }
 0x217   :  { %v734_v44 = vadd.f32 %v733_v41, %v729_v40  ;;  %v737_v45 = vadd.f32 3.5, %v736_v43 }
 0x219   :  { %v738_v46 = vmul.f32 %v737_v45, %v732_v39  ;;  %v739_v47 = vsub.f32 %v1007_v4, %v734_v44  ;;  %v741_v49 = vmul.f32 0.99, %v734_v44 }
 0x21b   :  { %v740_v48 = vadd.f32 %v739_v47, %v738_v46 }
 0x21d   :  { %v742_v50 = vmul.f32 0.001, %v740_v48  ;;  %vm744_vm3 = vcmp.gt.f32.partialorder %v740_v48, 30.0 }
 0x21e   :  { %v745_v51 = vsel %vm744_vm3, 1.0, %v983_v8  ;;  %v746_v52 = vsel %vm744_vm3, -65.0, %v740_v48 }
 0x21f   :  { %v743_v53 = vadd.f32 %v742_v50, %v741_v49  ;;  %v747_v54 = vmul.f32 4.0, %v745_v51  ;;  %v749_v55 = vadd.f32 %v745_v51, %v735_v42  ;;  %v750_v56 = vmul.f32 0.02, %v746_v52 }
 0x221   :  { %v748_v57 = vadd.f32 %v747_v54, %v743_v53  ;;  %v751_v58 = vadd.f32 3.5, %v750_v56 }
 0x223   :  { %v752_v59 = vmul.f32 %v751_v58, %v746_v52  ;;  %v753_v60 = vsub.f32 %v1007_v4, %v748_v57  ;;  %v755_v62 = vmul.f32 0.99, %v748_v57 }
 0x225   :  { %v754_v61 = vadd.f32 %v753_v60, %v752_v59 }
 0x227   :  { %v756_v63 = vmul.f32 0.001, %v754_v61  ;;  %vm758_vm4 = vcmp.gt.f32.partialorder %v754_v61, 30.0 }
 0x228   :  { %v759_v0 = vsel %vm758_vm4, 1.0, %v983_v8  ;;  %v760_v1 = vsel %vm758_vm4, -65.0, %v754_v61 }
 0x229   :  { %v757_v2 = vadd.f32 %v756_v63, %v755_v62  ;;  %v761_v3 = vmul.f32 4.0, %v759_v0  ;;  %v763_v5 = vadd.f32 %v759_v0, %v749_v55  ;;  %v764_v6 = vmul.f32 0.02, %v760_v1 }
 0x22b   :  { %v762_v7 = vadd.f32 %v761_v3, %v757_v2  ;;  %v765_v9 = vadd.f32 3.5, %v764_v6 }
 0x22d   :  { %v766_v10 = vmul.f32 %v765_v9, %v760_v1  ;;  %v767_v11 = vsub.f32 %v1007_v4, %v762_v7  ;;  %v769_v13 = vmul.f32 0.99, %v762_v7 }
 0x22f   :  { %v768_v12 = vadd.f32 %v767_v11, %v766_v10 }
 0x231   :  { %v770_v14 = vmul.f32 0.001, %v768_v12  ;;  %vm772_vm5 = vcmp.gt.f32.partialorder %v768_v12, 30.0 }
 0x232   :  { %v773_v15 = vsel %vm772_vm5, 1.0, %v983_v8  ;;  %v774_v16 = vsel %vm772_vm5, -65.0, %v768_v12 }
 0x233   :  { %v771_v17 = vadd.f32 %v770_v14, %v769_v13  ;;  %v775_v18 = vmul.f32 4.0, %v773_v15  ;;  %v777_v19 = vadd.f32 %v773_v15, %v763_v5  ;;  %v778_v20 = vmul.f32 0.02, %v774_v16 }
 0x235   :  { %v776_v21 = vadd.f32 %v775_v18, %v771_v17  ;;  %v779_v22 = vadd.f32 3.5, %v778_v20 }
 0x237   :  { %v780_v23 = vmul.f32 %v779_v22, %v774_v16  ;;  %v781_v24 = vsub.f32 %v1007_v4, %v776_v21  ;;  %v783_v26 = vmul.f32 0.99, %v776_v21 }
 0x239   :  { %v782_v25 = vadd.f32 %v781_v24, %v780_v23 }
 0x23b   :  { %v784_v27 = vmul.f32 0.001, %v782_v25  ;;  %vm786_vm6 = vcmp.gt.f32.partialorder %v782_v25, 30.0 }
 0x23c   :  { %v787_v28 = vsel %vm786_vm6, 1.0, %v983_v8  ;;  %v788_v29 = vsel %vm786_vm6, -65.0, %v782_v25 }
 0x23d   :  { %v785_v30 = vadd.f32 %v784_v27, %v783_v26  ;;  %v789_v31 = vmul.f32 4.0, %v787_v28  ;;  %v791_v32 = vadd.f32 %v787_v28, %v777_v19  ;;  %v792_v33 = vmul.f32 0.02, %v788_v29 }
 0x23f   :  { %v790_v34 = vadd.f32 %v789_v31, %v785_v30  ;;  %v793_v35 = vadd.f32 3.5, %v792_v33 }
 0x241   :  { %v794_v36 = vmul.f32 %v793_v35, %v788_v29  ;;  %v795_v37 = vsub.f32 %v1007_v4, %v790_v34  ;;  %v797_v39 = vmul.f32 0.99, %v790_v34 }
 0x243   :  { %v796_v38 = vadd.f32 %v795_v37, %v794_v36 }
 0x245   :  { %v798_v40 = vmul.f32 0.001, %v796_v38  ;;  %vm800_vm7 = vcmp.gt.f32.partialorder %v796_v38, 30.0 }
 0x246   :  { %v801_v41 = vsel %vm800_vm7, 1.0, %v983_v8  ;;  %v802_v42 = vsel %vm800_vm7, -65.0, %v796_v38 }
 0x247   :  { %v799_v43 = vadd.f32 %v798_v40, %v797_v39  ;;  %v803_v44 = vmul.f32 4.0, %v801_v41  ;;  %v1121_v45 = vadd.f32 %v801_v41, %v791_v32  ;;  %v806_v46 = vmul.f32 0.02, %v802_v42 }
 0x249   :  { %v804_v47 = vadd.f32 %v803_v44, %v799_v43  ;;  %v807_v48 = vadd.f32 3.5, %v806_v46 }
 0x24b   :  { %v808_v49 = vmul.f32 %v807_v48, %v802_v42  ;;  %v809_v50 = vsub.f32 %v1007_v4, %v804_v47  ;;  %v811_v52 = vmul.f32 0.99, %v804_v47 }
 0x24d   :  { %v810_v51 = vadd.f32 %v809_v50, %v808_v49 }
 0x24f   :  { %v812_v53 = vmul.f32 0.001, %v810_v51  ;;  %vm814_vm8 = vcmp.gt.f32.partialorder %v810_v51, 30.0 }
 0x250   :  { %v815_v54 = vsel %vm814_vm8, 1.0, %v983_v8  ;;  %v816_v55 = vsel %vm814_vm8, -65.0, %v810_v51 }
 0x251   :  { %v813_v56 = vadd.f32 %v812_v53, %v811_v52  ;;  %v817_v57 = vmul.f32 4.0, %v815_v54  ;;  %v820_v58 = vmul.f32 0.02, %v816_v55  ;;  %v819_v46 = vadd.f32 %v815_v54, %v1121_v45 }
 0x253   :  { %v818_v59 = vadd.f32 %v817_v57, %v813_v56  ;;  %v821_v60 = vadd.f32 3.5, %v820_v58 }
 0x255   :  { %v822_v61 = vmul.f32 %v821_v60, %v816_v55  ;;  %v823_v62 = vsub.f32 %v1007_v4, %v818_v59  ;;  %v825_v0 = vmul.f32 0.99, %v818_v59 }
 0x257   :  { %v824_v63 = vadd.f32 %v823_v62, %v822_v61 }
 0x259   :  { %v826_v1 = vmul.f32 0.001, %v824_v63  ;;  %vm828_vm9 = vcmp.gt.f32.partialorder %v824_v63, 30.0 }
 0x25a   :  { %v829_v2 = vsel %vm828_vm9, 1.0, %v983_v8  ;;  %v830_v3 = vsel %vm828_vm9, -65.0, %v824_v63 }
 0x25b   :  { %v827_v5 = vadd.f32 %v826_v1, %v825_v0  ;;  %v831_v6 = vmul.f32 4.0, %v829_v2  ;;  %v834_v7 = vmul.f32 0.02, %v830_v3  ;;  %v833_v51 = vadd.f32 %v829_v2, %v819_v46 }
 0x25d   :  { %v832_v9 = vadd.f32 %v831_v6, %v827_v5  ;;  %v835_v10 = vadd.f32 3.5, %v834_v7 }
 0x25f   :  { %v836_v11 = vmul.f32 %v835_v10, %v830_v3  ;;  %v837_v12 = vsub.f32 %v1007_v4, %v832_v9  ;;  %v839_v14 = vmul.f32 0.99, %v832_v9 }
 0x261   :  { %v838_v13 = vadd.f32 %v837_v12, %v836_v11 }
 0x263   :  { %v840_v15 = vmul.f32 0.001, %v838_v13  ;;  %vm842_vm10 = vcmp.gt.f32.partialorder %v838_v13, 30.0 }
 0x264   :  { %v843_v16 = vsel %vm842_vm10, 1.0, %v983_v8  ;;  %v844_v17 = vsel %vm842_vm10, -65.0, %v838_v13 }
 0x265   :  { %v841_v18 = vadd.f32 %v840_v15, %v839_v14  ;;  %v845_v19 = vmul.f32 4.0, %v843_v16  ;;  %v848_v20 = vmul.f32 0.02, %v844_v17  ;;  %v847_v58 = vadd.f32 %v843_v16, %v833_v51 }
 0x267   :  { %v846_v21 = vadd.f32 %v845_v19, %v841_v18  ;;  %v849_v22 = vadd.f32 3.5, %v848_v20 }
 0x269   :  { %v850_v23 = vmul.f32 %v849_v22, %v844_v17  ;;  %v851_v24 = vsub.f32 %v1007_v4, %v846_v21  ;;  %v853_v26 = vmul.f32 0.99, %v846_v21 }
 0x26b   :  { %v852_v25 = vadd.f32 %v851_v24, %v850_v23 }
 0x26d   :  { %v854_v27 = vmul.f32 0.001, %v852_v25  ;;  %vm856_vm11 = vcmp.gt.f32.partialorder %v852_v25, 30.0 }
 0x26e   :  { %v857_v28 = vsel %vm856_vm11, 1.0, %v983_v8  ;;  %v858_v29 = vsel %vm856_vm11, -65.0, %v852_v25 }
 0x26f   :  { %v855_v30 = vadd.f32 %v854_v27, %v853_v26  ;;  %v859_v31 = vmul.f32 4.0, %v857_v28  ;;  %v862_v32 = vmul.f32 0.02, %v858_v29  ;;  %v861_v45 = vadd.f32 %v857_v28, %v847_v58 }
 0x271   :  { %v860_v33 = vadd.f32 %v859_v31, %v855_v30  ;;  %v863_v34 = vadd.f32 3.5, %v862_v32 }
 0x273   :  { %v864_v35 = vmul.f32 %v863_v34, %v858_v29  ;;  %v865_v36 = vsub.f32 %v1007_v4, %v860_v33  ;;  %v867_v38 = vmul.f32 0.99, %v860_v33 }
 0x275   :  { %v866_v37 = vadd.f32 %v865_v36, %v864_v35 }
 0x277   :  { %v868_v39 = vmul.f32 0.001, %v866_v37  ;;  %vm870_vm12 = vcmp.gt.f32.partialorder %v866_v37, 30.0 }
 0x278   :  { %v871_v40 = vsel %vm870_vm12, 1.0, %v983_v8  ;;  %v872_v41 = vsel %vm870_vm12, -65.0, %v866_v37 }
 0x279   :  { %v869_v42 = vadd.f32 %v868_v39, %v867_v38  ;;  %v873_v43 = vmul.f32 4.0, %v871_v40  ;;  %v876_v44 = vmul.f32 0.02, %v872_v41  ;;  %v875_v2 = vadd.f32 %v871_v40, %v861_v45 }
 0x27b   :  { %v874_v47 = vadd.f32 %v873_v43, %v869_v42  ;;  %v877_v48 = vadd.f32 3.5, %v876_v44 }
 0x27d   :  { %v878_v49 = vmul.f32 %v877_v48, %v872_v41  ;;  %v879_v50 = vsub.f32 %v1007_v4, %v874_v47  ;;  %v881_v53 = vmul.f32 0.99, %v874_v47 }
 0x27f   :  { %v880_v52 = vadd.f32 %v879_v50, %v878_v49 }
 0x281   :  { %v882_v55 = vmul.f32 0.001, %v880_v52  ;;  %vm884_vm13 = vcmp.gt.f32.partialorder %v880_v52, 30.0 }
 0x282   :  { %v885_v56 = vsel %vm884_vm13, 1.0, %v983_v8  ;;  %v886_v57 = vsel %vm884_vm13, -65.0, %v880_v52 }
 0x283   :  { %v883_v59 = vadd.f32 %v882_v55, %v881_v53  ;;  %v887_v60 = vmul.f32 4.0, %v885_v56  ;;  %v890_v61 = vmul.f32 0.02, %v886_v57  ;;  %v889_v12 = vadd.f32 %v885_v56, %v875_v2 }
 0x285   :  { %v888_v62 = vadd.f32 %v887_v60, %v883_v59  ;;  %v891_v63 = vadd.f32 3.5, %v890_v61 }
 0x287   :  { %v892_v54 = vmul.f32 %v891_v63, %v886_v57  ;;  %v893_v0 = vsub.f32 %v1007_v4, %v888_v62  ;;  %v895_v3 = vmul.f32 0.99, %v888_v62 }
 0x289   :  { %v894_v1 = vadd.f32 %v893_v0, %v892_v54 }
 0x28b   :  { %v896_v5 = vmul.f32 0.001, %v894_v1  ;;  %vm898_vm14 = vcmp.gt.f32.partialorder %v894_v1, 30.0 }
 0x28c   :  { %v899_v6 = vsel %vm898_vm14, 1.0, %v983_v8  ;;  %v900_v7 = vsel %vm898_vm14, -65.0, %v894_v1 }
 0x28d   :  { %v897_v9 = vadd.f32 %v896_v5, %v895_v3  ;;  %v901_v10 = vmul.f32 4.0, %v899_v6  ;;  %v904_v11 = vmul.f32 0.02, %v900_v7  ;;  %v903_v17 = vadd.f32 %v899_v6, %v889_v12 }
 0x28f   :  { %v902_v13 = vadd.f32 %v901_v10, %v897_v9  ;;  %v905_v14 = vadd.f32 3.5, %v904_v11 }
 0x291   :  { %v906_v15 = vmul.f32 %v905_v14, %v900_v7  ;;  %v907_v16 = vsub.f32 %v1007_v4, %v902_v13 }
 0x293   :  { %v908_v18 = vadd.f32 %v907_v16, %v906_v15 }
 0x295   :  { %vm909_vm15 = vcmp.gt.f32.partialorder %v908_v18, 30.0 }
 0x296   :  { %v910_v19 = vsel %vm909_vm15, 1.0, %v983_v8 }
 0x297   :  { %v911_v20 = vadd.f32 %v910_v19, %v903_v17 }
 0x299   :  { %v912_v21 = vmul.f32 0.015625, %v911_v20 }
 0x29b   :  { %913 = vst [vmem:[#allocation5] sm:$0xff] %v912_v21 }
 0x29c   :  { %967 = shalt.err (!%p964_p12)
}
 0x29d   :  { %s968_s22 = scalar_lea.hbm %s1153_s1, 128 }
 0x29e   :  { %p969_p13 = scmp.ne.s32.totalorder %s1153_s1, %s968_s22  ;;  %p972_p0 = scmp.lt.u32.totalorder %s968_s22, %s1153_s1 }
 0x2a0   :  { %p974_p1 = pnand %p972_p0, %p969_p13 }
 0x2a2   :  { %977 = shalt.err (!%p974_p1)
}
 0x2a3   :  { %923 = dma.vmem_to_hbm [thread:$0]  %s921_s18, 128, %s1153_s1, [#allocation4]  }
 0x2a4   :  { %980 = dma.done.wait [#allocation4], 128  }
 0x2a5   :  { %981 = vsyncadd [#allocation4], 4294967168 }
 0x2a6   :  { %927 = vsyncpa [#allocation3], 1 }
 0x2a7   :  { %928 = vsyncpa [#allocation4], 1 }

</bundles_post_ra>
